<compile_context>
chip_gen: v7x
topology: tpu7x:2x2x1
jax: 0.10.0
libtpu: 0.0.40
codegen_flags: <defaults>
</compile_context>

<pallas_src>
import functools

import jax
import jax.numpy as jnp
from jax.experimental import pallas as pl
from jax.experimental.pallas import tpu as pltpu

K_SIZE = 4
STRIDE = 2
BN_EPS = 1e-5


# ---------------------------------------------------------------------------
# Pallas kernels (all grid-less, whole layer VMEM-resident)
# ---------------------------------------------------------------------------
def _bn_block_kernel(w_ref, x_ref, b_ref, g_ref, bt_ref, o_ref):
    """ConvTranspose phase-matmul + bias + BatchNorm(train) + ReLU.

    w_ref : (4*Cout, 4*Cin)   x_ref : (4*Cin, M)   b_ref : (4*Cout, 1)
    g_ref / bt_ref : (Cout, 1)        o_ref : (4*Cout, M) phase-major rows.
    """
    cout = g_ref.shape[0]
    m = x_ref.shape[-1]
    y = jnp.dot(w_ref[...], x_ref[...], preferred_element_type=jnp.float32)
    y = y + b_ref[...]

    # Channel co occupies rows {co, Cout+co, 2Cout+co, 3Cout+co}; together they
    # cover every output position exactly once -> single-pass batch statistics.
    # Per-phase accumulation keeps only (Cout, 1) partials live (vreg pressure).
    s = jnp.zeros((cout, 1), jnp.float32)
    ss = jnp.zeros((cout, 1), jnp.float32)
    for i in range(4):
        p = y[i * cout:(i + 1) * cout, :]
        s = s + jnp.sum(p, axis=1, keepdims=True)
        ss = ss + jnp.sum(p * p, axis=1, keepdims=True)

    inv_n = 1.0 / (4.0 * m)
    mean = s * inv_n
    var = jnp.maximum(ss * inv_n - mean * mean, 0.0)   # clamp single-pass variance
    scale = g_ref[...] * jax.lax.rsqrt(var + BN_EPS)
    shift = bt_ref[...] - mean * scale
    for i in range(4):
        p = y[i * cout:(i + 1) * cout, :]
        o_ref[i * cout:(i + 1) * cout, :] = jnp.maximum(p * scale + shift, 0.0)


def _bn_block_t_kernel(x_ref, w_ref, b_ref, g_ref, bt_ref, o_ref):
    """Transposed orientation for small-M layers (lane-dense (M, 4*Cout) output).

    x_ref : (M, 4*Cin)   w_ref : (4*Cin, 4*Cout)   b_ref : (1, 4*Cout)
    g_ref / bt_ref : (1, Cout)        o_ref : (M, 4*Cout) phase-major columns.
    """
    cout = g_ref.shape[1]
    m = x_ref.shape[0]
    y = jnp.dot(x_ref[...], w_ref[...], preferred_element_type=jnp.float32)
    y = y + b_ref[...]

    sp = jnp.sum(y, axis=0, keepdims=True)        # (1, 4*Cout)
    ssp = jnp.sum(y * y, axis=0, keepdims=True)
    s = (sp[:, 0:cout] + sp[:, cout:2 * cout]
         + sp[:, 2 * cout:3 * cout] + sp[:, 3 * cout:4 * cout])
    ss = (ssp[:, 0:cout] + ssp[:, cout:2 * cout]
          + ssp[:, 2 * cout:3 * cout] + ssp[:, 3 * cout:4 * cout])

    inv_n = 1.0 / (4.0 * m)
    mean = s * inv_n
    var = jnp.maximum(ss * inv_n - mean * mean, 0.0)
    scale = g_ref[...] * jax.lax.rsqrt(var + BN_EPS)   # (1, Cout)
    shift = bt_ref[...] - mean * scale
    scale4 = jnp.concatenate([scale, scale, scale, scale], axis=1)
    shift4 = jnp.concatenate([shift, shift, shift, shift], axis=1)
    o_ref[...] = jnp.maximum(y * scale4 + shift4, 0.0)


def _final_block_kernel(w_ref, x_ref, b_ref, o_ref):
    """Final block: ConvTranspose phase-matmul + bias + Tanh (no BN)."""
    y = jnp.dot(w_ref[...], x_ref[...], preferred_element_type=jnp.float32)
    o_ref[...] = jnp.tanh(y + b_ref[...])


# ---------------------------------------------------------------------------
# pallas_call wrappers
# ---------------------------------------------------------------------------
def _vmem_spec():
    return pl.BlockSpec(memory_space=pltpu.MemorySpace.VMEM)


def bn_block(w, xp, b, gamma, beta):
    """Standard orientation: (4*Cout, 4*Cin) @ (4*Cin, M) -> (4*Cout, M)."""
    four_cout, four_cin = w.shape
    m = xp.shape[1]
    cout = four_cout // 4
    cost = pl.CostEstimate(
        flops=2 * four_cout * four_cin * m + 10 * four_cout * m,
        transcendentals=cout,
        bytes_accessed=4 * (w.size + xp.size + b.size + gamma.size + beta.size
                            + four_cout * m),
    )
    # TODO(synk): on v7x, a channel-major (4*co + phase) row layout would let a
    # Cout-parallel grid shard the BN blocks across both TensorCores.
    return pl.pallas_call(
        _bn_block_kernel,
        out_shape=jax.ShapeDtypeStruct((four_cout, m), jnp.float32),
        in_specs=[_vmem_spec()] * 5,
        out_specs=_vmem_spec(),
        cost_estimate=cost,
    )(w, xp, b, gamma, beta)


def bn_block_t(xp_t, w_t, b_row, gamma_row, beta_row):
    """Transposed orientation: (M, 4*Cin) @ (4*Cin, 4*Cout) -> (M, 4*Cout)."""
    m, four_cin = xp_t.shape
    four_cout = w_t.shape[1]
    cout = four_cout // 4
    cost = pl.CostEstimate(
        flops=2 * m * four_cin * four_cout + 10 * m * four_cout,
        transcendentals=cout,
        bytes_accessed=4 * (xp_t.size + w_t.size + b_row.size + gamma_row.size
                            + beta_row.size + m * four_cout),
    )
    return pl.pallas_call(
        _bn_block_t_kernel,
        out_shape=jax.ShapeDtypeStruct((m, four_cout), jnp.float32),
        in_specs=[_vmem_spec()] * 5,
        out_specs=_vmem_spec(),
        cost_estimate=cost,
    )(xp_t, w_t, b_row, gamma_row, beta_row)


def final_block(w, xp, b):
    four_cout, four_cin = w.shape
    m = xp.shape[1]
    cost = pl.CostEstimate(
        flops=2 * four_cout * four_cin * m + 2 * four_cout * m,
        transcendentals=four_cout * m,                      # tanh
        bytes_accessed=4 * (w.size + xp.size + b.size + four_cout * m),
    )
    # TODO(synk): on v7x (2 TensorCores) re-introduce an M-tiled parallel grid
    # here with tm sized against 64 MiB VMEM; grid-less is optimal on v5e/v6e.
    return pl.pallas_call(
        _final_block_kernel,
        out_shape=jax.ShapeDtypeStruct((four_cout, m), jnp.float32),
        in_specs=[_vmem_spec()] * 3,
        out_specs=_vmem_spec(),
        cost_estimate=cost,
    )(w, xp, b)


# ---------------------------------------------------------------------------
# Thin XLA glue: layout plumbing only (pad / static slices / transpose / concat)
# ---------------------------------------------------------------------------
def use_transposed(m):
    """Use the (M, 4*Cout) orientation when the column count is lane-sparse."""
    return m < 128


def chw_to_patches(a, transposed=False):
    """Channel-major activation (C, N, H, W) -> patch matrix.

    Standard: (4*C, M) with row (2a+b)*C + c, column (n, p, q) holding
    x[n, c, p-a, q-b] (zero outside bounds), M = N*(H+1)*(W+1).
    Transposed: the (M, 4*C) transpose, built directly so XLA fuses it."""
    c, n, h, w = a.shape
    hp, wp = h + 1, w + 1
    apad = jnp.pad(a, ((0, 0), (0, 0), (1, 1), (1, 1)))
    taps = []
    for ta in range(2):
        for tb in range(2):
            t = apad[:, :, 1 - ta:1 - ta + hp, 1 - tb:1 - tb + wp]  # (C,N,Hp,Wp)
            t = t.reshape(c, n * hp * wp)
            taps.append(t.T if transposed else t)
    return jnp.concatenate(taps, axis=1 if transposed else 0)


def phases_to_chw(y, n, cout, hp, wp):
    """(4*Cout, N*Hp*Wp) phase-major -> channel-major (Cout, N, 2*Hp, 2*Wp)."""
    y = y.reshape(2, 2, cout, n, hp, wp)      # (r, s, co, n, p, q)
    y = y.transpose(2, 3, 4, 0, 5, 1)         # (co, n, p, r, q, s)
    return y.reshape(cout, n, 2 * hp, 2 * wp)


def reorg_weight(w):
    """PyTorch ConvTranspose2d weight (Cin, Cout, 4, 4) -> (4*Cout, 4*Cin)
    with W[(2r+s)*Cout + co, (2a+b)*Cin + cin] = w[cin, co, r+2a, s+2b]."""
    cin, cout = w.shape[:2]
    wr = w.reshape(cin, cout, 2, 2, 2, 2)   # (cin, co, a, r, b, s); kh=2a+r, kw=2b+s
    wr = wr.transpose(3, 5, 1, 2, 4, 0)     # (r, s, co, a, b, cin)
    return wr.reshape(4 * cout, 4 * cin)


def prepare_params(params, batch):
    """One-time reorganisation of PyTorch-layout params into the fused layout
    (no per-forward casts/transposes).  For bf16 MXU operands at production
    sizes, cast the reorganised weights here once."""
    prepped = []
    h = 1
    for p in params:
        cout = p["w"].shape[1]
        m = batch * (h + 1) * (h + 1)
        w_std = reorg_weight(p["w"])
        final = "gamma" not in p
        if (not final) and use_transposed(m):
            q = {"w": w_std.T,                                   # (4*Cin, 4*Cout)
                 "b": jnp.tile(p["b"], 4).reshape(1, 4 * cout),
                 "gamma": p["gamma"].reshape(1, cout),
                 "beta": p["beta"].reshape(1, cout)}
        else:
            q = {"w": w_std,                                     # (4*Cout, 4*Cin)
                 "b": jnp.tile(p["b"], 4).reshape(4 * cout, 1)}
            if not final:
                q["gamma"] = p["gamma"].reshape(cout, 1)
                q["beta"] = p["beta"].reshape(cout, 1)
        prepped.append(q)
        h = 2 * h + 2
    return prepped


# ---------------------------------------------------------------------------
# Parameter init (deterministic, synthetic) and full forward
# ---------------------------------------------------------------------------
def init_params(key, z_dim, im_chan, hidden_dim):
    chans = [z_dim, hidden_dim * 8, hidden_dim * 4, hidden_dim * 2, hidden_dim, im_chan]
    params = []
    for i in range(5):
        key, k1, k2, k3, k4 = jax.random.split(key, 5)
        cin, cout = chans[i], chans[i + 1]
        p = {
            "w": 0.05 * jax.random.normal(k1, (cin, cout, K_SIZE, K_SIZE), jnp.float32),
            "b": 0.05 * jax.random.normal(k2, (cout,), jnp.float32),
        }
        if i < 4:  # BN params only for non-final blocks
            p["gamma"] = 1.0 + 0.1 * jax.random.normal(k3, (cout,), jnp.float32)
            p["beta"] = 0.1 * jax.random.normal(k4, (cout,), jnp.float32)
        params.append(p)
    return params


def vowel_generator_forward(noise, prepped, z_dim):
    nb = noise.shape[0]
    # Channel-major activations (C, N, H, W) end-to-end; noise -> (z, N, 1, 1).
    a = noise.T.reshape(z_dim, nb, 1, 1)
    last = len(prepped) - 1
    # TODO(synk): fusing all five layers into one pallas_call would require the
    # phase->spatial interleave (lane-crossing reshape) to run in-kernel, which
    # Mosaic does not lower cleanly; the relayout stays as thin XLA glue below.
    for i, p in enumerate(prepped):
        _, _, h, w = a.shape
        hp, wp = h + 1, w + 1
        m = nb * hp * wp
        if i == last:
            cout = p["w"].shape[0] // 4
            y = final_block(p["w"], chw_to_patches(a), p["b"])
        elif use_transposed(m):
            cout = p["w"].shape[1] // 4
            y_t = bn_block_t(chw_to_patches(a, transposed=True),
                             p["w"], p["b"], p["gamma"], p["beta"])
            y = y_t.T                                # tiny; fuses into relayout
        else:
            cout = p["w"].shape[0] // 4
            y = bn_block(p["w"], chw_to_patches(a), p["b"], p["gamma"], p["beta"])
        a = phases_to_chw(y, nb, cout, hp, wp)       # XLA glue: reshape/transpose
    return a.transpose(1, 0, 2, 3)                   # -> NCHW


# ---------------------------------------------------------------------------
# Pure-JAX reference (faithful to the PyTorch module, training-mode BN)
# ---------------------------------------------------------------------------
def _ref_conv_transpose2d(x, w, b):
    nb, cin, hin, win = x.shape
    _, cout, kh_, kw_ = w.shape
    hout = (hin - 1) * STRIDE + kh_
    wout = (win - 1) * STRIDE + kw_
    x_flat = x.transpose(0, 2, 3, 1).reshape(nb * hin * win, cin)
    cols = (x_flat @ w.reshape(cin, cout * kh_ * kw_)).reshape(nb, hin, win, cout, kh_, kw_)
    out = jnp.zeros((nb, cout, hout, wout), jnp.float32)
    for kh in range(kh_):
        for kw in range(kw_):
            contrib = cols[:, :, :, :, kh, kw].transpose(0, 3, 1, 2)
            out = out.at[:, :, kh:kh + STRIDE * hin:STRIDE,
                         kw:kw + STRIDE * win:STRIDE].add(contrib)
    return out + b.reshape(1, cout, 1, 1)


def _reference_forward(noise, params, z_dim):
    x = noise.reshape(noise.shape[0], z_dim, 1, 1)
    for i, p in enumerate(params):
        y = _ref_conv_transpose2d(x, p["w"], p["b"])
        if i == len(params) - 1:
            x = jnp.tanh(y)
        else:
            nb, c, h, w = y.shape
            y2 = y.transpose(0, 2, 3, 1).reshape(-1, c)
            mean = jnp.mean(y2, axis=0)
            var = jnp.mean((y2 - mean) ** 2, axis=0)
            yn = (y2 - mean) / jnp.sqrt(var + BN_EPS) * p["gamma"] + p["beta"]
            x = jnp.maximum(yn, 0.0).reshape(nb, h, w, c).transpose(0, 3, 1, 2)
    return x


if __name__ == "__main__":
    # Small shapes consistent with the module: z_dim=8, hidden_dim=8, im_chan=1,
    # batch=2. Spatial growth (k=4, s=2, p=0): 1 -> 4 -> 10 -> 22 -> 46 -> 94.
    Z_DIM, HIDDEN_DIM, IM_CHAN, BATCH = 8, 8, 1, 2

    key = jax.random.PRNGKey(0)
    key_noise, key_params = jax.random.split(key)
    noise = jax.random.normal(key_noise, (BATCH, Z_DIM), jnp.float32)
    params = init_params(key_params, Z_DIM, IM_CHAN, HIDDEN_DIM)
    prepped = prepare_params(params, BATCH)

    fwd = jax.jit(functools.partial(vowel_generator_forward, z_dim=Z_DIM))
    out = jax.block_until_ready(fwd(noise, prepped))

    assert out.shape == (BATCH, IM_CHAN, 94, 94), out.shape
    assert bool(jnp.all(jnp.isfinite(out)))

    # Correctness check against the pure-JAX reference of the PyTorch module.
    ref = _reference_forward(noise, params, Z_DIM)
    err = float(jnp.max(jnp.abs(out - ref)))
    assert err < 1e-3, f"max abs error vs reference: {err}"

    print("KERNEL_OK")
</pallas_src>

<mosaic_0001>
module attributes {stable_mosaic.version = 11 : i64} {
  func.func @_bn_block_t_kernel(%arg0: memref<8x32xf32, #tpu.memory_space<vmem>>, %arg1: memref<32x256xf32, #tpu.memory_space<vmem>>, %arg2: memref<1x256xf32, #tpu.memory_space<vmem>>, %arg3: memref<1x64xf32, #tpu.memory_space<vmem>>, %arg4: memref<1x64xf32, #tpu.memory_space<vmem>>, %arg5: memref<8x256xf32, #tpu.memory_space<vmem>>) attributes {dimension_semantics = [], scalar_prefetch = 0 : i64, scratch_operands = 0 : i64, tpu.core_type = #tpu.core_type<tc>} {
    %c0 = arith.constant 0 : index
    %c0_0 = arith.constant 0 : index
    %0 = vector.load %arg0[%c0, %c0_0] : memref<8x32xf32, #tpu.memory_space<vmem>>, vector<8x32xf32>
    %c0_1 = arith.constant 0 : index
    %c0_2 = arith.constant 0 : index
    %1 = vector.load %arg1[%c0_1, %c0_2] : memref<32x256xf32, #tpu.memory_space<vmem>>, vector<32x256xf32>
    %cst = arith.constant dense<0.000000e+00> : vector<8x256xf32>
    %2 = tpu.matmul %0, %1, %cst {dimension_numbers = #tpu.dot_dimension_numbers<[1], [0], [0], [1], [0, 0, 1, 1], [], []>} : vector<8x32xf32>, vector<32x256xf32>, vector<8x256xf32> -> vector<8x256xf32>
    %c0_3 = arith.constant 0 : index
    %c0_4 = arith.constant 0 : index
    %3 = vector.load %arg2[%c0_3, %c0_4] : memref<1x256xf32, #tpu.memory_space<vmem>>, vector<1x256xf32>
    %4 = vector.broadcast %3 : vector<1x256xf32> to vector<8x256xf32>
    %5 = arith.addf %2, %4 : vector<8x256xf32>
    %cst_5 = arith.constant dense<0.000000e+00> : vector<256xf32>
    %6 = vector.multi_reduction <add>, %5, %cst_5 [0] : vector<8x256xf32> to vector<256xf32>
    %7 = vector.shape_cast %6 : vector<256xf32> to vector<1x256xf32>
    %8 = arith.mulf %5, %5 : vector<8x256xf32>
    %cst_6 = arith.constant dense<0.000000e+00> : vector<256xf32>
    %9 = vector.multi_reduction <add>, %8, %cst_6 [0] : vector<8x256xf32> to vector<256xf32>
    %10 = vector.shape_cast %9 : vector<256xf32> to vector<1x256xf32>
    %11 = vector.extract_strided_slice %7 {offsets = [0, 0], sizes = [1, 64], strides = [1, 1]} : vector<1x256xf32> to vector<1x64xf32>
    %12 = vector.extract_strided_slice %7 {offsets = [0, 64], sizes = [1, 64], strides = [1, 1]} : vector<1x256xf32> to vector<1x64xf32>
    %13 = arith.addf %11, %12 : vector<1x64xf32>
    %14 = vector.extract_strided_slice %7 {offsets = [0, 128], sizes = [1, 64], strides = [1, 1]} : vector<1x256xf32> to vector<1x64xf32>
    %15 = arith.addf %13, %14 : vector<1x64xf32>
    %16 = vector.extract_strided_slice %7 {offsets = [0, 192], sizes = [1, 64], strides = [1, 1]} : vector<1x256xf32> to vector<1x64xf32>
    %17 = arith.addf %15, %16 : vector<1x64xf32>
    %18 = vector.extract_strided_slice %10 {offsets = [0, 0], sizes = [1, 64], strides = [1, 1]} : vector<1x256xf32> to vector<1x64xf32>
    %19 = vector.extract_strided_slice %10 {offsets = [0, 64], sizes = [1, 64], strides = [1, 1]} : vector<1x256xf32> to vector<1x64xf32>
    %20 = arith.addf %18, %19 : vector<1x64xf32>
    %21 = vector.extract_strided_slice %10 {offsets = [0, 128], sizes = [1, 64], strides = [1, 1]} : vector<1x256xf32> to vector<1x64xf32>
    %22 = arith.addf %20, %21 : vector<1x64xf32>
    %23 = vector.extract_strided_slice %10 {offsets = [0, 192], sizes = [1, 64], strides = [1, 1]} : vector<1x256xf32> to vector<1x64xf32>
    %24 = arith.addf %22, %23 : vector<1x64xf32>
    %cst_7 = arith.constant 3.125000e-02 : f32
    %25 = vector.broadcast %cst_7 : f32 to vector<1x64xf32>
    %26 = arith.mulf %17, %25 : vector<1x64xf32>
    %cst_8 = arith.constant 3.125000e-02 : f32
    %27 = vector.broadcast %cst_8 : f32 to vector<1x64xf32>
    %28 = arith.mulf %24, %27 : vector<1x64xf32>
    %29 = arith.mulf %26, %26 : vector<1x64xf32>
    %30 = arith.subf %28, %29 : vector<1x64xf32>
    %cst_9 = arith.constant 0.000000e+00 : f32
    %31 = vector.broadcast %cst_9 : f32 to vector<1x64xf32>
    %32 = arith.maximumf %30, %31 : vector<1x64xf32>
    %c0_10 = arith.constant 0 : index
    %c0_11 = arith.constant 0 : index
    %33 = vector.load %arg3[%c0_10, %c0_11] : memref<1x64xf32, #tpu.memory_space<vmem>>, vector<1x64xf32>
    %cst_12 = arith.constant 9.99999974E-6 : f32
    %34 = vector.broadcast %cst_12 : f32 to vector<1x64xf32>
    %35 = arith.addf %32, %34 : vector<1x64xf32>
    %36 = math.rsqrt %35 : vector<1x64xf32>
    %37 = arith.mulf %33, %36 : vector<1x64xf32>
    %c0_13 = arith.constant 0 : index
    %c0_14 = arith.constant 0 : index
    %38 = vector.load %arg4[%c0_13, %c0_14] : memref<1x64xf32, #tpu.memory_space<vmem>>, vector<1x64xf32>
    %39 = arith.mulf %26, %37 : vector<1x64xf32>
    %40 = arith.subf %38, %39 : vector<1x64xf32>
    %41 = tpu.concatenate %37, %37, %37, %37 in 1 : vector<1x64xf32>, vector<1x64xf32>, vector<1x64xf32>, vector<1x64xf32> -> vector<1x256xf32>
    %42 = tpu.concatenate %40, %40, %40, %40 in 1 : vector<1x64xf32>, vector<1x64xf32>, vector<1x64xf32>, vector<1x64xf32> -> vector<1x256xf32>
    %43 = vector.broadcast %41 : vector<1x256xf32> to vector<8x256xf32>
    %44 = arith.mulf %5, %43 : vector<8x256xf32>
    %45 = vector.broadcast %42 : vector<1x256xf32> to vector<8x256xf32>
    %46 = arith.addf %44, %45 : vector<8x256xf32>
    %cst_15 = arith.constant 0.000000e+00 : f32
    %47 = vector.broadcast %cst_15 : f32 to vector<8x256xf32>
    %48 = arith.maximumf %46, %47 : vector<8x256xf32>
    %c0_16 = arith.constant 0 : index
    %c0_17 = arith.constant 0 : index
    %49 = vector.load %arg5[%c0_16, %c0_17] : memref<8x256xf32, #tpu.memory_space<vmem>>, vector<8x256xf32>
    tpu.vector_store %arg5[%c0_16, %c0_17], %48 {strides = array<i32>} : memref<8x256xf32, #tpu.memory_space<vmem>>, vector<8x256xf32>,
    return
  }
}

module attributes {stable_mosaic.version = 11 : i64} {
  func.func @_bn_block_t_kernel(%arg0: memref<50x256xf32, #tpu.memory_space<vmem>>, %arg1: memref<256x128xf32, #tpu.memory_space<vmem>>, %arg2: memref<1x128xf32, #tpu.memory_space<vmem>>, %arg3: memref<1x32xf32, #tpu.memory_space<vmem>>, %arg4: memref<1x32xf32, #tpu.memory_space<vmem>>, %arg5: memref<50x128xf32, #tpu.memory_space<vmem>>) attributes {dimension_semantics = [], scalar_prefetch = 0 : i64, scratch_operands = 0 : i64, tpu.core_type = #tpu.core_type<tc>} {
    %c0 = arith.constant 0 : index
    %c0_0 = arith.constant 0 : index
    %0 = vector.load %arg0[%c0, %c0_0] : memref<50x256xf32, #tpu.memory_space<vmem>>, vector<50x256xf32>
    %c0_1 = arith.constant 0 : index
    %c0_2 = arith.constant 0 : index
    %1 = vector.load %arg1[%c0_1, %c0_2] : memref<256x128xf32, #tpu.memory_space<vmem>>, vector<256x128xf32>
    %cst = arith.constant dense<0.000000e+00> : vector<50x128xf32>
    %2 = tpu.matmul %0, %1, %cst {dimension_numbers = #tpu.dot_dimension_numbers<[1], [0], [0], [1], [0, 0, 1, 1], [], []>} : vector<50x256xf32>, vector<256x128xf32>, vector<50x128xf32> -> vector<50x128xf32>
    %c0_3 = arith.constant 0 : index
    %c0_4 = arith.constant 0 : index
    %3 = vector.load %arg2[%c0_3, %c0_4] : memref<1x128xf32, #tpu.memory_space<vmem>>, vector<1x128xf32>
    %4 = vector.broadcast %3 : vector<1x128xf32> to vector<50x128xf32>
    %5 = arith.addf %2, %4 : vector<50x128xf32>
    %cst_5 = arith.constant dense<0.000000e+00> : vector<128xf32>
    %6 = vector.multi_reduction <add>, %5, %cst_5 [0] : vector<50x128xf32> to vector<128xf32>
    %7 = vector.shape_cast %6 : vector<128xf32> to vector<1x128xf32>
    %8 = arith.mulf %5, %5 : vector<50x128xf32>
    %cst_6 = arith.constant dense<0.000000e+00> : vector<128xf32>
    %9 = vector.multi_reduction <add>, %8, %cst_6 [0] : vector<50x128xf32> to vector<128xf32>
    %10 = vector.shape_cast %9 : vector<128xf32> to vector<1x128xf32>
    %11 = vector.extract_strided_slice %7 {offsets = [0, 0], sizes = [1, 32], strides = [1, 1]} : vector<1x128xf32> to vector<1x32xf32>
    %12 = vector.extract_strided_slice %7 {offsets = [0, 32], sizes = [1, 32], strides = [1, 1]} : vector<1x128xf32> to vector<1x32xf32>
    %13 = arith.addf %11, %12 : vector<1x32xf32>
    %14 = vector.extract_strided_slice %7 {offsets = [0, 64], sizes = [1, 32], strides = [1, 1]} : vector<1x128xf32> to vector<1x32xf32>
    %15 = arith.addf %13, %14 : vector<1x32xf32>
    %16 = vector.extract_strided_slice %7 {offsets = [0, 96], sizes = [1, 32], strides = [1, 1]} : vector<1x128xf32> to vector<1x32xf32>
    %17 = arith.addf %15, %16 : vector<1x32xf32>
    %18 = vector.extract_strided_slice %10 {offsets = [0, 0], sizes = [1, 32], strides = [1, 1]} : vector<1x128xf32> to vector<1x32xf32>
    %19 = vector.extract_strided_slice %10 {offsets = [0, 32], sizes = [1, 32], strides = [1, 1]} : vector<1x128xf32> to vector<1x32xf32>
    %20 = arith.addf %18, %19 : vector<1x32xf32>
    %21 = vector.extract_strided_slice %10 {offsets = [0, 64], sizes = [1, 32], strides = [1, 1]} : vector<1x128xf32> to vector<1x32xf32>
    %22 = arith.addf %20, %21 : vector<1x32xf32>
    %23 = vector.extract_strided_slice %10 {offsets = [0, 96], sizes = [1, 32], strides = [1, 1]} : vector<1x128xf32> to vector<1x32xf32>
    %24 = arith.addf %22, %23 : vector<1x32xf32>
    %cst_7 = arith.constant 5.000000e-03 : f32
    %25 = vector.broadcast %cst_7 : f32 to vector<1x32xf32>
    %26 = arith.mulf %17, %25 : vector<1x32xf32>
    %cst_8 = arith.constant 5.000000e-03 : f32
    %27 = vector.broadcast %cst_8 : f32 to vector<1x32xf32>
    %28 = arith.mulf %24, %27 : vector<1x32xf32>
    %29 = arith.mulf %26, %26 : vector<1x32xf32>
    %30 = arith.subf %28, %29 : vector<1x32xf32>
    %cst_9 = arith.constant 0.000000e+00 : f32
    %31 = vector.broadcast %cst_9 : f32 to vector<1x32xf32>
    %32 = arith.maximumf %30, %31 : vector<1x32xf32>
    %c0_10 = arith.constant 0 : index
    %c0_11 = arith.constant 0 : index
    %33 = vector.load %arg3[%c0_10, %c0_11] : memref<1x32xf32, #tpu.memory_space<vmem>>, vector<1x32xf32>
    %cst_12 = arith.constant 9.99999974E-6 : f32
    %34 = vector.broadcast %cst_12 : f32 to vector<1x32xf32>
    %35 = arith.addf %32, %34 : vector<1x32xf32>
    %36 = math.rsqrt %35 : vector<1x32xf32>
    %37 = arith.mulf %33, %36 : vector<1x32xf32>
    %c0_13 = arith.constant 0 : index
    %c0_14 = arith.constant 0 : index
    %38 = vector.load %arg4[%c0_13, %c0_14] : memref<1x32xf32, #tpu.memory_space<vmem>>, vector<1x32xf32>
    %39 = arith.mulf %26, %37 : vector<1x32xf32>
    %40 = arith.subf %38, %39 : vector<1x32xf32>
    %41 = tpu.concatenate %37, %37, %37, %37 in 1 : vector<1x32xf32>, vector<1x32xf32>, vector<1x32xf32>, vector<1x32xf32> -> vector<1x128xf32>
    %42 = tpu.concatenate %40, %40, %40, %40 in 1 : vector<1x32xf32>, vector<1x32xf32>, vector<1x32xf32>, vector<1x32xf32> -> vector<1x128xf32>
    %43 = vector.broadcast %41 : vector<1x128xf32> to vector<50x128xf32>
    %44 = arith.mulf %5, %43 : vector<50x128xf32>
    %45 = vector.broadcast %42 : vector<1x128xf32> to vector<50x128xf32>
    %46 = arith.addf %44, %45 : vector<50x128xf32>
    %cst_15 = arith.constant 0.000000e+00 : f32
    %47 = vector.broadcast %cst_15 : f32 to vector<50x128xf32>
    %48 = arith.maximumf %46, %47 : vector<50x128xf32>
    %c0_16 = arith.constant 0 : index
    %c0_17 = arith.constant 0 : index
    %49 = vector.load %arg5[%c0_16, %c0_17] : memref<50x128xf32, #tpu.memory_space<vmem>>, vector<50x128xf32>
    tpu.vector_store %arg5[%c0_16, %c0_17], %48 {strides = array<i32>} : memref<50x128xf32, #tpu.memory_space<vmem>>, vector<50x128xf32>,
    return
  }
}

module attributes {stable_mosaic.version = 11 : i64} {
  func.func @_bn_block_kernel(%arg0: memref<64x128xf32, #tpu.memory_space<vmem>>, %arg1: memref<128x242xf32, #tpu.memory_space<vmem>>, %arg2: memref<64x1xf32, #tpu.memory_space<vmem>>, %arg3: memref<16x1xf32, #tpu.memory_space<vmem>>, %arg4: memref<16x1xf32, #tpu.memory_space<vmem>>, %arg5: memref<64x242xf32, #tpu.memory_space<vmem>>) attributes {dimension_semantics = [], scalar_prefetch = 0 : i64, scratch_operands = 0 : i64, tpu.core_type = #tpu.core_type<tc>} {
    %c0 = arith.constant 0 : index
    %c0_0 = arith.constant 0 : index
    %0 = vector.load %arg0[%c0, %c0_0] : memref<64x128xf32, #tpu.memory_space<vmem>>, vector<64x128xf32>
    %c0_1 = arith.constant 0 : index
    %c0_2 = arith.constant 0 : index
    %1 = vector.load %arg1[%c0_1, %c0_2] : memref<128x242xf32, #tpu.memory_space<vmem>>, vector<128x242xf32>
    %cst = arith.constant dense<0.000000e+00> : vector<64x242xf32>
    %2 = tpu.matmul %0, %1, %cst {dimension_numbers = #tpu.dot_dimension_numbers<[1], [0], [0], [1], [0, 0, 1, 1], [], []>} : vector<64x128xf32>, vector<128x242xf32>, vector<64x242xf32> -> vector<64x242xf32>
    %c0_3 = arith.constant 0 : index
    %c0_4 = arith.constant 0 : index
    %3 = vector.load %arg2[%c0_3, %c0_4] : memref<64x1xf32, #tpu.memory_space<vmem>>, vector<64x1xf32>
    %4 = vector.broadcast %3 : vector<64x1xf32> to vector<64x242xf32>
    %5 = arith.addf %2, %4 : vector<64x242xf32>
    %cst_5 = arith.constant 0.000000e+00 : f32
    %6 = vector.broadcast %cst_5 : f32 to vector<16x1xf32>
    %cst_6 = arith.constant 0.000000e+00 : f32
    %7 = vector.broadcast %cst_6 : f32 to vector<16x1xf32>
    %8 = vector.extract_strided_slice %5 {offsets = [0, 0], sizes = [16, 242], strides = [1, 1]} : vector<64x242xf32> to vector<16x242xf32>
    %cst_7 = arith.constant dense<0.000000e+00> : vector<16xf32>
    %9 = vector.multi_reduction <add>, %8, %cst_7 [1] : vector<16x242xf32> to vector<16xf32>
    %10 = vector.shape_cast %9 : vector<16xf32> to vector<16x1xf32>
    %11 = arith.addf %6, %10 : vector<16x1xf32>
    %12 = arith.mulf %8, %8 : vector<16x242xf32>
    %cst_8 = arith.constant dense<0.000000e+00> : vector<16xf32>
    %13 = vector.multi_reduction <add>, %12, %cst_8 [1] : vector<16x242xf32> to vector<16xf32>
    %14 = vector.shape_cast %13 : vector<16xf32> to vector<16x1xf32>
    %15 = arith.addf %7, %14 : vector<16x1xf32>
    %16 = vector.extract_strided_slice %5 {offsets = [16, 0], sizes = [16, 242], strides = [1, 1]} : vector<64x242xf32> to vector<16x242xf32>
    %cst_9 = arith.constant dense<0.000000e+00> : vector<16xf32>
    %17 = vector.multi_reduction <add>, %16, %cst_9 [1] : vector<16x242xf32> to vector<16xf32>
    %18 = vector.shape_cast %17 : vector<16xf32> to vector<16x1xf32>
    %19 = arith.addf %11, %18 : vector<16x1xf32>
    %20 = arith.mulf %16, %16 : vector<16x242xf32>
    %cst_10 = arith.constant dense<0.000000e+00> : vector<16xf32>
    %21 = vector.multi_reduction <add>, %20, %cst_10 [1] : vector<16x242xf32> to vector<16xf32>
    %22 = vector.shape_cast %21 : vector<16xf32> to vector<16x1xf32>
    %23 = arith.addf %15, %22 : vector<16x1xf32>
    %24 = vector.extract_strided_slice %5 {offsets = [32, 0], sizes = [16, 242], strides = [1, 1]} : vector<64x242xf32> to vector<16x242xf32>
    %cst_11 = arith.constant dense<0.000000e+00> : vector<16xf32>
    %25 = vector.multi_reduction <add>, %24, %cst_11 [1] : vector<16x242xf32> to vector<16xf32>
    %26 = vector.shape_cast %25 : vector<16xf32> to vector<16x1xf32>
    %27 = arith.addf %19, %26 : vector<16x1xf32>
    %28 = arith.mulf %24, %24 : vector<16x242xf32>
    %cst_12 = arith.constant dense<0.000000e+00> : vector<16xf32>
    %29 = vector.multi_reduction <add>, %28, %cst_12 [1] : vector<16x242xf32> to vector<16xf32>
    %30 = vector.shape_cast %29 : vector<16xf32> to vector<16x1xf32>
    %31 = arith.addf %23, %30 : vector<16x1xf32>
    %32 = vector.extract_strided_slice %5 {offsets = [48, 0], sizes = [16, 242], strides = [1, 1]} : vector<64x242xf32> to vector<16x242xf32>
    %cst_13 = arith.constant dense<0.000000e+00> : vector<16xf32>
    %33 = vector.multi_reduction <add>, %32, %cst_13 [1] : vector<16x242xf32> to vector<16xf32>
    %34 = vector.shape_cast %33 : vector<16xf32> to vector<16x1xf32>
    %35 = arith.addf %27, %34 : vector<16x1xf32>
    %36 = arith.mulf %32, %32 : vector<16x242xf32>
    %cst_14 = arith.constant dense<0.000000e+00> : vector<16xf32>
    %37 = vector.multi_reduction <add>, %36, %cst_14 [1] : vector<16x242xf32> to vector<16xf32>
    %38 = vector.shape_cast %37 : vector<16xf32> to vector<16x1xf32>
    %39 = arith.addf %31, %38 : vector<16x1xf32>
    %cst_15 = arith.constant 0.00103305781 : f32
    %40 = vector.broadcast %cst_15 : f32 to vector<16x1xf32>
    %41 = arith.mulf %35, %40 : vector<16x1xf32>
    %cst_16 = arith.constant 0.00103305781 : f32
    %42 = vector.broadcast %cst_16 : f32 to vector<16x1xf32>
    %43 = arith.mulf %39, %42 : vector<16x1xf32>
    %44 = arith.mulf %41, %41 : vector<16x1xf32>
    %45 = arith.subf %43, %44 : vector<16x1xf32>
    %cst_17 = arith.constant 0.000000e+00 : f32
    %46 = vector.broadcast %cst_17 : f32 to vector<16x1xf32>
    %47 = arith.maximumf %45, %46 : vector<16x1xf32>
    %c0_18 = arith.constant 0 : index
    %c0_19 = arith.constant 0 : index
    %48 = vector.load %arg3[%c0_18, %c0_19] : memref<16x1xf32, #tpu.memory_space<vmem>>, vector<16x1xf32>
    %cst_20 = arith.constant 9.99999974E-6 : f32
    %49 = vector.broadcast %cst_20 : f32 to vector<16x1xf32>
    %50 = arith.addf %47, %49 : vector<16x1xf32>
    %51 = math.rsqrt %50 : vector<16x1xf32>
    %52 = arith.mulf %48, %51 : vector<16x1xf32>
    %c0_21 = arith.constant 0 : index
    %c0_22 = arith.constant 0 : index
    %53 = vector.load %arg4[%c0_21, %c0_22] : memref<16x1xf32, #tpu.memory_space<vmem>>, vector<16x1xf32>
    %54 = arith.mulf %41, %52 : vector<16x1xf32>
    %55 = arith.subf %53, %54 : vector<16x1xf32>
    %56 = vector.extract_strided_slice %5 {offsets = [0, 0], sizes = [16, 242], strides = [1, 1]} : vector<64x242xf32> to vector<16x242xf32>
    %57 = vector.broadcast %52 : vector<16x1xf32> to vector<16x242xf32>
    %58 = arith.mulf %56, %57 : vector<16x242xf32>
    %59 = vector.broadcast %55 : vector<16x1xf32> to vector<16x242xf32>
    %60 = arith.addf %58, %59 : vector<16x242xf32>
    %cst_23 = arith.constant 0.000000e+00 : f32
    %61 = vector.broadcast %cst_23 : f32 to vector<16x242xf32>
    %62 = arith.maximumf %60, %61 : vector<16x242xf32>
    %c0_24 = arith.constant 0 : index
    %c0_25 = arith.constant 0 : index
    %63 = vector.load %arg5[%c0_24, %c0_25] : memref<64x242xf32, #tpu.memory_space<vmem>>, vector<16x242xf32>
    tpu.vector_store %arg5[%c0_24, %c0_25], %62 {strides = array<i32>} : memref<64x242xf32, #tpu.memory_space<vmem>>, vector<16x242xf32>,
    %64 = vector.extract_strided_slice %5 {offsets = [16, 0], sizes = [16, 242], strides = [1, 1]} : vector<64x242xf32> to vector<16x242xf32>
    %65 = vector.broadcast %52 : vector<16x1xf32> to vector<16x242xf32>
    %66 = arith.mulf %64, %65 : vector<16x242xf32>
    %67 = vector.broadcast %55 : vector<16x1xf32> to vector<16x242xf32>
    %68 = arith.addf %66, %67 : vector<16x242xf32>
    %cst_26 = arith.constant 0.000000e+00 : f32
    %69 = vector.broadcast %cst_26 : f32 to vector<16x242xf32>
    %70 = arith.maximumf %68, %69 : vector<16x242xf32>
    %c16 = arith.constant 16 : index
    %c0_27 = arith.constant 0 : index
    %71 = vector.load %arg5[%c16, %c0_27] : memref<64x242xf32, #tpu.memory_space<vmem>>, vector<16x242xf32>
    tpu.vector_store %arg5[%c16, %c0_27], %70 {strides = array<i32>} : memref<64x242xf32, #tpu.memory_space<vmem>>, vector<16x242xf32>,
    %72 = vector.extract_strided_slice %5 {offsets = [32, 0], sizes = [16, 242], strides = [1, 1]} : vector<64x242xf32> to vector<16x242xf32>
    %73 = vector.broadcast %52 : vector<16x1xf32> to vector<16x242xf32>
    %74 = arith.mulf %72, %73 : vector<16x242xf32>
    %75 = vector.broadcast %55 : vector<16x1xf32> to vector<16x242xf32>
    %76 = arith.addf %74, %75 : vector<16x242xf32>
    %cst_28 = arith.constant 0.000000e+00 : f32
    %77 = vector.broadcast %cst_28 : f32 to vector<16x242xf32>
    %78 = arith.maximumf %76, %77 : vector<16x242xf32>
    %c32 = arith.constant 32 : index
    %c0_29 = arith.constant 0 : index
    %79 = vector.load %arg5[%c32, %c0_29] : memref<64x242xf32, #tpu.memory_space<vmem>>, vector<16x242xf32>
    tpu.vector_store %arg5[%c32, %c0_29], %78 {strides = array<i32>} : memref<64x242xf32, #tpu.memory_space<vmem>>, vector<16x242xf32>,
    %80 = vector.extract_strided_slice %5 {offsets = [48, 0], sizes = [16, 242], strides = [1, 1]} : vector<64x242xf32> to vector<16x242xf32>
    %81 = vector.broadcast %52 : vector<16x1xf32> to vector<16x242xf32>
    %82 = arith.mulf %80, %81 : vector<16x242xf32>
    %83 = vector.broadcast %55 : vector<16x1xf32> to vector<16x242xf32>
    %84 = arith.addf %82, %83 : vector<16x242xf32>
    %cst_30 = arith.constant 0.000000e+00 : f32
    %85 = vector.broadcast %cst_30 : f32 to vector<16x242xf32>
    %86 = arith.maximumf %84, %85 : vector<16x242xf32>
    %c48 = arith.constant 48 : index
    %c0_31 = arith.constant 0 : index
    %87 = vector.load %arg5[%c48, %c0_31] : memref<64x242xf32, #tpu.memory_space<vmem>>, vector<16x242xf32>
    tpu.vector_store %arg5[%c48, %c0_31], %86 {strides = array<i32>} : memref<64x242xf32, #tpu.memory_space<vmem>>, vector<16x242xf32>,
    return
  }
}

module attributes {stable_mosaic.version = 11 : i64} {
  func.func @_bn_block_kernel(%arg0: memref<32x64xf32, #tpu.memory_space<vmem>>, %arg1: memref<64x1058xf32, #tpu.memory_space<vmem>>, %arg2: memref<32x1xf32, #tpu.memory_space<vmem>>, %arg3: memref<8x1xf32, #tpu.memory_space<vmem>>, %arg4: memref<8x1xf32, #tpu.memory_space<vmem>>, %arg5: memref<32x1058xf32, #tpu.memory_space<vmem>>) attributes {dimension_semantics = [], scalar_prefetch = 0 : i64, scratch_operands = 0 : i64, tpu.core_type = #tpu.core_type<tc>} {
    %c0 = arith.constant 0 : index
    %c0_0 = arith.constant 0 : index
    %0 = vector.load %arg0[%c0, %c0_0] : memref<32x64xf32, #tpu.memory_space<vmem>>, vector<32x64xf32>
    %c0_1 = arith.constant 0 : index
    %c0_2 = arith.constant 0 : index
    %1 = vector.load %arg1[%c0_1, %c0_2] : memref<64x1058xf32, #tpu.memory_space<vmem>>, vector<64x1058xf32>
    %cst = arith.constant dense<0.000000e+00> : vector<32x1058xf32>
    %2 = tpu.matmul %0, %1, %cst {dimension_numbers = #tpu.dot_dimension_numbers<[1], [0], [0], [1], [0, 0, 1, 1], [], []>} : vector<32x64xf32>, vector<64x1058xf32>, vector<32x1058xf32> -> vector<32x1058xf32>
    %c0_3 = arith.constant 0 : index
    %c0_4 = arith.constant 0 : index
    %3 = vector.load %arg2[%c0_3, %c0_4] : memref<32x1xf32, #tpu.memory_space<vmem>>, vector<32x1xf32>
    %4 = vector.broadcast %3 : vector<32x1xf32> to vector<32x1058xf32>
    %5 = arith.addf %2, %4 : vector<32x1058xf32>
    %cst_5 = arith.constant 0.000000e+00 : f32
    %6 = vector.broadcast %cst_5 : f32 to vector<8x1xf32>
    %cst_6 = arith.constant 0.000000e+00 : f32
    %7 = vector.broadcast %cst_6 : f32 to vector<8x1xf32>
    %8 = vector.extract_strided_slice %5 {offsets = [0, 0], sizes = [8, 1058], strides = [1, 1]} : vector<32x1058xf32> to vector<8x1058xf32>
    %cst_7 = arith.constant dense<0.000000e+00> : vector<8xf32>
    %9 = vector.multi_reduction <add>, %8, %cst_7 [1] : vector<8x1058xf32> to vector<8xf32>
    %10 = vector.shape_cast %9 : vector<8xf32> to vector<8x1xf32>
    %11 = arith.addf %6, %10 : vector<8x1xf32>
    %12 = arith.mulf %8, %8 : vector<8x1058xf32>
    %cst_8 = arith.constant dense<0.000000e+00> : vector<8xf32>
    %13 = vector.multi_reduction <add>, %12, %cst_8 [1] : vector<8x1058xf32> to vector<8xf32>
    %14 = vector.shape_cast %13 : vector<8xf32> to vector<8x1xf32>
    %15 = arith.addf %7, %14 : vector<8x1xf32>
    %16 = vector.extract_strided_slice %5 {offsets = [8, 0], sizes = [8, 1058], strides = [1, 1]} : vector<32x1058xf32> to vector<8x1058xf32>
    %cst_9 = arith.constant dense<0.000000e+00> : vector<8xf32>
    %17 = vector.multi_reduction <add>, %16, %cst_9 [1] : vector<8x1058xf32> to vector<8xf32>
    %18 = vector.shape_cast %17 : vector<8xf32> to vector<8x1xf32>
    %19 = arith.addf %11, %18 : vector<8x1xf32>
    %20 = arith.mulf %16, %16 : vector<8x1058xf32>
    %cst_10 = arith.constant dense<0.000000e+00> : vector<8xf32>
    %21 = vector.multi_reduction <add>, %20, %cst_10 [1] : vector<8x1058xf32> to vector<8xf32>
    %22 = vector.shape_cast %21 : vector<8xf32> to vector<8x1xf32>
    %23 = arith.addf %15, %22 : vector<8x1xf32>
    %24 = vector.extract_strided_slice %5 {offsets = [16, 0], sizes = [8, 1058], strides = [1, 1]} : vector<32x1058xf32> to vector<8x1058xf32>
    %cst_11 = arith.constant dense<0.000000e+00> : vector<8xf32>
    %25 = vector.multi_reduction <add>, %24, %cst_11 [1] : vector<8x1058xf32> to vector<8xf32>
    %26 = vector.shape_cast %25 : vector<8xf32> to vector<8x1xf32>
    %27 = arith.addf %19, %26 : vector<8x1xf32>
    %28 = arith.mulf %24, %24 : vector<8x1058xf32>
    %cst_12 = arith.constant dense<0.000000e+00> : vector<8xf32>
    %29 = vector.multi_reduction <add>, %28, %cst_12 [1] : vector<8x1058xf32> to vector<8xf32>
    %30 = vector.shape_cast %29 : vector<8xf32> to vector<8x1xf32>
    %31 = arith.addf %23, %30 : vector<8x1xf32>
    %32 = vector.extract_strided_slice %5 {offsets = [24, 0], sizes = [8, 1058], strides = [1, 1]} : vector<32x1058xf32> to vector<8x1058xf32>
    %cst_13 = arith.constant dense<0.000000e+00> : vector<8xf32>
    %33 = vector.multi_reduction <add>, %32, %cst_13 [1] : vector<8x1058xf32> to vector<8xf32>
    %34 = vector.shape_cast %33 : vector<8xf32> to vector<8x1xf32>
    %35 = arith.addf %27, %34 : vector<8x1xf32>
    %36 = arith.mulf %32, %32 : vector<8x1058xf32>
    %cst_14 = arith.constant dense<0.000000e+00> : vector<8xf32>
    %37 = vector.multi_reduction <add>, %36, %cst_14 [1] : vector<8x1058xf32> to vector<8xf32>
    %38 = vector.shape_cast %37 : vector<8xf32> to vector<8x1xf32>
    %39 = arith.addf %31, %38 : vector<8x1xf32>
    %cst_15 = arith.constant 2.36294902E-4 : f32
    %40 = vector.broadcast %cst_15 : f32 to vector<8x1xf32>
    %41 = arith.mulf %35, %40 : vector<8x1xf32>
    %cst_16 = arith.constant 2.36294902E-4 : f32
    %42 = vector.broadcast %cst_16 : f32 to vector<8x1xf32>
    %43 = arith.mulf %39, %42 : vector<8x1xf32>
    %44 = arith.mulf %41, %41 : vector<8x1xf32>
    %45 = arith.subf %43, %44 : vector<8x1xf32>
    %cst_17 = arith.constant 0.000000e+00 : f32
    %46 = vector.broadcast %cst_17 : f32 to vector<8x1xf32>
    %47 = arith.maximumf %45, %46 : vector<8x1xf32>
    %c0_18 = arith.constant 0 : index
    %c0_19 = arith.constant 0 : index
    %48 = vector.load %arg3[%c0_18, %c0_19] : memref<8x1xf32, #tpu.memory_space<vmem>>, vector<8x1xf32>
    %cst_20 = arith.constant 9.99999974E-6 : f32
    %49 = vector.broadcast %cst_20 : f32 to vector<8x1xf32>
    %50 = arith.addf %47, %49 : vector<8x1xf32>
    %51 = math.rsqrt %50 : vector<8x1xf32>
    %52 = arith.mulf %48, %51 : vector<8x1xf32>
    %c0_21 = arith.constant 0 : index
    %c0_22 = arith.constant 0 : index
    %53 = vector.load %arg4[%c0_21, %c0_22] : memref<8x1xf32, #tpu.memory_space<vmem>>, vector<8x1xf32>
    %54 = arith.mulf %41, %52 : vector<8x1xf32>
    %55 = arith.subf %53, %54 : vector<8x1xf32>
    %56 = vector.extract_strided_slice %5 {offsets = [0, 0], sizes = [8, 1058], strides = [1, 1]} : vector<32x1058xf32> to vector<8x1058xf32>
    %57 = vector.broadcast %52 : vector<8x1xf32> to vector<8x1058xf32>
    %58 = arith.mulf %56, %57 : vector<8x1058xf32>
    %59 = vector.broadcast %55 : vector<8x1xf32> to vector<8x1058xf32>
    %60 = arith.addf %58, %59 : vector<8x1058xf32>
    %cst_23 = arith.constant 0.000000e+00 : f32
    %61 = vector.broadcast %cst_23 : f32 to vector<8x1058xf32>
    %62 = arith.maximumf %60, %61 : vector<8x1058xf32>
    %c0_24 = arith.constant 0 : index
    %c0_25 = arith.constant 0 : index
    %63 = vector.load %arg5[%c0_24, %c0_25] : memref<32x1058xf32, #tpu.memory_space<vmem>>, vector<8x1058xf32>
    tpu.vector_store %arg5[%c0_24, %c0_25], %62 {strides = array<i32>} : memref<32x1058xf32, #tpu.memory_space<vmem>>, vector<8x1058xf32>,
    %64 = vector.extract_strided_slice %5 {offsets = [8, 0], sizes = [8, 1058], strides = [1, 1]} : vector<32x1058xf32> to vector<8x1058xf32>
    %65 = vector.broadcast %52 : vector<8x1xf32> to vector<8x1058xf32>
    %66 = arith.mulf %64, %65 : vector<8x1058xf32>
    %67 = vector.broadcast %55 : vector<8x1xf32> to vector<8x1058xf32>
    %68 = arith.addf %66, %67 : vector<8x1058xf32>
    %cst_26 = arith.constant 0.000000e+00 : f32
    %69 = vector.broadcast %cst_26 : f32 to vector<8x1058xf32>
    %70 = arith.maximumf %68, %69 : vector<8x1058xf32>
    %c8 = arith.constant 8 : index
    %c0_27 = arith.constant 0 : index
    %71 = vector.load %arg5[%c8, %c0_27] : memref<32x1058xf32, #tpu.memory_space<vmem>>, vector<8x1058xf32>
    tpu.vector_store %arg5[%c8, %c0_27], %70 {strides = array<i32>} : memref<32x1058xf32, #tpu.memory_space<vmem>>, vector<8x1058xf32>,
    %72 = vector.extract_strided_slice %5 {offsets = [16, 0], sizes = [8, 1058], strides = [1, 1]} : vector<32x1058xf32> to vector<8x1058xf32>
    %73 = vector.broadcast %52 : vector<8x1xf32> to vector<8x1058xf32>
    %74 = arith.mulf %72, %73 : vector<8x1058xf32>
    %75 = vector.broadcast %55 : vector<8x1xf32> to vector<8x1058xf32>
    %76 = arith.addf %74, %75 : vector<8x1058xf32>
    %cst_28 = arith.constant 0.000000e+00 : f32
    %77 = vector.broadcast %cst_28 : f32 to vector<8x1058xf32>
    %78 = arith.maximumf %76, %77 : vector<8x1058xf32>
    %c16 = arith.constant 16 : index
    %c0_29 = arith.constant 0 : index
    %79 = vector.load %arg5[%c16, %c0_29] : memref<32x1058xf32, #tpu.memory_space<vmem>>, vector<8x1058xf32>
    tpu.vector_store %arg5[%c16, %c0_29], %78 {strides = array<i32>} : memref<32x1058xf32, #tpu.memory_space<vmem>>, vector<8x1058xf32>,
    %80 = vector.extract_strided_slice %5 {offsets = [24, 0], sizes = [8, 1058], strides = [1, 1]} : vector<32x1058xf32> to vector<8x1058xf32>
    %81 = vector.broadcast %52 : vector<8x1xf32> to vector<8x1058xf32>
    %82 = arith.mulf %80, %81 : vector<8x1058xf32>
    %83 = vector.broadcast %55 : vector<8x1xf32> to vector<8x1058xf32>
    %84 = arith.addf %82, %83 : vector<8x1058xf32>
    %cst_30 = arith.constant 0.000000e+00 : f32
    %85 = vector.broadcast %cst_30 : f32 to vector<8x1058xf32>
    %86 = arith.maximumf %84, %85 : vector<8x1058xf32>
    %c24 = arith.constant 24 : index
    %c0_31 = arith.constant 0 : index
    %87 = vector.load %arg5[%c24, %c0_31] : memref<32x1058xf32, #tpu.memory_space<vmem>>, vector<8x1058xf32>
    tpu.vector_store %arg5[%c24, %c0_31], %86 {strides = array<i32>} : memref<32x1058xf32, #tpu.memory_space<vmem>>, vector<8x1058xf32>,
    return
  }
}

module attributes {stable_mosaic.version = 11 : i64} {
  func.func @_final_block_kernel(%arg0: memref<4x32xf32, #tpu.memory_space<vmem>>, %arg1: memref<32x4418xf32, #tpu.memory_space<vmem>>, %arg2: memref<4x1xf32, #tpu.memory_space<vmem>>, %arg3: memref<4x4418xf32, #tpu.memory_space<vmem>>) attributes {dimension_semantics = [], scalar_prefetch = 0 : i64, scratch_operands = 0 : i64, tpu.core_type = #tpu.core_type<tc>} {
    %c0 = arith.constant 0 : index
    %c0_0 = arith.constant 0 : index
    %0 = vector.load %arg0[%c0, %c0_0] : memref<4x32xf32, #tpu.memory_space<vmem>>, vector<4x32xf32>
    %c0_1 = arith.constant 0 : index
    %c0_2 = arith.constant 0 : index
    %1 = vector.load %arg1[%c0_1, %c0_2] : memref<32x4418xf32, #tpu.memory_space<vmem>>, vector<32x4418xf32>
    %cst = arith.constant dense<0.000000e+00> : vector<4x4418xf32>
    %2 = tpu.matmul %0, %1, %cst {dimension_numbers = #tpu.dot_dimension_numbers<[1], [0], [0], [1], [0, 0, 1, 1], [], []>} : vector<4x32xf32>, vector<32x4418xf32>, vector<4x4418xf32> -> vector<4x4418xf32>
    %c0_3 = arith.constant 0 : index
    %c0_4 = arith.constant 0 : index
    %3 = vector.load %arg2[%c0_3, %c0_4] : memref<4x1xf32, #tpu.memory_space<vmem>>, vector<4x1xf32>
    %4 = vector.broadcast %3 : vector<4x1xf32> to vector<4x4418xf32>
    %5 = arith.addf %2, %4 : vector<4x4418xf32>
    %6 = math.tanh %5 : vector<4x4418xf32>
    %c0_5 = arith.constant 0 : index
    %c0_6 = arith.constant 0 : index
    %7 = vector.load %arg3[%c0_5, %c0_6] : memref<4x4418xf32, #tpu.memory_space<vmem>>, vector<4x4418xf32>
    tpu.vector_store %arg3[%c0_5, %c0_6], %6 {strides = array<i32>} : memref<4x4418xf32, #tpu.memory_space<vmem>>, vector<4x4418xf32>,
    return
  }
}

</mosaic_0001>

<bundles_post_ra>
// kernel: vowel_generator_forward.5
= control target key start
LH: loop header
LB: loop body
LE: loop exit
PB: predicated region body
PF: predicated region fallthrough
CT: control target
= control target key end

     0   :  { %10 = vsyncpa [#allocation3], 0  ;;  %s509_s0 = inlined_call_operand.vmem [shape: f32[8,32], index: 0, kind: input, shape index: {}]   ;;  %s510_s1 = inlined_call_operand.hbm [shape: f32[32,256], index: 1, kind: input, shape index: {}]   ;;  %s511_s2 = inlined_call_operand.hbm [shape: f32[1,256], index: 2, kind: input, shape index: {}]   ;;  %s512_s3 = inlined_call_operand.hbm [shape: f32[1,64], index: 3, kind: input, shape index: {}]   ;;  %s513_s4 = inlined_call_operand.hbm [shape: f32[1,64], index: 4, kind: input, shape index: {}]   ;;  %s514_s5 = inlined_call_operand.vmem [shape: f32[8,256], index: 5, kind: output, shape index: {}]  }
   0x1   :  { %11 = vsyncpa [#allocation5], 0 }
   0x2   :  { %12 = vsyncpa [#allocation8], 0  ;;  %s380_s18 = smov [#allocation4]   ;;  %s381_s20 = smov [#allocation2]  }
   0x3   :  { %s33_s19 = sshll.u32 %s380_s18, 4  ;;  %s20_s21 = sshll.u32 %s381_s20, 4  ;;  %s34_s19 = int_to_ptr.vmem [resolvable:$true] %s33_s19  ;;  %s418_s21 = int_to_ptr.vmem [resolvable:$true] %s20_s21 }
   0x4   :  { %s286_s24 = scalar_lea.hbm %s511_s2, 32 }
   0x5   :  { %p287_p0 = scmp.ne.s32.totalorder %s511_s2, %s286_s24  ;;  %p290_p1 = scmp.lt.u32.totalorder %s286_s24, %s511_s2 }
   0x7   :  { %p292_p2 = pnand %p290_p1, %p287_p0 }
   0x9   :  { %295 = shalt.err (!%p292_p2)
}
   0xa   :  { %s296_s29 = scalar_lea.vmem %s34_s19, 32  ;;  %p301_p4 = scmp.lt.s32.totalorder %s34_s19, %s34_s19 }
   0xb   :  { %p297_p3 = scmp.ne.s32.totalorder %s34_s19, %s296_s29  ;;  %p302_p5 = scmp.lt.s32.totalorder %s296_s29, %s296_s29 }
   0xd   :  { %p303_p6 = por %p302_p5, %p301_p4 }
   0xf   :  { %p304_p7 = pnand %p303_p6, %p297_p3 }
  0x11   :  { %307 = shalt.err (!%p304_p7)
}
  0x12   :  { %36 = dma.hbm_to_vmem [thread:$0]  %s511_s2, 32, %s34_s19, [#allocation5]  }
  0x13   :  { %s308_s9 = scalar_lea.hbm %s510_s1, 1024 }
  0x14   :  { %p309_p8 = scmp.ne.s32.totalorder %s510_s1, %s308_s9  ;;  %p312_p9 = scmp.lt.u32.totalorder %s308_s9, %s510_s1 }
  0x16   :  { %p314_p10 = pnand %p312_p9, %p309_p8 }
  0x18   :  { %317 = shalt.err (!%p314_p10)
}
  0x19   :  { %s318_s14 = scalar_lea.vmem %s418_s21, 1024  ;;  %p323_p12 = scmp.lt.s32.totalorder %s418_s21, %s418_s21 }
  0x1a   :  { %p319_p11 = scmp.ne.s32.totalorder %s418_s21, %s318_s14  ;;  %p324_p13 = scmp.lt.s32.totalorder %s318_s14, %s318_s14 }
  0x1c   :  { %p325_p0 = por %p324_p13, %p323_p12 }
  0x1e   :  { %p326_p1 = pnand %p325_p0, %p319_p11 }
  0x20   :  { %329 = shalt.err (!%p326_p1)
}
  0x21   :  { %s382_s2 = smov 256   ;;  %s383_s15 = smov 16  }
  0x22   :  { %26 = dma.hbm_to_vmem [thread:$0]  %s510_s1, 1024, %s418_s21, [#allocation3], %s382_s2, %s382_s2, %s383_s15  }
  0x23   :  { %s384_s18 = smov [#allocation6]   ;;  %s385_s20 = smov [#allocation7]  }
  0x24   :  { %s43_s19 = sshll.u32 %s384_s18, 4  ;;  %s53_s22 = sshll.u32 %s385_s20, 4  ;;  %s44_s19 = int_to_ptr.vmem [resolvable:$true] %s43_s19  ;;  %s54_s22 = int_to_ptr.vmem [resolvable:$true] %s53_s22 }
  0x25   :  { %s330_s25 = scalar_lea.hbm %s512_s3, 16 }
  0x26   :  { %p331_p2 = scmp.ne.s32.totalorder %s512_s3, %s330_s25  ;;  %p334_p3 = scmp.lt.u32.totalorder %s330_s25, %s512_s3 }
  0x28   :  { %p336_p4 = pnand %p334_p3, %p331_p2 }
  0x2a   :  { %339 = shalt.err (!%p336_p4)
}
  0x2b   :  { %s340_s1 = scalar_lea.vmem %s44_s19, 16  ;;  %s344_s21 = scalar_lea.vmem %s44_s19, 32 }
  0x2c   :  { %p341_p5 = scmp.ne.s32.totalorder %s44_s19, %s340_s1  ;;  %p345_p6 = scmp.lt.s32.totalorder %s44_s19, %s44_s19 }
  0x2d   :  { %p346_p7 = scmp.lt.s32.totalorder %s344_s21, %s340_s1 }
  0x2f   :  { %p347_p8 = por %p346_p7, %p345_p6 }
  0x31   :  { %p348_p9 = pnand %p347_p8, %p341_p5 }
  0x33   :  { %351 = shalt.err (!%p348_p9)
}
  0x34   :  { %46 = dma.hbm_to_vmem [thread:$0]  %s512_s3, 16, %s44_s19, [#allocation5]  }
  0x35   :  { %s352_s9 = scalar_lea.hbm %s513_s4, 16 }
  0x36   :  { %p353_p10 = scmp.ne.s32.totalorder %s513_s4, %s352_s9  ;;  %p356_p11 = scmp.lt.u32.totalorder %s352_s9, %s513_s4 }
  0x38   :  { %p358_p12 = pnand %p356_p11, %p353_p10 }
  0x3a   :  { %361 = shalt.err (!%p358_p12)
}
  0x3b   :  { %s362_s14 = scalar_lea.vmem %s54_s22, 16  ;;  %s366_s2 = scalar_lea.vmem %s54_s22, 32 }
  0x3c   :  { %p363_p13 = scmp.ne.s32.totalorder %s54_s22, %s362_s14  ;;  %p367_p0 = scmp.lt.s32.totalorder %s54_s22, %s54_s22 }
  0x3d   :  { %p368_p1 = scmp.lt.s32.totalorder %s366_s2, %s362_s14 }
  0x3f   :  { %p369_p2 = por %p368_p1, %p367_p0 }
  0x41   :  { %p370_p3 = pnand %p369_p2, %p363_p13 }
  0x43   :  { %373 = shalt.err (!%p370_p3)
}
  0x44   :  { %56 = dma.hbm_to_vmem [thread:$0]  %s513_s4, 16, %s54_s22, [#allocation8]  }
  0x45   :  { %374 = dma.done.wait [#allocation3], 1024  }
  0x46   :  { %375 = vsyncadd [#allocation3], 4294966272 }
  0x47   :  { %376 = dma.done.wait [#allocation5], 48  }
  0x48   :  { %377 = vsyncadd [#allocation5], 4294967248 }
  0x49   :  { %378 = dma.done.wait [#allocation8], 16  }
  0x4a   :  { %379 = vsyncadd [#allocation8], 4294967280  ;;  %v386_v0 = vmov 0.0   ;;  %v71_v1 = vld [vmem:[#allocation2 + $0x8] sm:$0xff]  ;;  %v73_v2 = vld [vmem:[#allocation2 + $0x18] sm:$0xff]  ;;  %vm90_vm0 = vcmask 261120   ;;  %v80_v14 = vlaneseq }
  0x4b   :  { %158 = vmatprep.mubr.f32.mxu0 %v386_v0  ;;  %v70_v3 = vld [vmem:[#allocation2] sm:$0xff]  ;;  %v268_v4 = vpack.c.bf16 %v73_v2, %v71_v1  ;;  %v72_v5 = vld [vmem:[#allocation2 + $0x10] sm:$0xff]  ;;  %v75_v6 = vld [vmem:[#allocation2 + $0x28] sm:$0xff]  ;;  %vm233_vm1 = vcmask 523264  }
  0x4c   :  { %v77_v7 = vld [vmem:[#allocation2 + $0x38] sm:$0xff]  ;;  %v270_v8 = vpack.c.bf16 %v72_v5, %v70_v3  ;;  %v74_v10 = vld [vmem:[#allocation2 + $0x20] sm:$0xff]  ;;  %v76_v11 = vld [vmem:[#allocation2 + $0x30] sm:$0xff]  ;;  %v81_v15 = vshrl.u32 %v80_v14, 7 }
  0x4d   :  { %v272_v9 = vpack.c.bf16 %v77_v7, %v75_v6  ;;  %269 = vmatprep.subr.bf16.mxu0 %v268_v4  ;;  %v274_v12 = vpack.c.bf16 %v76_v11, %v74_v10  ;;  %v69_v13 = vld [vmem:[%s509_s0] sm:$0xff]  ;;  %s387_s0 = smov 64  }
  0x4e   :  { %271 = vmatpush1.bf16.msra.mxu0 %v270_v8  ;;  %v476_v16 = vsub.s32 0, %v81_v15  ;;  %v78_v17 = vld [vmem:[#allocation4] sm:$0x3]  ;;  %v86_v18 = vsub.s32 1, %v81_v15  ;;  %v218_v3 = vld [vmem:[#allocation6] sm:$0x1] }
  0x4f   :  { %273 = vmatprep.subr.bf16.mxu0 %v272_v9  ;;  %v222_v6 = vld [vmem:[#allocation7] sm:$0x1] }
  0x50   :  { %v83_v19 = vrot.slane %v78_v17, %v476_v16  ;;  %v87_v20 = vrot.slane %v78_v17, %v86_v18 }
  0x52   :  { %275 = vmatpush1.bf16.msra.mxu0 %v274_v12 }
  0x55   :  { %267 = vmatmul.mubr.msk.f32.vlgmr.msra.gmra.mrb[0].mxu0 %vm90_vm0, %v69_v13 }
 0x128   :  { %v160_v21 = vpop.f32.mrb[0].mxu0 }
 0x129   :  { %v479_v22 = vadd.f32 %v160_v21, %v83_v19  ;;  %v162_v23 = vpop.f32.mrb[1].mxu0 }
 0x12a   :  { %v481_v24 = vadd.f32 %v162_v23, %v87_v20 }
 0x12b   :  { %v177_v25 = vmul.f32 %v479_v22, %v479_v22  ;;  %v165_v26 = vrot.slane %v479_v22, 4 }
 0x12c   :  { %v178_v27 = vmul.f32 %v481_v24, %v481_v24  ;;  %v171_v28 = vrot.slane %v481_v24, 4 }
 0x12d   :  { %v166_v29 = vadd.f32 %v165_v26, %v479_v22  ;;  %v179_v30 = vrot.slane %v177_v25, 4 }
 0x12e   :  { %v172_v31 = vadd.f32 %v171_v28, %v481_v24  ;;  %v185_v32 = vrot.slane %v178_v27, 4 }
 0x12f   :  { %v167_v33 = vrot.slane %v166_v29, 2  ;;  %v180_v34 = vadd.f32 %v179_v30, %v177_v25 }
 0x130   :  { %v173_v35 = vrot.slane %v172_v31, 2  ;;  %v186_v36 = vadd.f32 %v185_v32, %v178_v27 }
 0x131   :  { %v168_v37 = vadd.f32 %v167_v33, %v166_v29  ;;  %v181_v38 = vrot.slane %v180_v34, 2 }
 0x132   :  { %v174_v39 = vadd.f32 %v173_v35, %v172_v31  ;;  %v187_v40 = vrot.slane %v186_v36, 2 }
 0x133   :  { %v169_v41 = vrot.slane %v168_v37, 1  ;;  %v182_v42 = vadd.f32 %v181_v38, %v180_v34 }
 0x134   :  { %v175_v43 = vrot.slane %v174_v39, 1  ;;  %v188_v44 = vadd.f32 %v187_v40, %v186_v36 }
 0x135   :  { %v170_v45 = vadd.f32 %v169_v41, %v168_v37  ;;  %v183_v46 = vrot.slane %v182_v42, 1 }
 0x136   :  { %v176_v47 = vadd.f32 %v175_v43, %v174_v39  ;;  %v189_v48 = vrot.slane %v188_v44, 1 }
 0x137   :  { %192 = vrot.lane.b32.xlu0 %v170_v45, %s387_s0  ;;  %v184_v49 = vadd.f32 %v183_v46, %v182_v42 }
 0x138   :  { %198 = vrot.lane.b32.xlu1 %v176_v47, %s387_s0  ;;  %v190_v50 = vadd.f32 %v189_v48, %v188_v44 }
 0x13b   :  { %203 = vrot.lane.b32.xlu0 %v184_v49, %s387_s0 }
 0x13c   :  { %209 = vrot.lane.b32.xlu1 %v190_v50, %s387_s0 }
 0x1a9   :  { %v193_v51 = vpop.permute.xlu0 %192 }
 0x1aa   :  { %v195_v52 = vadd.f32 %v193_v51, %v170_v45  ;;  %v199_v53 = vpop.permute.xlu1 %198 }
 0x1ac   :  { %v196_v54 = vadd.f32 %v195_v52, %v176_v47 }
 0x1ad   :  { %v204_v55 = vpop.permute.xlu0 %203 }
 0x1ae   :  { %v201_v56 = vadd.f32 %v199_v53, %v196_v54  ;;  %v206_v57 = vadd.f32 %v204_v55, %v184_v49  ;;  %v210_v60 = vpop.permute.xlu1 %209 }
 0x1b0   :  { %v213_v58 = vmul.f32 0.03125, %v201_v56  ;;  %v207_v59 = vadd.f32 %v206_v57, %v190_v50 }
 0x1b2   :  { %v212_v61 = vadd.f32 %v210_v60, %v207_v59  ;;  %v215_v62 = vmul.f32 %v213_v58, %v213_v58 }
 0x1b4   :  { %v214_v63 = vmul.f32 0.03125, %v212_v61 }
 0x1b6   :  { %v216_v0 = vsub.f32 %v214_v63, %v215_v62 }
 0x1b8   :  { %v217_v1 = vmax.f32 %v216_v0, 0.0 }
 0x1ba   :  { %v219_v2 = vadd.f32 1e-05, %v217_v1 }
 0x1bc   :  { %284 = vrsqrt.f32 %v219_v2 }
 0x1c6   :  { %v285_v4 = vpop.eup %284 }
 0x1c7   :  { %v221_v5 = vmul.f32 %v285_v4, %v218_v3 }
 0x1c9   :  { %v229_v7 = vrot.slane %v221_v5, %v476_v16  ;;  %v223_v8 = vmul.f32 %v221_v5, %v213_v58 }
 0x1cb   :  { %230 = vrot.lane.b32.xlu0 %v229_v7, %s387_s0  ;;  %v224_v9 = vsub.f32 %v222_v6, %v223_v8 }
 0x1cd   :  { %v239_v10 = vrot.slane %v224_v9, %v476_v16 }
 0x1cf   :  { %240 = vrot.lane.b32.xlu1 %v239_v10, %s387_s0 }
 0x23d   :  { %v231_v11 = vpop.permute.xlu0 %230 }
 0x23e   :  { %v234_v12 = vsel %vm233_vm1, %v221_v5, %v231_v11 }
 0x23f   :  { %v247_v13 = vrot.slane %v234_v12, %v476_v16 }
 0x241   :  { %v241_v14 = vpop.permute.xlu1 %240  ;;  %v248_v17 = vmul.f32 %v247_v13, %v479_v22  ;;  %v249_v18 = vmul.f32 %v247_v13, %v481_v24 }
 0x242   :  { %v243_v15 = vsel %vm233_vm1, %v224_v9, %v241_v14 }
 0x243   :  { %v253_v19 = vrot.slane %v243_v15, %v476_v16 }
 0x245   :  { %v254_v20 = vadd.f32 %v253_v19, %v248_v17  ;;  %v255_v21 = vadd.f32 %v253_v19, %v249_v18 }
 0x247   :  { %v256_v23 = vmax.f32 %v254_v20, 0.0  ;;  %v257_v25 = vmax.f32 %v255_v21, 0.0 }
 0x249   :  { %258 = vst [vmem:[%s514_s5] sm:$0xff] %v256_v23  ;;  %259 = vst [vmem:[%s514_s5 + $0x8] sm:$0xff] %v257_v25 }
 0x24a   :  { %264 = vsyncpa [#allocation3], 1 }
 0x24b   :  { %265 = vsyncpa [#allocation5], 1 }
 0x24c   :  { %266 = vsyncpa [#allocation8], 1 }

// kernel: vowel_generator_forward.6
= control target key start
LH: loop header
LB: loop body
LE: loop exit
PB: predicated region body
PF: predicated region fallthrough
CT: control target
= control target key end

     0   :  { %10 = vsyncpa [#allocation3], 0  ;;  %s792_s0 = inlined_call_operand.vmem [shape: f32[50,256], index: 0, kind: input, shape index: {}]   ;;  %s793_s1 = inlined_call_operand.hbm [shape: f32[256,128], index: 1, kind: input, shape index: {}]   ;;  %s794_s2 = inlined_call_operand.hbm [shape: f32[1,128], index: 2, kind: input, shape index: {}]   ;;  %s795_s3 = inlined_call_operand.hbm [shape: f32[1,32], index: 3, kind: input, shape index: {}]   ;;  %s796_s4 = inlined_call_operand.hbm [shape: f32[1,32], index: 4, kind: input, shape index: {}]   ;;  %s797_s5 = inlined_call_operand.vmem [shape: f32[50,128], index: 5, kind: output, shape index: {}]  }
   0x1   :  { %11 = vsyncpa [#allocation5], 0 }
   0x2   :  { %12 = vsyncpa [#allocation8], 0  ;;  %s581_s18 = smov [#allocation4]   ;;  %s582_s20 = smov [#allocation2]  }
   0x3   :  { %s33_s19 = sshll.u32 %s581_s18, 4  ;;  %s20_s21 = sshll.u32 %s582_s20, 4  ;;  %s34_s19 = int_to_ptr.vmem [resolvable:$true] %s33_s19  ;;  %s620_s21 = int_to_ptr.vmem [resolvable:$true] %s20_s21 }
   0x4   :  { %s487_s24 = scalar_lea.hbm %s794_s2, 16 }
   0x5   :  { %p488_p0 = scmp.ne.s32.totalorder %s794_s2, %s487_s24  ;;  %p491_p1 = scmp.lt.u32.totalorder %s487_s24, %s794_s2 }
   0x7   :  { %p493_p2 = pnand %p491_p1, %p488_p0 }
   0x9   :  { %496 = shalt.err (!%p493_p2)
}
   0xa   :  { %s497_s29 = scalar_lea.vmem %s34_s19, 16  ;;  %s501_s30 = scalar_lea.vmem %s34_s19, 32 }
   0xb   :  { %p498_p3 = scmp.ne.s32.totalorder %s34_s19, %s497_s29  ;;  %p502_p4 = scmp.lt.s32.totalorder %s34_s19, %s34_s19 }
   0xc   :  { %p503_p5 = scmp.lt.s32.totalorder %s501_s30, %s497_s29 }
   0xe   :  { %p504_p6 = por %p503_p5, %p502_p4 }
  0x10   :  { %p505_p7 = pnand %p504_p6, %p498_p3 }
  0x12   :  { %508 = shalt.err (!%p505_p7)
}
  0x13   :  { %36 = dma.hbm_to_vmem [thread:$0]  %s794_s2, 16, %s34_s19, [#allocation5]  }
  0x14   :  { %s509_s10 = scalar_lea.hbm %s793_s1, 4096 }
  0x15   :  { %p510_p8 = scmp.ne.s32.totalorder %s793_s1, %s509_s10  ;;  %p513_p9 = scmp.lt.u32.totalorder %s509_s10, %s793_s1 }
  0x17   :  { %p515_p10 = pnand %p513_p9, %p510_p8 }
  0x19   :  { %518 = shalt.err (!%p515_p10)
}
  0x1a   :  { %s519_s15 = scalar_lea.vmem %s620_s21, 4096  ;;  %p524_p12 = scmp.lt.s32.totalorder %s620_s21, %s620_s21 }
  0x1b   :  { %p520_p11 = scmp.ne.s32.totalorder %s620_s21, %s519_s15  ;;  %p525_p13 = scmp.lt.s32.totalorder %s519_s15, %s519_s15 }
  0x1d   :  { %p526_p0 = por %p525_p13, %p524_p12 }
  0x1f   :  { %p527_p1 = pnand %p526_p0, %p520_p11 }
  0x21   :  { %530 = shalt.err (!%p527_p1)
}
  0x22   :  { %s583_s2 = smov 128   ;;  %s584_s16 = smov 8  }
  0x23   :  { %26 = dma.hbm_to_vmem [thread:$0]  %s793_s1, 4096, %s620_s21, [#allocation3], %s583_s2, %s583_s2, %s584_s16  }
  0x24   :  { %s585_s19 = smov [#allocation6]   ;;  %s586_s22 = smov [#allocation7]  }
  0x25   :  { %s43_s20 = sshll.u32 %s585_s19, 4  ;;  %s53_s23 = sshll.u32 %s586_s22, 4  ;;  %s44_s20 = int_to_ptr.vmem [resolvable:$true] %s43_s20  ;;  %s54_s23 = int_to_ptr.vmem [resolvable:$true] %s53_s23 }
  0x26   :  { %s531_s26 = scalar_lea.hbm %s795_s3, 16 }
  0x27   :  { %p532_p2 = scmp.ne.s32.totalorder %s795_s3, %s531_s26  ;;  %p535_p3 = scmp.lt.u32.totalorder %s531_s26, %s795_s3 }
  0x29   :  { %p537_p4 = pnand %p535_p3, %p532_p2 }
  0x2b   :  { %540 = shalt.err (!%p537_p4)
}
  0x2c   :  { %s541_s1 = scalar_lea.vmem %s44_s20, 16  ;;  %s545_s21 = scalar_lea.vmem %s44_s20, 32 }
  0x2d   :  { %p542_p5 = scmp.ne.s32.totalorder %s44_s20, %s541_s1  ;;  %p546_p6 = scmp.lt.s32.totalorder %s44_s20, %s44_s20 }
  0x2e   :  { %p547_p7 = scmp.lt.s32.totalorder %s545_s21, %s541_s1 }
  0x30   :  { %p548_p8 = por %p547_p7, %p546_p6 }
  0x32   :  { %p549_p9 = pnand %p548_p8, %p542_p5 }
  0x34   :  { %552 = shalt.err (!%p549_p9)
}
  0x35   :  { %46 = dma.hbm_to_vmem [thread:$0]  %s795_s3, 16, %s44_s20, [#allocation5]  }
  0x36   :  { %s553_s10 = scalar_lea.hbm %s796_s4, 16 }
  0x37   :  { %p554_p10 = scmp.ne.s32.totalorder %s796_s4, %s553_s10  ;;  %p557_p11 = scmp.lt.u32.totalorder %s553_s10, %s796_s4 }
  0x39   :  { %p559_p12 = pnand %p557_p11, %p554_p10 }
  0x3b   :  { %562 = shalt.err (!%p559_p12)
}
  0x3c   :  { %s563_s15 = scalar_lea.vmem %s54_s23, 16  ;;  %s567_s2 = scalar_lea.vmem %s54_s23, 32 }
  0x3d   :  { %p564_p13 = scmp.ne.s32.totalorder %s54_s23, %s563_s15  ;;  %p568_p0 = scmp.lt.s32.totalorder %s54_s23, %s54_s23 }
  0x3e   :  { %p569_p1 = scmp.lt.s32.totalorder %s567_s2, %s563_s15 }
  0x40   :  { %p570_p2 = por %p569_p1, %p568_p0 }
  0x42   :  { %p571_p3 = pnand %p570_p2, %p564_p13 }
  0x44   :  { %574 = shalt.err (!%p571_p3)
}
  0x45   :  { %56 = dma.hbm_to_vmem [thread:$0]  %s796_s4, 16, %s54_s23, [#allocation8]  }
  0x46   :  { %575 = dma.done.wait [#allocation3], 4096  }
  0x47   :  { %576 = vsyncadd [#allocation3], 4294963200 }
  0x48   :  { %577 = dma.done.wait [#allocation5], 32  }
  0x49   :  { %578 = vsyncadd [#allocation5], 4294967264 }
  0x4a   :  { %579 = dma.done.wait [#allocation8], 16  }
  0x4b   :  { %580 = vsyncadd [#allocation8], 4294967280  ;;  %v99_v0 = vld [vmem:[#allocation2 + $0x80] sm:$0xff]  ;;  %v100_v1 = vld [vmem:[#allocation2 + $0x88] sm:$0xff]  ;;  %vm227_vm0 = vcmask 1041408   ;;  %s588_s16 = smov 96  }
  0x4c   :  { %v83_v2 = vld [vmem:[#allocation2] sm:$0xff]  ;;  %v428_v3 = vpack.c.bf16 %v100_v1, %v99_v0  ;;  %v84_v4 = vld [vmem:[#allocation2 + $0x8] sm:$0xff]  ;;  %v101_v5 = vld [vmem:[#allocation2 + $0x90] sm:$0xff]  ;;  %s589_s4 = smov 64   ;;  %vm308_vm1 = vcmask 261120   ;;  %vm310_vm2 = vcmask 523264  }
  0x4d   :  { %v102_v6 = vld [vmem:[#allocation2 + $0x98] sm:$0xff]  ;;  %v430_v7 = vpack.c.bf16 %v84_v4, %v83_v2  ;;  %v85_v9 = vld [vmem:[#allocation2 + $0x10] sm:$0xff]  ;;  %v103_v11 = vld [vmem:[#allocation2 + $0xa0] sm:$0xff]  ;;  %vm312_vm3 = vcmask 785408  }
  0x4e   :  { %v432_v8 = vpack.c.bf16 %v102_v6, %v101_v5  ;;  %v86_v10 = vld [vmem:[#allocation2 + $0x18] sm:$0xff]  ;;  %429 = vmatprep.subr.bf16.mxu0 %v428_v3  ;;  %460 = vmatprep.subr.bf16.mxu1 %v428_v3  ;;  %v104_v12 = vld [vmem:[#allocation2 + $0xa8] sm:$0xff]  ;;  %v87_v15 = vld [vmem:[#allocation2 + $0x20] sm:$0xff] }
  0x4f   :  { %431 = vmatpush3.bf16.msra.mxu0 %v430_v7  ;;  %v434_v13 = vpack.c.bf16 %v86_v10, %v85_v9  ;;  %468 = vmatpush3.bf16.msra.mxu1 %v430_v7  ;;  %v436_v14 = vpack.c.bf16 %v104_v12, %v103_v11  ;;  %v88_v16 = vld [vmem:[#allocation2 + $0x28] sm:$0xff]  ;;  %v105_v17 = vld [vmem:[#allocation2 + $0xb0] sm:$0xff]  ;;  %v106_v18 = vld [vmem:[#allocation2 + $0xb8] sm:$0xff] }
  0x50   :  { %433 = vmatprep.subr.bf16.mxu0 %v432_v8  ;;  %461 = vmatprep.subr.bf16.mxu1 %v432_v8  ;;  %v438_v19 = vpack.c.bf16 %v88_v16, %v87_v15  ;;  %v440_v20 = vpack.c.bf16 %v106_v18, %v105_v17  ;;  %v89_v21 = vld [vmem:[#allocation2 + $0x30] sm:$0xff]  ;;  %v90_v22 = vld [vmem:[#allocation2 + $0x38] sm:$0xff]  ;;  %v107_v23 = vld [vmem:[#allocation2 + $0xc0] sm:$0xff] }
  0x51   :  { %v108_v24 = vld [vmem:[#allocation2 + $0xc8] sm:$0xff]  ;;  %v442_v26 = vpack.c.bf16 %v90_v22, %v89_v21  ;;  %v91_v29 = vld [vmem:[#allocation2 + $0x40] sm:$0xff]  ;;  %v109_v31 = vld [vmem:[#allocation2 + $0xd0] sm:$0xff] }
  0x52   :  { %v70_v25 = vld [vmem:[%s792_s0 + $0x8] sm:$0xff]  ;;  %v444_v28 = vpack.c.bf16 %v108_v24, %v107_v23  ;;  %v110_v32 = vld [vmem:[#allocation2 + $0xd8] sm:$0xff]  ;;  %v93_v35 = vld [vmem:[#allocation2 + $0x50] sm:$0xff] }
  0x53   :  { %435 = vmatpush3.bf16.msra.mxu0 %v434_v13  ;;  %469 = vmatpush3.bf16.msra.mxu1 %v434_v13  ;;  %v78_v27 = vld [vmem:[%s792_s0 + $0x48] sm:$0xff]  ;;  %v448_v34 = vpack.c.bf16 %v110_v32, %v109_v31  ;;  %v94_v36 = vld [vmem:[#allocation2 + $0x58] sm:$0xff]  ;;  %v111_v37 = vld [vmem:[#allocation2 + $0xe0] sm:$0xff] }
  0x54   :  { %437 = vmatprep.subr.bf16.mxu0 %v436_v14  ;;  %462 = vmatprep.subr.bf16.mxu1 %v436_v14  ;;  %v92_v30 = vld [vmem:[#allocation2 + $0x48] sm:$0xff]  ;;  %v450_v39 = vpack.c.bf16 %v94_v36, %v93_v35  ;;  %v95_v41 = vld [vmem:[#allocation2 + $0x60] sm:$0xff]  ;;  %v113_v43 = vld [vmem:[#allocation2 + $0xf0] sm:$0xff] }
  0x55   :  { %186 = vmatprep.mubr.f32.mxu0 %v70_v25  ;;  %206 = vmatprep.mubr.f32.mxu1 %v78_v27  ;;  %v446_v33 = vpack.c.bf16 %v92_v30, %v91_v29  ;;  %v112_v38 = vld [vmem:[#allocation2 + $0xe8] sm:$0xff]  ;;  %v114_v44 = vld [vmem:[#allocation2 + $0xf8] sm:$0xff]  ;;  %v97_v47 = vld [vmem:[#allocation2 + $0x70] sm:$0xff] }
  0x56   :  { %v452_v40 = vpack.c.bf16 %v112_v38, %v111_v37  ;;  %v96_v42 = vld [vmem:[#allocation2 + $0x68] sm:$0xff]  ;;  %v456_v46 = vpack.c.bf16 %v114_v44, %v113_v43  ;;  %v98_v48 = vld [vmem:[#allocation2 + $0x78] sm:$0xff]  ;;  %v69_v50 = vld [vmem:[%s792_s0] sm:$0xff] }
  0x57   :  { %439 = vmatpush3.bf16.msra.mxu0 %v438_v19  ;;  %470 = vmatpush3.bf16.msra.mxu1 %v438_v19  ;;  %v454_v45 = vpack.c.bf16 %v96_v42, %v95_v41  ;;  %v458_v49 = vpack.c.bf16 %v98_v48, %v97_v47  ;;  %v77_v51 = vld [vmem:[%s792_s0 + $0x40] sm:$0xff]  ;;  %v72_v52 = vld [vmem:[%s792_s0 + $0x18] sm:$0xff]  ;;  %v71_v54 = vld [vmem:[%s792_s0 + $0x10] sm:$0xff] }
  0x58   :  { %441 = vmatprep.subr.bf16.mxu0 %v440_v20  ;;  %463 = vmatprep.subr.bf16.mxu1 %v440_v20  ;;  %v80_v53 = vld [vmem:[%s792_s0 + $0x58] sm:$0xff]  ;;  %v79_v55 = vld [vmem:[%s792_s0 + $0x50] sm:$0xff]  ;;  %v74_v56 = vld [vmem:[%s792_s0 + $0x28] sm:$0xff] }
  0x59   :  { %v82_v57 = vld [vmem:[%s792_s0 + $0x68] sm:$0x3]  ;;  %v73_v58 = vld [vmem:[%s792_s0 + $0x20] sm:$0xff]  ;;  %v76_v60 = vld [vmem:[%s792_s0 + $0x38] sm:$0xff] }
  0x5a   :  { %v81_v59 = vld [vmem:[%s792_s0 + $0x60] sm:$0x3]  ;;  %v75_v61 = vld [vmem:[%s792_s0 + $0x30] sm:$0xff]  ;;  %s587_s0 = smov 32  }
  0x5b   :  { %443 = vmatpush3.bf16.msra.mxu0 %v442_v26  ;;  %471 = vmatpush3.bf16.msra.mxu1 %v442_v26  ;;  %v374_v10 = vld [vmem:[#allocation4] ss:$0 sm:$0xff] }
  0x5c   :  { %445 = vmatprep.subr.bf16.mxu0 %v444_v28  ;;  %464 = vmatprep.subr.bf16.mxu1 %v444_v28 }
  0x5f   :  { %447 = vmatpush3.bf16.msra.mxu0 %v446_v33  ;;  %472 = vmatpush3.bf16.msra.mxu1 %v446_v33 }
  0x60   :  { %449 = vmatprep.subr.bf16.mxu0 %v448_v34  ;;  %465 = vmatprep.subr.bf16.mxu1 %v448_v34 }
  0x63   :  { %451 = vmatpush3.bf16.msra.mxu0 %v450_v39  ;;  %473 = vmatpush3.bf16.msra.mxu1 %v450_v39 }
  0x64   :  { %453 = vmatprep.subr.bf16.mxu0 %v452_v40  ;;  %466 = vmatprep.subr.bf16.mxu1 %v452_v40 }
  0x67   :  { %455 = vmatpush3.bf16.msra.mxu0 %v454_v45  ;;  %474 = vmatpush3.bf16.msra.mxu1 %v454_v45 }
  0x68   :  { %457 = vmatprep.subr.bf16.mxu0 %v456_v46  ;;  %467 = vmatprep.subr.bf16.mxu1 %v456_v46 }
  0x6b   :  { %459 = vmatpush3.bf16.msra.mxu0 %v458_v49  ;;  %475 = vmatpush3.bf16.msra.mxu1 %v458_v49 }
  0x6e   :  { %187 = vmatmul.mubr.f32.vlgmr.msra.gmra.mrb[0].mxu0 %v69_v50  ;;  %207 = vmatmul.mubr.f32.vlgmr.msra.gmra.mrb[0].mxu1 %v77_v51 }
  0x6f   :  { %191 = vmatprep.mubr.f32.mxu0 %v72_v52  ;;  %211 = vmatprep.mubr.f32.mxu1 %v80_v53 }
  0x72   :  { %192 = vmatmul.mubr.f32.gmra.mrb[2].mxu0 %v71_v54  ;;  %212 = vmatmul.mubr.f32.gmra.mrb[2].mxu1 %v79_v55 }
  0x73   :  { %196 = vmatprep.mubr.f32.mxu0 %v74_v56  ;;  %216 = vmatprep.mubr.f32.mxu1 %v82_v57 }
  0x76   :  { %197 = vmatmul.mubr.f32.gmra.mrb[4].mxu0 %v73_v58  ;;  %217 = vmatmul.mubr.f32.gmra.mrb[4].mxu1 %v81_v59 }
  0x77   :  { %201 = vmatprep.mubr.f32.mxu0 %v76_v60 }
  0x7a   :  { %202 = vmatmul.mubr.f32.gmra.mrb[6].mxu0 %v75_v61 }
 0x141   :  { %v407_v62 = vpop.f32.mrb[0].mxu0  ;;  %v419_v63 = vpop.f32.mrb[0].mxu1 }
 0x142   :  { %v408_v0 = vpop.f32.mrb[1].mxu0  ;;  %v420_v1 = vpop.f32.mrb[1].mxu1 }
 0x143   :  { %v409_v2 = vadd.f32 %v408_v0, %v407_v62  ;;  %v421_v3 = vadd.f32 %v420_v1, %v419_v63 }
 0x145   :  { %v410_v4 = vpop.f32.mrb[2].mxu0  ;;  %v422_v5 = vpop.f32.mrb[2].mxu1  ;;  %v719_v16 = vadd.f32 %v409_v2, %v374_v10  ;;  %v734_v30 = vadd.f32 %v421_v3, %v374_v10 }
 0x146   :  { %v411_v6 = vpop.f32.mrb[3].mxu0  ;;  %v423_v7 = vpop.f32.mrb[3].mxu1 }
 0x147   :  { %v412_v8 = vadd.f32 %v411_v6, %v410_v4  ;;  %v424_v9 = vadd.f32 %v423_v7, %v422_v5  ;;  %v236_v23 = vmul.f32 %v719_v16, %v719_v16  ;;  %v240_v37 = vmul.f32 %v734_v30, %v734_v30 }
 0x149   :  { %v717_v11 = vadd.f32 %v412_v8, %v374_v10  ;;  %v413_v12 = vpop.f32.mrb[4].mxu0  ;;  %v425_v13 = vpop.f32.mrb[4].mxu1  ;;  %v741_v35 = vadd.f32 %v424_v9, %v374_v10 }
 0x14a   :  { %v414_v14 = vpop.f32.mrb[5].mxu0  ;;  %v426_v15 = vpop.f32.mrb[5].mxu1 }
 0x14b   :  { %v415_v17 = vadd.f32 %v414_v14, %v413_v12  ;;  %v427_v18 = vadd.f32 %v426_v15, %v425_v13  ;;  %v237_v19 = vmul.f32 %v717_v11, %v717_v11  ;;  %v222_v24 = vadd.f32 %v717_v11, %v719_v16 }
 0x14c   :  { %v241_v42 = vmul.f32 %v741_v35, %v741_v35  ;;  %v295_v15 = vlaneseq }
 0x14d   :  { %v723_v20 = vadd.f32 %v415_v17, %v374_v10  ;;  %v416_v21 = vpop.f32.mrb[6].mxu0  ;;  %v731_v27 = vadd.f32 %v427_v18, %v374_v10  ;;  %v243_v28 = vadd.f32 %v237_v19, %v236_v23  ;;  %v287_v18 = vld [vmem:[#allocation6] sm:$0x1]  ;;  %v291_v23 = vld [vmem:[#allocation7] sm:$0x1] }
 0x14e   :  { %v417_v22 = vpop.f32.mrb[7].mxu0  ;;  %v296_v17 = vshrl.u32 %v295_v15, 7 }
 0x14f   :  { %v238_v25 = vmul.f32 %v723_v20, %v723_v20  ;;  %v418_v26 = vadd.f32 %v417_v22, %v416_v21  ;;  %v223_v29 = vadd.f32 %v222_v24, %v723_v20  ;;  %v242_v36 = vmul.f32 %v731_v27, %v731_v27 }
 0x150   :  { %v228_v40 = vsel %vm227_vm0, %v731_v27, 0.0  ;;  %v297_v19 = vsub.s32 0, %v296_v17 }
 0x151   :  { %v736_v31 = vadd.f32 %v418_v26, %v374_v10  ;;  %v244_v32 = vadd.f32 %v243_v28, %v238_v25  ;;  %v248_v44 = vsel %vm227_vm0, %v242_v36, 0.0 }
 0x153   :  { %v224_v33 = vadd.f32 %v223_v29, %v736_v31  ;;  %v239_v34 = vmul.f32 %v736_v31, %v736_v31 }
 0x155   :  { %v245_v38 = vadd.f32 %v244_v32, %v239_v34  ;;  %v225_v39 = vadd.f32 %v224_v33, %v734_v30 }
 0x157   :  { %v226_v41 = vadd.f32 %v225_v39, %v741_v35  ;;  %v246_v43 = vadd.f32 %v245_v38, %v240_v37 }
 0x159   :  { %v247_v45 = vadd.f32 %v246_v43, %v241_v42  ;;  %v229_v46 = vadd.f32 %v228_v40, %v226_v41 }
 0x15b   :  { %v230_v47 = vrot.slane %v229_v46, 4  ;;  %v249_v48 = vadd.f32 %v248_v44, %v247_v45 }
 0x15d   :  { %v231_v49 = vadd.f32 %v230_v47, %v229_v46  ;;  %v250_v50 = vrot.slane %v249_v48, 4 }
 0x15f   :  { %v232_v51 = vrot.slane %v231_v49, 2  ;;  %v251_v52 = vadd.f32 %v250_v50, %v249_v48 }
 0x161   :  { %v233_v53 = vadd.f32 %v232_v51, %v231_v49  ;;  %v252_v54 = vrot.slane %v251_v52, 2 }
 0x163   :  { %v234_v55 = vrot.slane %v233_v53, 1  ;;  %v253_v56 = vadd.f32 %v252_v54, %v251_v52 }
 0x165   :  { %v235_v57 = vadd.f32 %v234_v55, %v233_v53  ;;  %v254_v58 = vrot.slane %v253_v56, 1 }
 0x167   :  { %265 = vrot.lane.b32.xlu1 %v235_v57, %s587_s0  ;;  %257 = vrot.lane.b32.xlu0 %v235_v57, %s588_s16  ;;  %v255_v59 = vadd.f32 %v254_v58, %v253_v56 }
 0x16b   :  { %270 = vrot.lane.b32.xlu1 %v255_v59, %s588_s16  ;;  %261 = vrot.lane.b32.xlu0 %v235_v57, %s589_s4 }
 0x16f   :  { %278 = vrot.lane.b32.xlu1 %v255_v59, %s587_s0  ;;  %274 = vrot.lane.b32.xlu0 %v255_v59, %s589_s4 }
 0x1d9   :  { %v266_v60 = vpop.permute.xlu1 %265  ;;  %v258_v61 = vpop.permute.xlu0 %257 }
 0x1da   :  { %v260_v62 = vadd.f32 %v258_v61, %v235_v57 }
 0x1dd   :  { %v271_v63 = vpop.permute.xlu1 %270  ;;  %v262_v0 = vpop.permute.xlu0 %261 }
 0x1de   :  { %v264_v1 = vadd.f32 %v262_v0, %v260_v62  ;;  %v273_v2 = vadd.f32 %v271_v63, %v255_v59 }
 0x1e0   :  { %v268_v3 = vadd.f32 %v266_v60, %v264_v1 }
 0x1e1   :  { %v275_v4 = vpop.permute.xlu0 %274  ;;  %v279_v7 = vpop.permute.xlu1 %278 }
 0x1e2   :  { %v282_v5 = vmul.f32 0.005, %v268_v3  ;;  %v277_v6 = vadd.f32 %v275_v4, %v273_v2 }
 0x1e4   :  { %v281_v8 = vadd.f32 %v279_v7, %v277_v6  ;;  %v284_v9 = vmul.f32 %v282_v5, %v282_v5 }
 0x1e6   :  { %v283_v10 = vmul.f32 0.005, %v281_v8 }
 0x1e8   :  { %v285_v12 = vsub.f32 %v283_v10, %v284_v9 }
 0x1ea   :  { %v286_v13 = vmax.f32 %v285_v12, 0.0 }
 0x1ec   :  { %v288_v14 = vadd.f32 1e-05, %v286_v13 }
 0x1ee   :  { %485 = vrsqrt.f32 %v288_v14 }
 0x1f8   :  { %v486_v21 = vpop.eup %485 }
 0x1f9   :  { %v290_v22 = vmul.f32 %v486_v21, %v287_v18 }
 0x1fb   :  { %v298_v24 = vrot.slane %v290_v22, %v297_v19  ;;  %v292_v25 = vmul.f32 %v290_v22, %v282_v5 }
 0x1fd   :  { %302 = vrot.lane.b32.xlu1 %v298_v24, %s589_s4  ;;  %299 = vrot.lane.b32.xlu0 %v298_v24, %s587_s0  ;;  %v293_v26 = vsub.f32 %v291_v23, %v292_v25 }
 0x1ff   :  { %v318_v28 = vrot.slane %v293_v26, %v297_v19 }
 0x201   :  { %305 = vrot.lane.b32.xlu0 %v298_v24, %s588_s16  ;;  %319 = vrot.lane.b32.xlu1 %v318_v28, %s587_s0 }
 0x205   :  { %322 = vrot.lane.b32.xlu0 %v318_v28, %s589_s4  ;;  %325 = vrot.lane.b32.xlu1 %v318_v28, %s588_s16 }
 0x26f   :  { %v303_v29 = vpop.permute.xlu1 %302  ;;  %v300_v32 = vpop.permute.xlu0 %299 }
 0x270   :  { %v309_v33 = vsel %vm308_vm1, %v290_v22, %v300_v32 }
 0x271   :  { %v311_v34 = vsel %vm310_vm2, %v309_v33, %v303_v29 }
 0x273   :  { %v306_v36 = vpop.permute.xlu0 %305  ;;  %v320_v37 = vpop.permute.xlu1 %319 }
 0x274   :  { %v313_v38 = vsel %vm312_vm3, %v311_v34, %v306_v36  ;;  %v328_v40 = vsel %vm308_vm1, %v293_v26, %v320_v37 }
 0x275   :  { %v334_v39 = vrot.slane %v313_v38, %v297_v19 }
 0x277   :  { %v323_v41 = vpop.permute.xlu0 %322  ;;  %v326_v42 = vpop.permute.xlu1 %325  ;;  %v335_v44 = vmul.f32 %v334_v39, %v719_v16  ;;  %v336_v46 = vmul.f32 %v334_v39, %v717_v11  ;;  %v337_v47 = vmul.f32 %v334_v39, %v723_v20  ;;  %v338_v48 = vmul.f32 %v334_v39, %v736_v31 }
 0x278   :  { %v329_v43 = vsel %vm310_vm2, %v328_v40, %v323_v41  ;;  %v339_v50 = vmul.f32 %v334_v39, %v734_v30  ;;  %v340_v51 = vmul.f32 %v334_v39, %v741_v35  ;;  %v341_v52 = vmul.f32 %v334_v39, %v731_v27 }
 0x279   :  { %v330_v45 = vsel %vm312_vm3, %v329_v43, %v326_v42 }
 0x27a   :  { %v345_v49 = vrot.slane %v330_v45, %v297_v19 }
 0x27c   :  { %v346_v53 = vadd.f32 %v345_v49, %v335_v44  ;;  %v347_v54 = vadd.f32 %v345_v49, %v336_v46  ;;  %v348_v55 = vadd.f32 %v345_v49, %v337_v47  ;;  %v349_v56 = vadd.f32 %v345_v49, %v338_v48 }
 0x27d   :  { %v350_v57 = vadd.f32 %v345_v49, %v339_v50  ;;  %v351_v16 = vadd.f32 %v345_v49, %v340_v51  ;;  %v352_v58 = vadd.f32 %v345_v49, %v341_v52 }
 0x27e   :  { %v353_v59 = vmax.f32 %v346_v53, 0.0  ;;  %v354_v11 = vmax.f32 %v347_v54, 0.0  ;;  %v355_v60 = vmax.f32 %v348_v55, 0.0  ;;  %v356_v20 = vmax.f32 %v349_v56, 0.0 }
 0x27f   :  { %v357_v61 = vmax.f32 %v350_v57, 0.0  ;;  %v358_v31 = vmax.f32 %v351_v16, 0.0  ;;  %v359_v62 = vmax.f32 %v352_v58, 0.0 }
 0x280   :  { %360 = vst [vmem:[%s797_s5] sm:$0xff] %v353_v59  ;;  %361 = vst [vmem:[%s797_s5 + $0x8] sm:$0xff] %v354_v11 }
 0x281   :  { %362 = vst [vmem:[%s797_s5 + $0x10] sm:$0xff] %v355_v60  ;;  %363 = vst [vmem:[%s797_s5 + $0x18] sm:$0xff] %v356_v20 }
 0x282   :  { %364 = vst [vmem:[%s797_s5 + $0x20] sm:$0xff] %v357_v61  ;;  %365 = vst [vmem:[%s797_s5 + $0x28] sm:$0xff] %v358_v31 }
 0x283   :  { %366 = vst [vmem:[%s797_s5 + $0x30] sm:$0x3] %v359_v62 }
 0x284   :  { %371 = vsyncpa [#allocation3], 1 }
 0x285   :  { %372 = vsyncpa [#allocation5], 1 }
 0x286   :  { %373 = vsyncpa [#allocation8], 1 }

// kernel: vowel_generator_forward.7
= control target key start
LH: loop header
LB: loop body
LE: loop exit
PB: predicated region body
PF: predicated region fallthrough
CT: control target
= control target key end

     0   :  { %v486_v3 = vmov 0.0   ;;  %v487_v8 = vmov 0   ;;  %vm221_vm0 = vcmask 932864   ;;  %s858_s1 = inlined_call_operand.vmem [shape: f32[128,242], index: 1, kind: input, shape index: {}]   ;;  %s859_s2 = inlined_call_operand.vmem [shape: f32[64,1], index: 2, kind: input, shape index: {}]   ;;  %s860_s0 = inlined_call_operand.vmem [shape: f32[64,128], index: 0, kind: input, shape index: {}]   ;;  %s861_s3 = inlined_call_operand.vmem [shape: f32[16,1], index: 3, kind: input, shape index: {}]   ;;  %s862_s4 = inlined_call_operand.vmem [shape: f32[16,1], index: 4, kind: input, shape index: {}]   ;;  %s863_s5 = inlined_call_operand.vmem [shape: f32[64,242], index: 5, kind: output, shape index: {}]  }
   0x1   :  { %v29_v0 = vld [vmem:[%s858_s1 + $0x8] sm:$0xff]  ;;  %v31_v1 = vld [vmem:[%s858_s1 + $0x18] sm:$0xff]  ;;  %v28_v2 = vld [vmem:[%s858_s1] sm:$0xff]  ;;  %172 = vmatprep.mubr.f32.mxu0 %v486_v3  ;;  %196 = vmatprep.mubr.f32.mxu1 %v486_v3 }
   0x2   :  { %v430_v4 = vpack.c.bf16 %v31_v1, %v29_v0  ;;  %v30_v5 = vld [vmem:[%s858_s1 + $0x10] sm:$0xff]  ;;  %v33_v6 = vld [vmem:[%s858_s1 + $0x28] sm:$0xff]  ;;  %v35_v7 = vld [vmem:[%s858_s1 + $0x38] sm:$0xff]  ;;  %481 = vset.pattern.permute.xlu1 %v487_v8  ;;  %480 = vset.pattern.permute.xlu0 %v487_v8 }
   0x3   :  { %v432_v9 = vpack.c.bf16 %v30_v5, %v28_v2  ;;  %v434_v10 = vpack.c.bf16 %v35_v7, %v33_v6  ;;  %v32_v11 = vld [vmem:[%s858_s1 + $0x20] sm:$0xff]  ;;  %v34_v12 = vld [vmem:[%s858_s1 + $0x30] sm:$0xff]  ;;  %v37_v13 = vld [vmem:[%s858_s1 + $0x48] sm:$0xff] }
   0x4   :  { %431 = vmatprep.subr.bf16.mxu0 %v430_v4  ;;  %462 = vmatprep.subr.bf16.mxu1 %v430_v4  ;;  %v39_v14 = vld [vmem:[%s858_s1 + $0x58] sm:$0xff]  ;;  %v436_v15 = vpack.c.bf16 %v34_v12, %v32_v11  ;;  %v36_v17 = vld [vmem:[%s858_s1 + $0x40] sm:$0xff]  ;;  %v38_v18 = vld [vmem:[%s858_s1 + $0x50] sm:$0xff] }
   0x5   :  { %433 = vmatpush1.bf16.msra.mxu0 %v432_v9  ;;  %470 = vmatpush1.bf16.msra.mxu1 %v432_v9  ;;  %v438_v16 = vpack.c.bf16 %v39_v14, %v37_v13  ;;  %v41_v19 = vld [vmem:[%s858_s1 + $0x68] sm:$0xff]  ;;  %v43_v20 = vld [vmem:[%s858_s1 + $0x78] sm:$0xff]  ;;  %v440_v21 = vpack.c.bf16 %v38_v18, %v36_v17  ;;  %v40_v23 = vld [vmem:[%s858_s1 + $0x60] sm:$0xff] }
   0x6   :  { %435 = vmatprep.subr.bf16.mxu0 %v434_v10  ;;  %463 = vmatprep.subr.bf16.mxu1 %v434_v10  ;;  %v442_v22 = vpack.c.bf16 %v43_v20, %v41_v19  ;;  %v42_v24 = vld [vmem:[%s858_s1 + $0x70] sm:$0xff]  ;;  %v45_v25 = vld [vmem:[%s858_s1 + $0x88] sm:$0xff]  ;;  %v47_v26 = vld [vmem:[%s858_s1 + $0x98] sm:$0xff] }
   0x7   :  { %v444_v27 = vpack.c.bf16 %v42_v24, %v40_v23  ;;  %v44_v28 = vld [vmem:[%s858_s1 + $0x80] sm:$0xff]  ;;  %v446_v29 = vpack.c.bf16 %v47_v26, %v45_v25  ;;  %v46_v30 = vld [vmem:[%s858_s1 + $0x90] sm:$0xff]  ;;  %v49_v33 = vld [vmem:[%s858_s1 + $0xa8] sm:$0xff] }
   0x8   :  { %v62_v31 = vld [vmem:[%s859_s2 + $0x10] sm:$0xff]  ;;  %v60_v32 = vld [vmem:[%s859_s2] sm:$0xff]  ;;  %v51_v34 = vld [vmem:[%s858_s1 + $0xb8] sm:$0xff]  ;;  %v448_v37 = vpack.c.bf16 %v46_v30, %v44_v28 }
   0x9   :  { %437 = vmatpush1.bf16.msra.mxu0 %v436_v15  ;;  %471 = vmatpush1.bf16.msra.mxu1 %v436_v15  ;;  %v63_v35 = vld [vmem:[%s859_s2 + $0x18] sm:$0xff]  ;;  %v61_v36 = vld [vmem:[%s859_s2 + $0x8] sm:$0xff]  ;;  %v450_v38 = vpack.c.bf16 %v51_v34, %v49_v33  ;;  %v48_v39 = vld [vmem:[%s858_s1 + $0xa0] sm:$0xff] }
   0xa   :  { %439 = vmatprep.subr.bf16.mxu0 %v438_v16  ;;  %464 = vmatprep.subr.bf16.mxu1 %v438_v16  ;;  %v50_v40 = vld [vmem:[%s858_s1 + $0xb0] sm:$0xff]  ;;  %v53_v41 = vld [vmem:[%s858_s1 + $0xc8] sm:$0xff]  ;;  %v55_v42 = vld [vmem:[%s858_s1 + $0xd8] sm:$0xff] }
   0xb   :  { %80 = vperm.xlu1 %481, %v62_v31   ;;  %70 = vperm.xlu0 %480, %v60_v32   ;;  %v65_v43 = vld [vmem:[%s859_s2 + $0x28] sm:$0xff]  ;;  %v64_v44 = vld [vmem:[%s859_s2 + $0x20] sm:$0xff]  ;;  %v452_v45 = vpack.c.bf16 %v50_v40, %v48_v39  ;;  %v454_v46 = vpack.c.bf16 %v55_v42, %v53_v41  ;;  %v54_v48 = vld [vmem:[%s858_s1 + $0xd0] sm:$0xff] }
   0xc   :  { %v52_v47 = vld [vmem:[%s858_s1 + $0xc0] sm:$0xff]  ;;  %v57_v49 = vld [vmem:[%s858_s1 + $0xe8] sm:$0xff]  ;;  %v59_v50 = vld [vmem:[%s858_s1 + $0xf8] sm:$0xff] }
   0xd   :  { %441 = vmatpush1.bf16.msra.mxu0 %v440_v21  ;;  %472 = vmatpush1.bf16.msra.mxu1 %v440_v21  ;;  %v67_v51 = vld [vmem:[%s859_s2 + $0x38] sm:$0xff]  ;;  %v66_v52 = vld [vmem:[%s859_s2 + $0x30] sm:$0xff]  ;;  %v456_v53 = vpack.c.bf16 %v54_v48, %v52_v47  ;;  %v458_v54 = vpack.c.bf16 %v59_v50, %v57_v49  ;;  %v56_v55 = vld [vmem:[%s858_s1 + $0xe0] sm:$0xff] }
   0xe   :  { %443 = vmatprep.subr.bf16.mxu0 %v442_v22  ;;  %465 = vmatprep.subr.bf16.mxu1 %v442_v22  ;;  %v58_v56 = vld [vmem:[%s858_s1 + $0xf0] sm:$0xff]  ;;  %v20_v58 = vld [vmem:[%s860_s0] sm:$0xff]  ;;  %v21_v60 = vld [vmem:[%s860_s0 + $0x8] sm:$0xff] }
   0xf   :  { %85 = vperm.xlu1 %481, %v63_v35   ;;  %75 = vperm.xlu0 %480, %v61_v36   ;;  %v460_v57 = vpack.c.bf16 %v58_v56, %v56_v55  ;;  %v24_v59 = vld [vmem:[%s860_s0 + $0x20] sm:$0xff]  ;;  %v25_v61 = vld [vmem:[%s860_s0 + $0x28] sm:$0xff]  ;;  %v22_v62 = vld [vmem:[%s860_s0 + $0x10] sm:$0xff] }
  0x10   :  { %v26_v63 = vld [vmem:[%s860_s0 + $0x30] sm:$0xff]  ;;  %v23_v0 = vld [vmem:[%s860_s0 + $0x18] sm:$0xff] }
  0x11   :  { %445 = vmatpush1.bf16.msra.mxu0 %v444_v27  ;;  %473 = vmatpush1.bf16.msra.mxu1 %v444_v27  ;;  %v27_v1 = vld [vmem:[%s860_s0 + $0x38] sm:$0xff] }
  0x12   :  { %447 = vmatprep.subr.bf16.mxu0 %v446_v29  ;;  %466 = vmatprep.subr.bf16.mxu1 %v446_v29 }
  0x13   :  { %95 = vperm.xlu1 %481, %v65_v43   ;;  %90 = vperm.xlu0 %480, %v64_v44  }
  0x15   :  { %449 = vmatpush1.bf16.msra.mxu0 %v448_v37  ;;  %474 = vmatpush1.bf16.msra.mxu1 %v448_v37 }
  0x16   :  { %451 = vmatprep.subr.bf16.mxu0 %v450_v38  ;;  %467 = vmatprep.subr.bf16.mxu1 %v450_v38 }
  0x17   :  { %105 = vperm.xlu1 %481, %v67_v51   ;;  %100 = vperm.xlu0 %480, %v66_v52  }
  0x19   :  { %453 = vmatpush1.bf16.msra.mxu0 %v452_v45  ;;  %475 = vmatpush1.bf16.msra.mxu1 %v452_v45 }
  0x1a   :  { %455 = vmatprep.subr.bf16.mxu0 %v454_v46  ;;  %468 = vmatprep.subr.bf16.mxu1 %v454_v46 }
  0x1d   :  { %457 = vmatpush1.bf16.msra.mxu0 %v456_v53  ;;  %476 = vmatpush1.bf16.msra.mxu1 %v456_v53 }
  0x1e   :  { %459 = vmatprep.subr.bf16.mxu0 %v458_v54  ;;  %469 = vmatprep.subr.bf16.mxu1 %v458_v54 }
  0x21   :  { %461 = vmatpush1.bf16.msra.mxu0 %v460_v57  ;;  %477 = vmatpush1.bf16.msra.mxu1 %v460_v57 }
  0x24   :  { %173 = vmatmul.mubr.f32.vlgmr.msra.gmra.mrb[0].mxu0 %v20_v58  ;;  %197 = vmatmul.mubr.f32.vlgmr.msra.gmra.mrb[0].mxu1 %v24_v59 }
  0x25   :  { %178 = vmatprep.mubr.f32.mxu0 %v486_v3  ;;  %202 = vmatprep.mubr.f32.mxu1 %v486_v3 }
  0x28   :  { %179 = vmatmul.mubr.f32.gmra.mrb[2].mxu0 %v21_v60  ;;  %203 = vmatmul.mubr.f32.gmra.mrb[2].mxu1 %v25_v61 }
  0x29   :  { %184 = vmatprep.mubr.f32.mxu0 %v486_v3  ;;  %208 = vmatprep.mubr.f32.mxu1 %v486_v3 }
  0x2c   :  { %185 = vmatmul.mubr.f32.gmra.mrb[4].mxu0 %v22_v62  ;;  %209 = vmatmul.mubr.f32.gmra.mrb[4].mxu1 %v26_v63 }
  0x2d   :  { %190 = vmatprep.mubr.f32.mxu0 %v486_v3  ;;  %214 = vmatprep.mubr.f32.mxu1 %v486_v3 }
  0x30   :  { %191 = vmatmul.mubr.f32.gmra.mrb[6].mxu0 %v23_v0  ;;  %215 = vmatmul.mubr.f32.gmra.mrb[6].mxu1 %v27_v1 }
  0x8a   :  { %v71_v2 = vpop.permute.xlu0 %70  ;;  %v670_v4 = vpop.permute.xlu1 %80 }
  0x8e   :  { %v76_v5 = vpop.permute.xlu0 %75  ;;  %v672_v6 = vpop.permute.xlu1 %85 }
  0x92   :  { %v91_v7 = vpop.permute.xlu0 %90  ;;  %v96_v13 = vpop.permute.xlu1 %95 }
  0x96   :  { %v101_v43 = vpop.permute.xlu0 %100  ;;  %v106_v1 = vpop.permute.xlu1 %105 }
  0xf7   :  { %v174_v8 = vpop.f32.mrb[0].mxu0  ;;  %v198_v9 = vpop.f32.mrb[0].mxu1 }
  0xf8   :  { %v176_v3 = vpop.f32.mrb[1].mxu0  ;;  %v200_v10 = vpop.f32.mrb[1].mxu1  ;;  %v678_v14 = vadd.f32 %v174_v8, %v71_v2  ;;  %v680_v15 = vadd.f32 %v198_v9, %v91_v7 }
  0xf9   :  { %v674_v11 = vadd.f32 %v176_v3, %v71_v2  ;;  %v676_v12 = vadd.f32 %v200_v10, %v91_v7 }
  0xfa   :  { %v232_v31 = vmul.f32 %v678_v14, %v678_v14  ;;  %v280_v44 = vmul.f32 %v680_v15, %v680_v15 }
  0xfb   :  { %v180_v16 = vpop.f32.mrb[2].mxu0  ;;  %v204_v17 = vpop.f32.mrb[2].mxu1  ;;  %v270_v18 = vsel %vm221_vm0, %v676_v12, 0.0  ;;  %v222_v19 = vsel %vm221_vm0, %v674_v11, 0.0  ;;  %v233_v20 = vmul.f32 %v674_v11, %v674_v11  ;;  %v281_v28 = vmul.f32 %v676_v12, %v676_v12 }
  0xfc   :  { %v182_v21 = vpop.f32.mrb[3].mxu0  ;;  %v206_v22 = vpop.f32.mrb[3].mxu1  ;;  %v271_v23 = vadd.f32 %v270_v18, %v680_v15  ;;  %v223_v24 = vadd.f32 %v222_v19, %v678_v14  ;;  %v697_v29 = vadd.f32 %v180_v16, %v76_v5  ;;  %v699_v30 = vadd.f32 %v204_v17, %v96_v13 }
  0xfd   :  { %v690_v25 = vadd.f32 %v182_v21, %v76_v5  ;;  %v692_v26 = vadd.f32 %v206_v22, %v96_v13  ;;  %v236_v27 = vsel %vm221_vm0, %v233_v20, 0.0  ;;  %v284_v40 = vsel %vm221_vm0, %v281_v28, 0.0 }
  0xfe   :  { %272 = vadd.xlane.f32.xlu1 %v271_v23  ;;  %224 = vadd.xlane.f32.xlu0 %v223_v24  ;;  %v237_v38 = vadd.f32 %v236_v27, %v232_v31  ;;  %v234_v45 = vmul.f32 %v697_v29, %v697_v29  ;;  %v285_v50 = vadd.f32 %v284_v40, %v280_v44 }
  0xff   :  { %v186_v32 = vpop.f32.mrb[4].mxu0  ;;  %v210_v33 = vpop.f32.mrb[4].mxu1  ;;  %v274_v34 = vsel %vm221_vm0, %v692_v26, 0.0  ;;  %v235_v35 = vmul.f32 %v690_v25, %v690_v25  ;;  %v283_v42 = vmul.f32 %v692_v26, %v692_v26  ;;  %v226_v54 = vsel %vm221_vm0, %v690_v25, 0.0 }
 0x100   :  { %v188_v36 = vpop.f32.mrb[5].mxu0  ;;  %v212_v37 = vpop.f32.mrb[5].mxu1  ;;  %v275_v39 = vadd.f32 %v274_v34, %v699_v30  ;;  %v282_v56 = vmul.f32 %v699_v30, %v699_v30  ;;  %v227_v57 = vadd.f32 %v226_v54, %v697_v29  ;;  %v737_v63 = vadd.f32 %v186_v32, %v670_v4 }
 0x101   :  { %v240_v41 = vsel %vm221_vm0, %v235_v35, 0.0  ;;  %v717_v52 = vadd.f32 %v188_v36, %v670_v4  ;;  %v719_v53 = vadd.f32 %v212_v37, %v101_v43  ;;  %v288_v55 = vsel %vm221_vm0, %v283_v42, 0.0 }
 0x102   :  { %238 = vadd.xlane.f32.xlu1 %v237_v38  ;;  %276 = vadd.xlane.f32.xlu0 %v275_v39  ;;  %v241_v51 = vadd.f32 %v240_v41, %v234_v45  ;;  %v289_v58 = vadd.f32 %v288_v55, %v282_v56  ;;  %v739_v0 = vadd.f32 %v210_v33, %v101_v43 }
 0x103   :  { %v192_v46 = vpop.f32.mrb[6].mxu0  ;;  %v216_v47 = vpop.f32.mrb[6].mxu1  ;;  %v294_v60 = vsel %vm221_vm0, %v719_v53, 0.0  ;;  %v246_v61 = vsel %vm221_vm0, %v717_v52, 0.0  ;;  %v257_v62 = vmul.f32 %v717_v52, %v717_v52  ;;  %v305_v4 = vmul.f32 %v719_v53, %v719_v53 }
 0x104   :  { %v194_v48 = vpop.f32.mrb[7].mxu0  ;;  %v218_v49 = vpop.f32.mrb[7].mxu1  ;;  %v295_v2 = vadd.f32 %v294_v60, %v739_v0  ;;  %v247_v5 = vadd.f32 %v246_v61, %v737_v63  ;;  %v751_v3 = vadd.f32 %v192_v46, %v672_v6  ;;  %v256_v10 = vmul.f32 %v737_v63, %v737_v63 }
 0x105   :  { %v728_v59 = vadd.f32 %v194_v48, %v672_v6  ;;  %v743_v7 = vadd.f32 %v218_v49, %v106_v1  ;;  %v260_v8 = vsel %vm221_vm0, %v257_v62, 0.0  ;;  %v308_v17 = vsel %vm221_vm0, %v305_v4, 0.0 }
 0x106   :  { %286 = vadd.xlane.f32.xlu1 %v285_v50  ;;  %242 = vadd.xlane.f32.xlu0 %v241_v51  ;;  %v261_v13 = vadd.f32 %v260_v8, %v256_v10  ;;  %v761_v20 = vadd.f32 %v216_v47, %v106_v1  ;;  %v304_v6 = vmul.f32 %v739_v0, %v739_v0 }
 0x107   :  { %v250_v9 = vsel %vm221_vm0, %v728_v59, 0.0  ;;  %v298_v18 = vsel %vm221_vm0, %v743_v7, 0.0  ;;  %v259_v19 = vmul.f32 %v728_v59, %v728_v59  ;;  %v307_v24 = vmul.f32 %v743_v7, %v743_v7 }
 0x108   :  { %v251_v16 = vadd.f32 %v250_v9, %v751_v3  ;;  %v309_v21 = vadd.f32 %v308_v17, %v304_v6  ;;  %v299_v22 = vadd.f32 %v298_v18, %v761_v20  ;;  %v258_v27 = vmul.f32 %v751_v3, %v751_v3 }
 0x109   :  { %v264_v23 = vsel %vm221_vm0, %v259_v19, 0.0  ;;  %v312_v31 = vsel %vm221_vm0, %v307_v24, 0.0  ;;  %v306_v32 = vmul.f32 %v761_v20, %v761_v20 }
 0x10a   :  { %228 = vadd.xlane.f32.xlu1 %v227_v57  ;;  %290 = vadd.xlane.f32.xlu0 %v289_v58  ;;  %v265_v28 = vadd.f32 %v264_v23, %v258_v27  ;;  %v336_v27 = vld [vmem:[%s862_s4] sm:$0xff] }
 0x10b   :  { %v313_v33 = vadd.f32 %v312_v31, %v306_v32  ;;  %v329_v32 = vld [vmem:[%s861_s3 + $0x8] sm:$0xff] }
 0x10e   :  { %296 = vadd.xlane.f32.xlu1 %v295_v2  ;;  %248 = vadd.xlane.f32.xlu0 %v247_v5 }
 0x112   :  { %262 = vadd.xlane.f32.xlu1 %v261_v13  ;;  %252 = vadd.xlane.f32.xlu0 %v251_v16 }
 0x116   :  { %310 = vadd.xlane.f32.xlu1 %v309_v21  ;;  %300 = vadd.xlane.f32.xlu0 %v299_v22  ;;  %v328_v22 = vld [vmem:[%s861_s3] sm:$0xff] }
 0x11a   :  { %266 = vadd.xlane.f32.xlu0 %v265_v28 }
 0x11e   :  { %314 = vadd.xlane.f32.xlu0 %v313_v33 }
 0x18b   :  { %v273_v34 = vpop.xlane.xlu1 %272  ;;  %v225_v35 = vpop.xlane.xlu0 %224 }
 0x18f   :  { %v239_v36 = vpop.xlane.xlu1 %238  ;;  %v277_v37 = vpop.xlane.xlu0 %276 }
 0x193   :  { %v287_v38 = vpop.xlane.xlu1 %286  ;;  %v243_v39 = vpop.xlane.xlu0 %242 }
 0x197   :  { %v229_v40 = vpop.xlane.xlu1 %228  ;;  %v291_v41 = vpop.xlane.xlu0 %290 }
 0x19b   :  { %v297_v42 = vpop.xlane.xlu1 %296  ;;  %v249_v43 = vpop.xlane.xlu0 %248 }
 0x19c   :  { %v254_v44 = vadd.f32 %v249_v43, %v225_v35  ;;  %v337_v35 = vld [vmem:[%s862_s4 + $0x8] sm:$0xff] }
 0x19e   :  { %v278_v45 = vadd.f32 %v273_v34, %v254_v44 }
 0x19f   :  { %v263_v46 = vpop.xlane.xlu1 %262  ;;  %v253_v47 = vpop.xlane.xlu0 %252 }
 0x1a0   :  { %v302_v48 = vadd.f32 %v297_v42, %v278_v45  ;;  %v268_v49 = vadd.f32 %v263_v46, %v239_v36  ;;  %v255_v50 = vadd.f32 %v253_v47, %v229_v40 }
 0x1a2   :  { %v318_v51 = vmul.f32 0.0010330578, %v302_v48  ;;  %v292_v54 = vadd.f32 %v287_v38, %v268_v49  ;;  %v279_v55 = vadd.f32 %v277_v37, %v255_v50 }
 0x1a3   :  { %v311_v56 = vpop.xlane.xlu1 %310  ;;  %v301_v57 = vpop.xlane.xlu0 %300 }
 0x1a4   :  { %v316_v58 = vadd.f32 %v311_v56, %v292_v54  ;;  %v322_v61 = vmul.f32 %v318_v51, %v318_v51  ;;  %v303_v62 = vadd.f32 %v301_v57, %v279_v55 }
 0x1a6   :  { %v320_v60 = vmul.f32 0.0010330578, %v316_v58  ;;  %v319_v9 = vmul.f32 0.0010330578, %v303_v62 }
 0x1a7   :  { %v267_v1 = vpop.xlane.xlu0 %266 }
 0x1a8   :  { %v324_v2 = vsub.f32 %v320_v60, %v322_v61  ;;  %v269_v5 = vadd.f32 %v267_v1, %v243_v39  ;;  %v323_v17 = vmul.f32 %v319_v9, %v319_v9 }
 0x1aa   :  { %v326_v8 = vmax.f32 %v324_v2, 0.0  ;;  %v293_v4 = vadd.f32 %v291_v41, %v269_v5 }
 0x1ab   :  { %v315_v10 = vpop.xlane.xlu0 %314 }
 0x1ac   :  { %v330_v13 = vadd.f32 1e-05, %v326_v8  ;;  %v317_v16 = vadd.f32 %v315_v10, %v293_v4 }
 0x1ae   :  { %482 = vrsqrt.f32 %v330_v13  ;;  %v321_v18 = vmul.f32 0.0010330578, %v317_v16 }
 0x1b0   :  { %v325_v19 = vsub.f32 %v321_v18, %v323_v17 }
 0x1b2   :  { %v327_v6 = vmax.f32 %v325_v19, 0.0 }
 0x1b4   :  { %v331_v21 = vadd.f32 1e-05, %v327_v6 }
 0x1b6   :  { %484 = vrsqrt.f32 %v331_v21 }
 0x1b8   :  { %v483_v23 = vpop.eup %482 }
 0x1b9   :  { %v334_v24 = vmul.f32 %v483_v23, %v328_v22 }
 0x1bb   :  { %344 = vperm.xlu1 %481, %v334_v24   ;;  %v338_v28 = vmul.f32 %v334_v24, %v318_v51 }
 0x1bd   :  { %v340_v31 = vsub.f32 %v336_v27, %v338_v28 }
 0x1bf   :  { %358 = vperm.xlu1 %481, %v340_v31  }
 0x1c0   :  { %v485_v33 = vpop.eup %484 }
 0x1c1   :  { %v335_v34 = vmul.f32 %v485_v33, %v329_v32 }
 0x1c3   :  { %349 = vperm.xlu0 %480, %v335_v34   ;;  %v339_v36 = vmul.f32 %v335_v34, %v319_v9 }
 0x1c5   :  { %v341_v37 = vsub.f32 %v337_v35, %v339_v36 }
 0x1c7   :  { %363 = vperm.xlu1 %481, %v341_v37  }
 0x23a   :  { %v345_v38 = vpop.permute.xlu1 %344 }
 0x23b   :  { %v352_v39 = vmul.f32 %v345_v38, %v678_v14  ;;  %v353_v40 = vmul.f32 %v345_v38, %v674_v11  ;;  %v378_v41 = vmul.f32 %v345_v38, %v737_v63  ;;  %v379_v42 = vmul.f32 %v345_v38, %v717_v52 }
 0x23c   :  { %v394_v43 = vmul.f32 %v345_v38, %v680_v15  ;;  %v395_v44 = vmul.f32 %v345_v38, %v676_v12  ;;  %v410_v45 = vmul.f32 %v345_v38, %v739_v0  ;;  %v411_v46 = vmul.f32 %v345_v38, %v719_v53 }
 0x23e   :  { %v359_v47 = vpop.permute.xlu1 %358 }
 0x23f   :  { %v366_v48 = vadd.f32 %v359_v47, %v352_v39  ;;  %v367_v49 = vadd.f32 %v359_v47, %v353_v40  ;;  %v382_v50 = vadd.f32 %v378_v41, %v359_v47  ;;  %v383_v51 = vadd.f32 %v379_v42, %v359_v47 }
 0x240   :  { %v398_v14 = vadd.f32 %v394_v43, %v359_v47  ;;  %v399_v54 = vadd.f32 %v395_v44, %v359_v47  ;;  %v414_v11 = vadd.f32 %v410_v45, %v359_v47  ;;  %v415_v55 = vadd.f32 %v411_v46, %v359_v47 }
 0x241   :  { %v370_v63 = vmax.f32 %v366_v48, 0.0  ;;  %v371_v56 = vmax.f32 %v367_v49, 0.0  ;;  %v386_v52 = vmax.f32 %v382_v50, 0.0  ;;  %v387_v57 = vmax.f32 %v383_v51, 0.0 }
 0x242   :  { %v402_v15 = vmax.f32 %v398_v14, 0.0  ;;  %v403_v58 = vmax.f32 %v399_v54, 0.0  ;;  %v418_v12 = vmax.f32 %v414_v11, 0.0  ;;  %v419_v60 = vmax.f32 %v415_v55, 0.0  ;;  %v350_v0 = vpop.permute.xlu0 %349 }
 0x243   :  { %374 = vst [vmem:[%s863_s5] sm:$0xff] %v370_v63  ;;  %375 = vst.msk [vmem:[%s863_s5 + $0x8] sm:$0xff] %vm221_vm0, %v371_v56  ;;  %v354_v53 = vmul.f32 %v350_v0, %v697_v29  ;;  %v355_v61 = vmul.f32 %v350_v0, %v690_v25  ;;  %v380_v62 = vmul.f32 %v350_v0, %v751_v3 }
 0x244   :  { %390 = vst [vmem:[%s863_s5 + $0x20] sm:$0xff] %v386_v52  ;;  %391 = vst.msk [vmem:[%s863_s5 + $0x28] sm:$0xff] %vm221_vm0, %v387_v57  ;;  %v381_v1 = vmul.f32 %v350_v0, %v728_v59  ;;  %v396_v2 = vmul.f32 %v350_v0, %v699_v30  ;;  %v397_v5 = vmul.f32 %v350_v0, %v692_v26 }
 0x245   :  { %406 = vst [vmem:[%s863_s5 + $0x40] sm:$0xff] %v402_v15  ;;  %407 = vst.msk [vmem:[%s863_s5 + $0x48] sm:$0xff] %vm221_vm0, %v403_v58  ;;  %v412_v8 = vmul.f32 %v350_v0, %v761_v20  ;;  %v413_v9 = vmul.f32 %v350_v0, %v743_v7 }
 0x246   :  { %422 = vst [vmem:[%s863_s5 + $0x60] sm:$0xff] %v418_v12  ;;  %423 = vst.msk [vmem:[%s863_s5 + $0x68] sm:$0xff] %vm221_vm0, %v419_v60  ;;  %v364_v4 = vpop.permute.xlu1 %363 }
 0x247   :  { %v368_v10 = vadd.f32 %v364_v4, %v354_v53  ;;  %v369_v13 = vadd.f32 %v364_v4, %v355_v61  ;;  %v384_v16 = vadd.f32 %v380_v62, %v364_v4  ;;  %v385_v17 = vadd.f32 %v381_v1, %v364_v4 }
 0x248   :  { %v400_v29 = vadd.f32 %v396_v2, %v364_v4  ;;  %v401_v18 = vadd.f32 %v397_v5, %v364_v4  ;;  %v416_v25 = vadd.f32 %v412_v8, %v364_v4  ;;  %v417_v19 = vadd.f32 %v413_v9, %v364_v4 }
 0x249   :  { %v372_v3 = vmax.f32 %v368_v10, 0.0  ;;  %v373_v6 = vmax.f32 %v369_v13, 0.0  ;;  %v388_v59 = vmax.f32 %v384_v16, 0.0  ;;  %v389_v21 = vmax.f32 %v385_v17, 0.0 }
 0x24a   :  { %v404_v30 = vmax.f32 %v400_v29, 0.0  ;;  %v405_v22 = vmax.f32 %v401_v18, 0.0  ;;  %v420_v26 = vmax.f32 %v416_v25, 0.0  ;;  %v421_v23 = vmax.f32 %v417_v19, 0.0 }
 0x24b   :  { %376 = vst [vmem:[%s863_s5 + $0x10] sm:$0xff] %v372_v3  ;;  %377 = vst.msk [vmem:[%s863_s5 + $0x18] sm:$0xff] %vm221_vm0, %v373_v6 }
 0x24c   :  { %392 = vst [vmem:[%s863_s5 + $0x30] sm:$0xff] %v388_v59  ;;  %393 = vst.msk [vmem:[%s863_s5 + $0x38] sm:$0xff] %vm221_vm0, %v389_v21 }
 0x24d   :  { %408 = vst [vmem:[%s863_s5 + $0x50] sm:$0xff] %v404_v30  ;;  %409 = vst.msk [vmem:[%s863_s5 + $0x58] sm:$0xff] %vm221_vm0, %v405_v22 }
 0x24e   :  { %424 = vst [vmem:[%s863_s5 + $0x70] sm:$0xff] %v420_v26  ;;  %425 = vst.msk [vmem:[%s863_s5 + $0x78] sm:$0xff] %vm221_vm0, %v421_v23 }

// kernel: vowel_generator_forward.8
= control target key start
LH: loop header
LB: loop body
LE: loop exit
PB: predicated region body
PF: predicated region fallthrough
CT: control target
= control target key end

     0   :  { %v1025_v3 = vmov 0.0   ;;  %v1026_v8 = vmov 0   ;;  %vm120_vm0 = vcmask 523264   ;;  %vm581_vm1 = vcmask 277504   ;;  %s1839_s1 = inlined_call_operand.vmem [shape: f32[64,1058], index: 1, kind: input, shape index: {}]   ;;  %s1840_s0 = inlined_call_operand.vmem [shape: f32[32,64], index: 0, kind: input, shape index: {}]   ;;  %s1841_s2 = inlined_call_operand.vmem [shape: f32[32,1], index: 2, kind: input, shape index: {}]   ;;  %s1842_s3 = inlined_call_operand.vmem [shape: f32[8,1], index: 3, kind: input, shape index: {}]   ;;  %s1843_s4 = inlined_call_operand.vmem [shape: f32[8,1], index: 4, kind: input, shape index: {}]   ;;  %s1844_s5 = inlined_call_operand.vmem [shape: f32[32,1058], index: 5, kind: output, shape index: {}]  }
   0x1   :  { %v25_v0 = vld [vmem:[%s1839_s1 + $0x8] sm:$0xff]  ;;  %v34_v1 = vld [vmem:[%s1839_s1 + $0x50] sm:$0xff]  ;;  %v27_v2 = vld [vmem:[%s1839_s1 + $0x18] sm:$0xff]  ;;  %197 = vmatprep.mubr.f32.mxu0 %v1025_v3  ;;  %286 = vmatprep.mubr.f32.mxu1 %v1025_v3 }
   0x2   :  { %v931_v4 = vpack.c.bf16 %v34_v1, %v25_v0  ;;  %v36_v5 = vld [vmem:[%s1839_s1 + $0x60] sm:$0xff]  ;;  %v33_v7 = vld [vmem:[%s1839_s1 + $0x48] sm:$0xff]  ;;  %1021 = vset.pattern.permute.xlu0 %v1026_v8  ;;  %1022 = vset.pattern.permute.xlu1 %v1026_v8  ;;  %v26_v11 = vld [vmem:[%s1839_s1 + $0x10] sm:$0xff] }
   0x3   :  { %v24_v6 = vld [vmem:[%s1839_s1] sm:$0xff]  ;;  %v947_v9 = vpack.c.bf16 %v36_v5, %v27_v2  ;;  %v35_v12 = vld [vmem:[%s1839_s1 + $0x58] sm:$0xff]  ;;  %v45_v16 = vld [vmem:[%s1839_s1 + $0xa8] sm:$0xff] }
   0x4   :  { %v933_v10 = vpack.c.bf16 %v33_v7, %v24_v6  ;;  %v43_v13 = vld [vmem:[%s1839_s1 + $0x98] sm:$0xff]  ;;  %932 = vmatprep.subr.bf16.mxu0 %v931_v4  ;;  %v949_v14 = vpack.c.bf16 %v35_v12, %v26_v11  ;;  %v52_v15 = vld [vmem:[%s1839_s1 + $0xe0] sm:$0xff]  ;;  %v54_v17 = vld [vmem:[%s1839_s1 + $0xf0] sm:$0xff] }
   0x5   :  { %948 = vmatprep.subr.bf16.mxu1 %v947_v9  ;;  %v935_v18 = vpack.c.bf16 %v52_v15, %v43_v13  ;;  %v951_v19 = vpack.c.bf16 %v54_v17, %v45_v16  ;;  %v42_v20 = vld [vmem:[%s1839_s1 + $0x90] sm:$0xff]  ;;  %v51_v21 = vld [vmem:[%s1839_s1 + $0xd8] sm:$0xff]  ;;  %v44_v22 = vld [vmem:[%s1839_s1 + $0xa0] sm:$0xff] }
   0x6   :  { %934 = vmatpush1.bf16.msra.mxu0 %v933_v10  ;;  %950 = vmatpush1.bf16.msra.mxu1 %v949_v14  ;;  %v937_v23 = vpack.c.bf16 %v51_v21, %v42_v20  ;;  %v53_v24 = vld [vmem:[%s1839_s1 + $0xe8] sm:$0xff]  ;;  %v70_v26 = vld [vmem:[%s1839_s1 + $0x170] sm:$0xff]  ;;  %v63_v29 = vld [vmem:[%s1839_s1 + $0x138] sm:$0xff] }
   0x7   :  { %v61_v25 = vld [vmem:[%s1839_s1 + $0x128] sm:$0xff]  ;;  %936 = vmatprep.subr.bf16.mxu0 %v935_v18  ;;  %952 = vmatprep.subr.bf16.mxu1 %v951_v19  ;;  %v953_v27 = vpack.c.bf16 %v53_v24, %v44_v22  ;;  %v72_v30 = vld [vmem:[%s1839_s1 + $0x180] sm:$0xff]  ;;  %v62_v34 = vld [vmem:[%s1839_s1 + $0x130] sm:$0xff] }
   0x8   :  { %v939_v28 = vpack.c.bf16 %v70_v26, %v61_v25  ;;  %v60_v31 = vld [vmem:[%s1839_s1 + $0x120] sm:$0xff]  ;;  %v955_v32 = vpack.c.bf16 %v72_v30, %v63_v29  ;;  %v69_v33 = vld [vmem:[%s1839_s1 + $0x168] sm:$0xff]  ;;  %v71_v35 = vld [vmem:[%s1839_s1 + $0x178] sm:$0xff] }
   0x9   :  { %v941_v36 = vpack.c.bf16 %v69_v33, %v60_v31  ;;  %v79_v37 = vld [vmem:[%s1839_s1 + $0x1b8] sm:$0xff]  ;;  %v88_v38 = vld [vmem:[%s1839_s1 + $0x200] sm:$0xff]  ;;  %v81_v39 = vld [vmem:[%s1839_s1 + $0x1c8] sm:$0xff]  ;;  %v957_v40 = vpack.c.bf16 %v71_v35, %v62_v34 }
   0xa   :  { %938 = vmatpush1.bf16.msra.mxu0 %v937_v23  ;;  %954 = vmatpush1.bf16.msra.mxu1 %v953_v27  ;;  %v943_v41 = vpack.c.bf16 %v88_v38, %v79_v37  ;;  %v90_v42 = vld [vmem:[%s1839_s1 + $0x210] sm:$0xff]  ;;  %v87_v44 = vld [vmem:[%s1839_s1 + $0x1f8] sm:$0xff]  ;;  %v80_v46 = vld [vmem:[%s1839_s1 + $0x1c0] sm:$0xff] }
   0xb   :  { %940 = vmatprep.subr.bf16.mxu0 %v939_v28  ;;  %v78_v43 = vld [vmem:[%s1839_s1 + $0x1b0] sm:$0xff]  ;;  %956 = vmatprep.subr.bf16.mxu1 %v955_v32  ;;  %v959_v45 = vpack.c.bf16 %v90_v42, %v81_v39  ;;  %v89_v47 = vld [vmem:[%s1839_s1 + $0x208] sm:$0xff]  ;;  %v31_v50 = vld [vmem:[%s1839_s1 + $0x38] sm:$0xff] }
   0xc   :  { %v29_v48 = vld [vmem:[%s1839_s1 + $0x28] sm:$0xff]  ;;  %v38_v49 = vld [vmem:[%s1839_s1 + $0x70] sm:$0xff]  ;;  %v945_v51 = vpack.c.bf16 %v87_v44, %v78_v43  ;;  %v40_v52 = vld [vmem:[%s1839_s1 + $0x80] sm:$0xff]  ;;  %v961_v53 = vpack.c.bf16 %v89_v47, %v80_v46 }
   0xd   :  { %v963_v54 = vpack.c.bf16 %v38_v49, %v29_v48  ;;  %v28_v55 = vld [vmem:[%s1839_s1 + $0x20] sm:$0xff]  ;;  %v37_v56 = vld [vmem:[%s1839_s1 + $0x68] sm:$0xff]  ;;  %v979_v57 = vpack.c.bf16 %v40_v52, %v31_v50  ;;  %v30_v58 = vld [vmem:[%s1839_s1 + $0x30] sm:$0xff] }
   0xe   :  { %942 = vmatpush1.bf16.msra.mxu0 %v941_v36  ;;  %958 = vmatpush1.bf16.msra.mxu1 %v957_v40  ;;  %v39_v59 = vld [vmem:[%s1839_s1 + $0x78] sm:$0xff]  ;;  %v56_v61 = vld [vmem:[%s1839_s1 + $0x100] sm:$0xff]  ;;  %v965_v63 = vpack.c.bf16 %v37_v56, %v28_v55  ;;  %v49_v0 = vld [vmem:[%s1839_s1 + $0xc8] sm:$0xff] }
   0xf   :  { %944 = vmatprep.subr.bf16.mxu0 %v943_v41  ;;  %960 = vmatprep.subr.bf16.mxu1 %v959_v45  ;;  %v47_v60 = vld [vmem:[%s1839_s1 + $0xb8] sm:$0xff]  ;;  %v1188_v62 = vld [vmem:[%s1840_s0] sm:$0xff]  ;;  %v58_v1 = vld [vmem:[%s1839_s1 + $0x110] sm:$0xff]  ;;  %v981_v2 = vpack.c.bf16 %v39_v59, %v30_v58 }
  0x10   :  { %v46_v4 = vld [vmem:[%s1839_s1 + $0xb0] sm:$0xff]  ;;  %v55_v5 = vld [vmem:[%s1839_s1 + $0xf8] sm:$0xff]  ;;  %v967_v6 = vpack.c.bf16 %v56_v61, %v47_v60  ;;  %v48_v7 = vld [vmem:[%s1839_s1 + $0xc0] sm:$0xff]  ;;  %v983_v9 = vpack.c.bf16 %v58_v1, %v49_v0 }
  0x11   :  { %v57_v8 = vld [vmem:[%s1839_s1 + $0x108] sm:$0xff]  ;;  %v74_v11 = vld [vmem:[%s1839_s1 + $0x190] sm:$0xff]  ;;  %v969_v13 = vpack.c.bf16 %v55_v5, %v46_v4  ;;  %v67_v14 = vld [vmem:[%s1839_s1 + $0x158] sm:$0xff] }
  0x12   :  { %946 = vmatpush1.bf16.msra.mxu0 %v945_v51  ;;  %962 = vmatpush1.bf16.msra.mxu1 %v961_v53  ;;  %v65_v10 = vld [vmem:[%s1839_s1 + $0x148] sm:$0xff]  ;;  %v76_v15 = vld [vmem:[%s1839_s1 + $0x1a0] sm:$0xff]  ;;  %v985_v16 = vpack.c.bf16 %v57_v8, %v48_v7  ;;  %v66_v20 = vld [vmem:[%s1839_s1 + $0x150] sm:$0xff] }
  0x13   :  { %964 = vmatprep.subr.bf16.mxu0 %v963_v54  ;;  %980 = vmatprep.subr.bf16.mxu1 %v979_v57  ;;  %v1221_v12 = vld [vmem:[%s1840_s0 + $0x8] sm:$0xff]  ;;  %v64_v17 = vld [vmem:[%s1839_s1 + $0x140] sm:$0xff]  ;;  %v971_v19 = vpack.c.bf16 %v74_v11, %v65_v10  ;;  %v75_v21 = vld [vmem:[%s1839_s1 + $0x198] sm:$0xff]  ;;  %v987_v22 = vpack.c.bf16 %v76_v15, %v67_v14 }
  0x14   :  { %v73_v18 = vld [vmem:[%s1839_s1 + $0x188] sm:$0xff]  ;;  %v83_v23 = vld [vmem:[%s1839_s1 + $0x1d8] sm:$0xff]  ;;  %v92_v24 = vld [vmem:[%s1839_s1 + $0x220] sm:$0xff]  ;;  %v989_v29 = vpack.c.bf16 %v75_v21, %v66_v20 }
  0x15   :  { %877 = vmatmul.mubr.msk.f32.vlgmr.msra.gmra.mrb[0].mxu0 %vm120_vm0, %v1188_v62  ;;  %881 = vmatmul.mubr.msk.f32.vlgmr.msra.gmra.mrb[0].mxu1 %vm120_vm0, %v1188_v62  ;;  %v1256_v25 = vld [vmem:[%s1840_s0 + $0x10] sm:$0xff]  ;;  %v973_v26 = vpack.c.bf16 %v73_v18, %v64_v17  ;;  %v85_v27 = vld [vmem:[%s1839_s1 + $0x1e8] sm:$0xff]  ;;  %v91_v31 = vld [vmem:[%s1839_s1 + $0x218] sm:$0xff]  ;;  %v975_v32 = vpack.c.bf16 %v92_v24, %v83_v23 }
  0x16   :  { %966 = vmatpush1.bf16.msra.mxu0 %v965_v63  ;;  %982 = vmatpush1.bf16.msra.mxu1 %v981_v2  ;;  %v94_v28 = vld [vmem:[%s1839_s1 + $0x230] sm:$0xff]  ;;  %v84_v33 = vld [vmem:[%s1839_s1 + $0x1e0] sm:$0xff]  ;;  %v93_v34 = vld [vmem:[%s1839_s1 + $0x228] sm:$0xff] }
  0x17   :  { %203 = vmatprep.mubr.f32.mxu0 %v1025_v3  ;;  %292 = vmatprep.mubr.f32.mxu1 %v1025_v3  ;;  %v82_v30 = vld [vmem:[%s1839_s1 + $0x1d0] sm:$0xff]  ;;  %v991_v35 = vpack.c.bf16 %v94_v28, %v85_v27  ;;  %v32_v36 = vld [vmem:[%s1839_s1 + $0x40] sm:$0xff]  ;;  %v41_v37 = vld [vmem:[%s1839_s1 + $0x88] sm:$0xff]  ;;  %v993_v40 = vpack.c.bf16 %v93_v34, %v84_v33 }
  0x18   :  { %968 = vmatprep.subr.bf16.mxu0 %v967_v6  ;;  %984 = vmatprep.subr.bf16.mxu1 %v983_v9  ;;  %v1291_v38 = vld [vmem:[%s1840_s0 + $0x18] sm:$0xff]  ;;  %v977_v39 = vpack.c.bf16 %v91_v31, %v82_v30  ;;  %v995_v41 = vpack.c.bf16 %v41_v37, %v32_v36  ;;  %v50_v42 = vld [vmem:[%s1839_s1 + $0xd0] sm:$0xff]  ;;  %v68_v45 = vld [vmem:[%s1839_s1 + $0x160] sm:$0xff] }
  0x19   :  { %878 = vmatmul.mubr.msk.f32.gmra.mrb[2].mxu0 %vm120_vm0, %v1221_v12  ;;  %882 = vmatmul.mubr.msk.f32.gmra.mrb[2].mxu1 %vm120_vm0, %v1221_v12  ;;  %v59_v43 = vld [vmem:[%s1839_s1 + $0x118] sm:$0xff]  ;;  %v77_v46 = vld [vmem:[%s1839_s1 + $0x1a8] sm:$0xff]  ;;  %v86_v48 = vld [vmem:[%s1839_s1 + $0x1f0] sm:$0xff] }
  0x1a   :  { %970 = vmatpush1.bf16.msra.mxu0 %v969_v13  ;;  %986 = vmatpush1.bf16.msra.mxu1 %v985_v16  ;;  %v999_v44 = vpack.c.bf16 %v59_v43, %v50_v42  ;;  %v1003_v47 = vpack.c.bf16 %v77_v46, %v68_v45  ;;  %v95_v49 = vld [vmem:[%s1839_s1 + $0x238] sm:$0xff]  ;;  %v96_v51 = vld [vmem:[%s1841_s2] sm:$0xff]  ;;  %v98_v52 = vld [vmem:[%s1841_s2 + $0x10] sm:$0xff] }
  0x1b   :  { %209 = vmatprep.mubr.f32.mxu0 %v1025_v3  ;;  %298 = vmatprep.mubr.f32.mxu1 %v1025_v3  ;;  %v1007_v50 = vpack.c.bf16 %v95_v49, %v86_v48  ;;  %v99_v53 = vld [vmem:[%s1841_s2 + $0x18] sm:$0xff] }
  0x1c   :  { %972 = vmatprep.subr.bf16.mxu0 %v971_v19  ;;  %988 = vmatprep.subr.bf16.mxu1 %v987_v22 }
  0x1d   :  { %879 = vmatmul.mubr.msk.f32.gmra.mrb[4].mxu0 %vm120_vm0, %v1256_v25  ;;  %883 = vmatmul.mubr.msk.f32.gmra.mrb[4].mxu1 %vm120_vm0, %v1256_v25 }
  0x1e   :  { %974 = vmatpush1.bf16.msra.mxu0 %v973_v26  ;;  %990 = vmatpush1.bf16.msra.mxu1 %v989_v29 }
  0x1f   :  { %215 = vmatprep.mubr.f32.mxu0 %v1025_v3  ;;  %304 = vmatprep.mubr.f32.mxu1 %v1025_v3 }
  0x20   :  { %976 = vmatprep.subr.bf16.mxu0 %v975_v32  ;;  %992 = vmatprep.subr.bf16.mxu1 %v991_v35 }
  0x21   :  { %880 = vmatmul.mubr.msk.f32.gmra.mrb[6].mxu0 %vm120_vm0, %v1291_v38  ;;  %884 = vmatmul.mubr.msk.f32.gmra.mrb[6].mxu1 %vm120_vm0, %v1291_v38 }
  0x22   :  { %978 = vmatpush1.bf16.msra.mxu0 %v977_v39  ;;  %994 = vmatpush1.bf16.msra.mxu1 %v993_v40 }
  0x23   :  { %375 = vmatprep.mubr.f32.mxu0 %v1025_v3  ;;  %464 = vmatprep.mubr.f32.mxu1 %v1025_v3 }
  0x24   :  { %996 = vmatprep.subr.bf16.mxu0 %v995_v41  ;;  %1011 = vmatprep.subr.bf16.mxu1 %v995_v41 }
  0x25   :  { %885 = vmatmul.mubr.msk.f32.vlgmr.msra.gmra.mrb[8].mxu0 %vm120_vm0, %v1188_v62  ;;  %889 = vmatmul.mubr.msk.f32.vlgmr.msra.gmra.mrb[8].mxu1 %vm120_vm0, %v1188_v62 }
  0x26   :  { %998 = vmatpush3.bf16.msra.mxu0 %v995_v41  ;;  %1015 = vmatpush3.bf16.msra.mxu1 %v995_v41 }
  0x27   :  { %381 = vmatprep.mubr.f32.mxu0 %v1025_v3  ;;  %470 = vmatprep.mubr.f32.mxu1 %v1025_v3 }
  0x28   :  { %1000 = vmatprep.subr.bf16.mxu0 %v999_v44  ;;  %1012 = vmatprep.subr.bf16.mxu1 %v999_v44 }
  0x29   :  { %886 = vmatmul.mubr.msk.f32.gmra.mrb[10].mxu0 %vm120_vm0, %v1221_v12  ;;  %890 = vmatmul.mubr.msk.f32.gmra.mrb[10].mxu1 %vm120_vm0, %v1221_v12 }
  0x2a   :  { %1002 = vmatpush3.bf16.msra.mxu0 %v999_v44  ;;  %1016 = vmatpush3.bf16.msra.mxu1 %v999_v44 }
  0x2b   :  { %387 = vmatprep.mubr.f32.mxu0 %v1025_v3  ;;  %476 = vmatprep.mubr.f32.mxu1 %v1025_v3 }
  0x2c   :  { %1004 = vmatprep.subr.bf16.mxu0 %v1003_v47  ;;  %1013 = vmatprep.subr.bf16.mxu1 %v1003_v47 }
  0x2d   :  { %887 = vmatmul.mubr.msk.f32.gmra.mrb[12].mxu0 %vm120_vm0, %v1256_v25  ;;  %891 = vmatmul.mubr.msk.f32.gmra.mrb[12].mxu1 %vm120_vm0, %v1256_v25 }
  0x2e   :  { %1006 = vmatpush3.bf16.msra.mxu0 %v1003_v47  ;;  %1017 = vmatpush3.bf16.msra.mxu1 %v1003_v47 }
  0x2f   :  { %393 = vmatprep.mubr.f32.mxu0 %v1025_v3  ;;  %482 = vmatprep.mubr.f32.mxu1 %v1025_v3  ;;  %v97_v3 = vld [vmem:[%s1841_s2 + $0x8] sm:$0xff] }
  0x30   :  { %1008 = vmatprep.subr.bf16.mxu0 %v1007_v50  ;;  %1014 = vmatprep.subr.bf16.mxu1 %v1007_v50 }
  0x31   :  { %888 = vmatmul.mubr.msk.f32.gmra.mrb[14].mxu0 %vm120_vm0, %v1291_v38  ;;  %892 = vmatmul.mubr.msk.f32.gmra.mrb[14].mxu1 %vm120_vm0, %v1291_v38 }
  0x32   :  { %1010 = vmatpush3.bf16.msra.mxu0 %v1007_v50  ;;  %1018 = vmatpush3.bf16.msra.mxu1 %v1007_v50 }
  0x33   :  { %925 = vmatprep.mubr.msk.f32.mxu0 %vm120_vm0, %v1188_v62  ;;  %928 = vmatprep.mubr.msk.f32.mxu1 %vm120_vm0, %v1256_v25 }
  0x34   :  { %102 = vperm.xlu0 %1021, %v96_v51   ;;  %112 = vperm.xlu1 %1022, %v98_v52  }
  0x35   :  { %926 = vmatmul.mubr.msk.f32.vlgmr.msra.gmra.mrb[16].mxu0 %vm120_vm0, %v1221_v12  ;;  %929 = vmatmul.mubr.msk.f32.vlgmr.msra.gmra.mrb[16].mxu1 %vm120_vm0, %v1291_v38 }
  0x38   :  { %107 = vperm.xlu0 %1021, %v97_v3   ;;  %117 = vperm.xlu1 %1022, %v99_v53  }
  0xb3   :  { %v1361_v54 = vpop.permute.xlu0 %102  ;;  %v1363_v59 = vpop.permute.xlu1 %112 }
  0xb7   :  { %v1371_v63 = vpop.permute.xlu0 %107  ;;  %v1394_v15 = vpop.permute.xlu1 %117 }
  0xe8   :  { %v199_v55 = vpop.f32.mrb[0].mxu0  ;;  %v288_v57 = vpop.f32.mrb[0].mxu1 }
  0xe9   :  { %v201_v56 = vpop.f32.mrb[1].mxu0  ;;  %v290_v58 = vpop.f32.mrb[1].mxu1  ;;  %v1366_v60 = vadd.f32 %v199_v55, %v1361_v54  ;;  %v1386_v9 = vadd.f32 %v288_v57, %v1361_v54 }
  0xea   :  { %v1369_v61 = vadd.f32 %v201_v56, %v1361_v54  ;;  %v1401_v19 = vadd.f32 %v290_v58, %v1361_v54 }
  0xeb   :  { %v587_v7 = vmul.f32 %v1366_v60, %v1366_v60  ;;  %v589_v23 = vmul.f32 %v1386_v9, %v1386_v9 }
  0xec   :  { %v205_v62 = vpop.f32.mrb[2].mxu0  ;;  %v294_v1 = vpop.f32.mrb[2].mxu1  ;;  %v574_v6 = vadd.f32 %v1369_v61, %v1366_v60  ;;  %v588_v8 = vmul.f32 %v1369_v61, %v1369_v61  ;;  %v590_v40 = vmul.f32 %v1401_v19, %v1401_v19 }
  0xed   :  { %v207_v0 = vpop.f32.mrb[3].mxu0  ;;  %v296_v2 = vpop.f32.mrb[3].mxu1  ;;  %v1374_v4 = vadd.f32 %v205_v62, %v1371_v63  ;;  %v1404_v20 = vadd.f32 %v294_v1, %v1371_v63 }
  0xee   :  { %v1377_v5 = vadd.f32 %v207_v0, %v1371_v63  ;;  %v596_v21 = vadd.f32 %v588_v8, %v587_v7  ;;  %v575_v22 = vadd.f32 %v574_v6, %v1386_v9  ;;  %v1412_v26 = vadd.f32 %v296_v2, %v1371_v63 }
  0xef   :  { %v620_v17 = vmul.f32 %v1374_v4, %v1374_v4  ;;  %v622_v36 = vmul.f32 %v1404_v20, %v1404_v20 }
  0xf0   :  { %v211_v10 = vpop.f32.mrb[4].mxu0  ;;  %v300_v12 = vpop.f32.mrb[4].mxu1  ;;  %v621_v18 = vmul.f32 %v1377_v5, %v1377_v5  ;;  %v608_v24 = vadd.f32 %v1377_v5, %v1374_v4  ;;  %v597_v38 = vadd.f32 %v596_v21, %v589_v23  ;;  %v576_v39 = vadd.f32 %v575_v22, %v1401_v19 }
  0xf1   :  { %v213_v11 = vpop.f32.mrb[5].mxu0  ;;  %v1389_v13 = vadd.f32 %v211_v10, %v1363_v59  ;;  %v302_v16 = vpop.f32.mrb[5].mxu1  ;;  %v1422_v32 = vadd.f32 %v300_v12, %v1363_v59  ;;  %v623_v50 = vmul.f32 %v1412_v26, %v1412_v26 }
  0xf2   :  { %v1392_v14 = vadd.f32 %v213_v11, %v1363_v59  ;;  %v629_v35 = vadd.f32 %v621_v18, %v620_v17  ;;  %v609_v41 = vadd.f32 %v608_v24, %v1404_v20  ;;  %v1450_v52 = vadd.f32 %v302_v16, %v1363_v59 }
  0xf3   :  { %v653_v30 = vmul.f32 %v1389_v13, %v1389_v13  ;;  %v655_v51 = vmul.f32 %v1422_v32, %v1422_v32  ;;  %v598_v58 = vadd.f32 %v597_v38, %v590_v40 }
  0xf4   :  { %v217_v25 = vpop.f32.mrb[6].mxu0  ;;  %v306_v29 = vpop.f32.mrb[6].mxu1  ;;  %v654_v31 = vmul.f32 %v1392_v14, %v1392_v14  ;;  %v641_v37 = vadd.f32 %v1392_v14, %v1389_v13  ;;  %v630_v53 = vadd.f32 %v629_v35, %v622_v36  ;;  %v610_v2 = vadd.f32 %v609_v41, %v1412_v26 }
  0xf5   :  { %v1415_v27 = vadd.f32 %v217_v25, %v1394_v15  ;;  %v219_v28 = vpop.f32.mrb[7].mxu0  ;;  %v308_v34 = vpop.f32.mrb[7].mxu1  ;;  %v1440_v45 = vadd.f32 %v306_v29, %v1394_v15  ;;  %v656_v16 = vmul.f32 %v1450_v52, %v1450_v52 }
  0xf6   :  { %v1425_v33 = vadd.f32 %v219_v28, %v1394_v15  ;;  %v662_v49 = vadd.f32 %v654_v31, %v653_v30  ;;  %v642_v55 = vadd.f32 %v641_v37, %v1422_v32  ;;  %v1454_v56 = vadd.f32 %v308_v34, %v1394_v15 }
  0xf7   :  { %v686_v43 = vmul.f32 %v1415_v27, %v1415_v27  ;;  %v688_v8 = vmul.f32 %v1440_v45, %v1440_v45  ;;  %v631_v22 = vadd.f32 %v630_v53, %v623_v50 }
  0xf8   :  { %v377_v42 = vpop.f32.mrb[8].mxu0  ;;  %v687_v44 = vmul.f32 %v1425_v33, %v1425_v33  ;;  %v466_v48 = vpop.f32.mrb[8].mxu1  ;;  %v674_v6 = vadd.f32 %v1425_v33, %v1415_v27  ;;  %v663_v12 = vadd.f32 %v662_v49, %v655_v51  ;;  %v643_v23 = vadd.f32 %v642_v55, %v1450_v52 }
  0xf9   :  { %v1443_v46 = vadd.f32 %v377_v42, %v1361_v54  ;;  %v379_v47 = vpop.f32.mrb[9].mxu0  ;;  %v468_v3 = vpop.f32.mrb[9].mxu1  ;;  %v689_v24 = vmul.f32 %v1454_v56, %v1454_v56  ;;  %v1486_v37 = vadd.f32 %v466_v48, %v1361_v54 }
  0xfa   :  { %v1457_v57 = vadd.f32 %v379_v47, %v1361_v54  ;;  %v695_v7 = vadd.f32 %v687_v44, %v686_v43  ;;  %v675_v35 = vadd.f32 %v674_v6, %v1440_v45  ;;  %v664_v41 = vadd.f32 %v663_v12, %v656_v16 }
  0xfb   :  { %v577_v62 = vadd.f32 %v576_v39, %v1443_v46  ;;  %v591_v0 = vmul.f32 %v1443_v46, %v1443_v46  ;;  %v1503_v55 = vadd.f32 %v468_v3, %v1361_v54 }
  0xfc   :  { %v383_v1 = vpop.f32.mrb[10].mxu0  ;;  %v472_v10 = vpop.f32.mrb[10].mxu1  ;;  %v592_v25 = vmul.f32 %v1457_v57, %v1457_v57  ;;  %v696_v36 = vadd.f32 %v695_v7, %v688_v8 }
  0xfd   :  { %v385_v11 = vpop.f32.mrb[11].mxu0  ;;  %v1470_v17 = vadd.f32 %v383_v1, %v1371_v63  ;;  %v474_v21 = vpop.f32.mrb[11].mxu1  ;;  %v599_v28 = vadd.f32 %v598_v58, %v591_v0  ;;  %v578_v29 = vadd.f32 %v577_v62, %v1457_v57  ;;  %v1496_v49 = vadd.f32 %v472_v10, %v1371_v63 }
  0xfe   :  { %v1473_v18 = vadd.f32 %v385_v11, %v1371_v63  ;;  %v1506_v58 = vadd.f32 %v474_v21, %v1371_v63  ;;  %v676_v0 = vadd.f32 %v675_v35, %v1454_v56  ;;  %v697_v1 = vadd.f32 %v696_v36, %v689_v24 }
  0xff   :  { %v611_v30 = vadd.f32 %v610_v2, %v1470_v17  ;;  %v624_v31 = vmul.f32 %v1470_v17, %v1470_v17  ;;  %v600_v51 = vadd.f32 %v599_v28, %v592_v25  ;;  %v579_v53 = vadd.f32 %v578_v29, %v1486_v37 }
 0x100   :  { %v389_v34 = vpop.f32.mrb[12].mxu0  ;;  %v478_v40 = vpop.f32.mrb[12].mxu1  ;;  %v625_v48 = vmul.f32 %v1473_v18, %v1473_v18  ;;  %v593_v2 = vmul.f32 %v1486_v37, %v1486_v37  ;;  %v626_v21 = vmul.f32 %v1496_v49, %v1496_v49  ;;  %v627_v25 = vmul.f32 %v1506_v58, %v1506_v58 }
 0x101   :  { %v1489_v38 = vadd.f32 %v389_v34, %v1363_v59  ;;  %v391_v39 = vpop.f32.mrb[13].mxu0  ;;  %v612_v42 = vadd.f32 %v611_v30, %v1473_v18  ;;  %v480_v44 = vpop.f32.mrb[13].mxu1  ;;  %v632_v47 = vadd.f32 %v631_v22, %v624_v31  ;;  %v1516_v3 = vadd.f32 %v478_v40, %v1363_v59 }
 0x102   :  { %v1493_v43 = vadd.f32 %v391_v39, %v1363_v59  ;;  %v1530_v28 = vadd.f32 %v480_v44, %v1363_v59  ;;  %v580_v30 = vadd.f32 %v579_v53, %v1503_v55  ;;  %v601_v31 = vadd.f32 %v600_v51, %v593_v2 }
 0x103   :  { %v644_v50 = vadd.f32 %v643_v23, %v1489_v38  ;;  %v613_v16 = vadd.f32 %v612_v42, %v1496_v49  ;;  %v633_v22 = vadd.f32 %v632_v47, %v625_v48  ;;  %v657_v23 = vmul.f32 %v1489_v38, %v1489_v38 }
 0x104   :  { %v395_v62 = vpop.f32.mrb[14].mxu0  ;;  %v484_v8 = vpop.f32.mrb[14].mxu1  ;;  %v658_v34 = vmul.f32 %v1493_v43, %v1493_v43 }
 0x105   :  { %v1512_v6 = vadd.f32 %v395_v62, %v1394_v15  ;;  %v397_v7 = vpop.f32.mrb[15].mxu0  ;;  %v645_v10 = vadd.f32 %v644_v50, %v1493_v43  ;;  %v486_v12 = vpop.f32.mrb[15].mxu1  ;;  %v1543_v47 = vadd.f32 %v484_v8, %v1394_v15  ;;  %v614_v51 = vadd.f32 %v613_v16, %v1506_v58 }
 0x106   :  { %v1519_v11 = vadd.f32 %v397_v7, %v1394_v15  ;;  %v665_v53 = vadd.f32 %v664_v41, %v657_v23  ;;  %v1564_v23 = vadd.f32 %v486_v12, %v1394_v15  ;;  %v594_v12 = vmul.f32 %v1503_v55, %v1503_v55 }
 0x107   :  { %v677_v24 = vadd.f32 %v676_v0, %v1512_v6  ;;  %v690_v35 = vmul.f32 %v1512_v6, %v1512_v6  ;;  %v646_v44 = vadd.f32 %v645_v10, %v1516_v3  ;;  %v634_v0 = vadd.f32 %v633_v22, %v626_v21 }
 0x108   :  { %v927_v29 = vpop.f32.mrb[16].mxu0  ;;  %v930_v40 = vpop.f32.mrb[16].mxu1  ;;  %v691_v41 = vmul.f32 %v1519_v11, %v1519_v11 }
 0x109   :  { %v678_v36 = vadd.f32 %v677_v24, %v1519_v11  ;;  %v1539_v39 = vadd.f32 %v927_v29, %v1371_v63  ;;  %v555_v42 = vpop.f32.mrb[17].mxu0  ;;  %v565_v50 = vpop.f32.mrb[17].mxu1  ;;  %v698_v10 = vadd.f32 %v697_v1, %v690_v35  ;;  %v647_v21 = vadd.f32 %v646_v44, %v1530_v28 }
 0x10a   :  { %v1546_v48 = vadd.f32 %v555_v42, %v1361_v54  ;;  %v1550_v62 = vadd.f32 %v565_v50, %v1363_v59  ;;  %v666_v29 = vadd.f32 %v665_v53, %v658_v34  ;;  %v659_v1 = vmul.f32 %v1516_v3, %v1516_v3 }
 0x10b   :  { %v615_v63 = vsel %vm581_vm1, %v1539_v39, 0.0  ;;  %v679_v2 = vadd.f32 %v678_v36, %v1543_v47  ;;  %v628_v54 = vmul.f32 %v1539_v39, %v1539_v39  ;;  %v635_v35 = vadd.f32 %v634_v0, %v627_v25 }
 0x10c   :  { %v616_v7 = vadd.f32 %v615_v63, %v614_v51  ;;  %v582_v8 = vsel %vm581_vm1, %v1546_v48, 0.0  ;;  %v648_v59 = vsel %vm581_vm1, %v1550_v62, 0.0  ;;  %v595_v24 = vmul.f32 %v1546_v48, %v1546_v48 }
 0x10d   :  { %v583_v16 = vadd.f32 %v582_v8, %v580_v30  ;;  %v636_v22 = vsel %vm581_vm1, %v628_v54, 0.0  ;;  %v1573_v30 = vadd.f32 %v930_v40, %v1394_v15  ;;  %v649_v36 = vadd.f32 %v648_v59, %v647_v21 }
 0x10e   :  { %617 = vadd.xlane.f32.xlu1 %v616_v7  ;;  %v680_v42 = vadd.f32 %v679_v2, %v1564_v23  ;;  %v699_v44 = vadd.f32 %v698_v10, %v691_v41  ;;  %v637_v50 = vadd.f32 %v636_v22, %v635_v35  ;;  %v602_v51 = vadd.f32 %v601_v31, %v594_v12 }
 0x10f   :  { %584 = vadd.xlane.f32.xlu0 %v583_v16  ;;  %v603_v34 = vsel %vm581_vm1, %v595_v24, 0.0  ;;  %v661_v53 = vmul.f32 %v1550_v62, %v1550_v62  ;;  %v660_v15 = vmul.f32 %v1530_v28, %v1530_v28  ;;  %v692_v25 = vmul.f32 %v1543_v47, %v1543_v47 }
 0x110   :  { %v681_v40 = vsel %vm581_vm1, %v1573_v30, 0.0  ;;  %v667_v63 = vadd.f32 %v666_v29, %v659_v1  ;;  %v604_v2 = vadd.f32 %v603_v34, %v602_v51  ;;  %v693_v8 = vmul.f32 %v1564_v23, %v1564_v23 }
 0x111   :  { %v682_v0 = vadd.f32 %v681_v40, %v680_v42  ;;  %v700_v7 = vadd.f32 %v699_v44, %v692_v25  ;;  %v669_v31 = vsel %vm581_vm1, %v661_v53, 0.0  ;;  %v694_v10 = vmul.f32 %v1573_v30, %v1573_v30 }
 0x112   :  { %650 = vadd.xlane.f32.xlu1 %v649_v36  ;;  %v668_v54 = vadd.f32 %v667_v63, %v660_v15 }
 0x113   :  { %638 = vadd.xlane.f32.xlu0 %v637_v50  ;;  %v701_v16 = vadd.f32 %v700_v7, %v693_v8  ;;  %v702_v59 = vsel %vm581_vm1, %v694_v10, 0.0  ;;  %v716_v10 = vld [vmem:[%s1843_s4] sm:$0xff] }
 0x114   :  { %v670_v41 = vadd.f32 %v669_v31, %v668_v54  ;;  %v712_v31 = vld [vmem:[%s1842_s3] sm:$0xff] }
 0x115   :  { %v703_v21 = vadd.f32 %v702_v59, %v701_v16 }
 0x116   :  { %683 = vadd.xlane.f32.xlu1 %v682_v0 }
 0x117   :  { %605 = vadd.xlane.f32.xlu0 %v604_v2 }
 0x11b   :  { %671 = vadd.xlane.f32.xlu0 %v670_v41 }
 0x11f   :  { %704 = vadd.xlane.f32.xlu0 %v703_v21 }
 0x19b   :  { %v618_v22 = vpop.xlane.xlu1 %617 }
 0x19c   :  { %v585_v24 = vpop.xlane.xlu0 %584 }
 0x19d   :  { %v619_v35 = vadd.f32 %v618_v22, %v585_v24 }
 0x19f   :  { %v651_v29 = vpop.xlane.xlu1 %650 }
 0x1a0   :  { %v639_v1 = vpop.xlane.xlu0 %638  ;;  %v652_v42 = vadd.f32 %v651_v29, %v619_v35 }
 0x1a3   :  { %v684_v12 = vpop.xlane.xlu1 %683 }
 0x1a4   :  { %v606_v36 = vpop.xlane.xlu0 %605  ;;  %v685_v44 = vadd.f32 %v684_v12, %v652_v42 }
 0x1a5   :  { %v640_v51 = vadd.f32 %v639_v1, %v606_v36 }
 0x1a6   :  { %v707_v34 = vmul.f32 0.0002362949, %v685_v44 }
 0x1a8   :  { %v672_v50 = vpop.xlane.xlu0 %671  ;;  %v709_v40 = vmul.f32 %v707_v34, %v707_v34 }
 0x1a9   :  { %v673_v53 = vadd.f32 %v672_v50, %v640_v51 }
 0x1ac   :  { %v705_v15 = vpop.xlane.xlu0 %704 }
 0x1ad   :  { %v706_v25 = vadd.f32 %v705_v15, %v673_v53 }
 0x1af   :  { %v708_v63 = vmul.f32 0.0002362949, %v706_v25 }
 0x1b1   :  { %v710_v0 = vsub.f32 %v708_v63, %v709_v40 }
 0x1b3   :  { %v711_v2 = vmax.f32 %v710_v0, 0.0 }
 0x1b5   :  { %v713_v7 = vadd.f32 1e-05, %v711_v2 }
 0x1b7   :  { %1023 = vrsqrt.f32 %v713_v7 }
 0x1c1   :  { %v1024_v8 = vpop.eup %1023 }
 0x1c2   :  { %v715_v54 = vmul.f32 %v1024_v8, %v712_v31 }
 0x1c4   :  { %721 = vperm.xlu1 %1022, %v715_v54   ;;  %v717_v41 = vmul.f32 %v715_v54, %v707_v34 }
 0x1c6   :  { %v718_v16 = vsub.f32 %v716_v10, %v717_v41 }
 0x1c8   :  { %735 = vperm.xlu0 %1021, %v718_v16  }
 0x243   :  { %v722_v59 = vpop.permute.xlu1 %721 }
 0x244   :  { %v724_v21 = vmul.f32 %v722_v59, %v1366_v60  ;;  %v725_v22 = vmul.f32 %v722_v59, %v1369_v61  ;;  %v726_v24 = vmul.f32 %v722_v59, %v1386_v9  ;;  %v727_v29 = vmul.f32 %v722_v59, %v1401_v19 }
 0x245   :  { %v728_v1 = vmul.f32 %v722_v59, %v1443_v46  ;;  %v729_v35 = vmul.f32 %v722_v59, %v1457_v57  ;;  %v730_v12 = vmul.f32 %v722_v59, %v1486_v37  ;;  %v731_v36 = vmul.f32 %v722_v59, %v1503_v55 }
 0x246   :  { %v732_v42 = vmul.f32 %v722_v59, %v1546_v48  ;;  %v765_v44 = vmul.f32 %v722_v59, %v1374_v4  ;;  %v766_v60 = vmul.f32 %v722_v59, %v1377_v5  ;;  %v767_v61 = vmul.f32 %v722_v59, %v1404_v20 }
 0x247   :  { %v768_v9 = vmul.f32 %v722_v59, %v1412_v26  ;;  %v769_v19 = vmul.f32 %v722_v59, %v1470_v17  ;;  %v770_v46 = vmul.f32 %v722_v59, %v1473_v18  ;;  %v771_v57 = vmul.f32 %v722_v59, %v1496_v49 }
 0x248   :  { %v772_v37 = vmul.f32 %v722_v59, %v1506_v58  ;;  %v773_v55 = vmul.f32 %v722_v59, %v1539_v39  ;;  %v1618_v48 = vmul.f32 %v722_v59, %v1389_v13  ;;  %v1621_v4 = vmul.f32 %v722_v59, %v1392_v14 }
 0x249   :  { %v1624_v5 = vmul.f32 %v722_v59, %v1422_v32  ;;  %v1627_v20 = vmul.f32 %v722_v59, %v1450_v52  ;;  %v1630_v26 = vmul.f32 %v722_v59, %v1489_v38  ;;  %v1633_v17 = vmul.f32 %v722_v59, %v1493_v43  ;;  %v1647_v52 = vpop.permute.xlu0 %735 }
 0x24a   :  { %v1636_v18 = vmul.f32 %v722_v59, %v1516_v3  ;;  %v1639_v13 = vmul.f32 %v722_v59, %v1530_v28  ;;  %v1642_v14 = vmul.f32 %v722_v59, %v1550_v62  ;;  %v1645_v32 = vmul.f32 %v722_v59, %v1415_v27 }
 0x24b   :  { %v1650_v38 = vmul.f32 %v722_v59, %v1425_v33  ;;  %v1653_v43 = vmul.f32 %v722_v59, %v1440_v45  ;;  %v1656_v49 = vmul.f32 %v722_v59, %v1454_v56  ;;  %v1659_v58 = vmul.f32 %v722_v59, %v1512_v6 }
 0x24c   :  { %v1662_v3 = vmul.f32 %v722_v59, %v1519_v11  ;;  %v1665_v27 = vmul.f32 %v722_v59, %v1543_v47  ;;  %v1668_v28 = vmul.f32 %v722_v59, %v1564_v23  ;;  %v1671_v33 = vmul.f32 %v722_v59, %v1573_v30 }
 0x24d   :  { %v738_v45 = vadd.f32 %v1647_v52, %v724_v21  ;;  %v739_v56 = vadd.f32 %v1647_v52, %v725_v22  ;;  %v740_v39 = vadd.f32 %v1647_v52, %v726_v24  ;;  %v741_v6 = vadd.f32 %v1647_v52, %v727_v29 }
 0x24e   :  { %v742_v11 = vadd.f32 %v1647_v52, %v728_v1  ;;  %v743_v62 = vadd.f32 %v1647_v52, %v729_v35  ;;  %v744_v47 = vadd.f32 %v1647_v52, %v730_v12  ;;  %v745_v23 = vadd.f32 %v1647_v52, %v731_v36 }
 0x24f   :  { %v746_v50 = vadd.f32 %v1647_v52, %v732_v42  ;;  %v747_v30 = vmax.f32 %v738_v45, 0.0  ;;  %v748_v51 = vmax.f32 %v739_v56, 0.0  ;;  %v749_v34 = vmax.f32 %v740_v39, 0.0 }
 0x250   :  { %v750_v53 = vmax.f32 %v741_v6, 0.0  ;;  %v751_v15 = vmax.f32 %v742_v11, 0.0  ;;  %v752_v25 = vmax.f32 %v743_v62, 0.0  ;;  %v753_v40 = vmax.f32 %v744_v47, 0.0 }
 0x251   :  { %v754_v63 = vmax.f32 %v745_v23, 0.0  ;;  %v755_v0 = vmax.f32 %v746_v50, 0.0  ;;  %756 = vst [vmem:[%s1844_s5] sm:$0xff] %v747_v30  ;;  %757 = vst [vmem:[%s1844_s5 + $0x8] sm:$0xff] %v748_v51  ;;  %v774_v2 = vadd.f32 %v765_v44, %v1647_v52  ;;  %v775_v7 = vadd.f32 %v766_v60, %v1647_v52 }
 0x252   :  { %758 = vst [vmem:[%s1844_s5 + $0x10] sm:$0xff] %v749_v34  ;;  %759 = vst [vmem:[%s1844_s5 + $0x18] sm:$0xff] %v750_v53  ;;  %v776_v31 = vadd.f32 %v767_v61, %v1647_v52  ;;  %v777_v8 = vadd.f32 %v768_v9, %v1647_v52  ;;  %v778_v54 = vadd.f32 %v769_v19, %v1647_v52 }
 0x253   :  { %760 = vst [vmem:[%s1844_s5 + $0x20] sm:$0xff] %v751_v15  ;;  %761 = vst [vmem:[%s1844_s5 + $0x28] sm:$0xff] %v752_v25  ;;  %v779_v10 = vadd.f32 %v770_v46, %v1647_v52  ;;  %v780_v41 = vadd.f32 %v771_v57, %v1647_v52  ;;  %v781_v16 = vadd.f32 %v772_v37, %v1647_v52  ;;  %v783_v21 = vmax.f32 %v774_v2, 0.0 }
 0x254   :  { %762 = vst [vmem:[%s1844_s5 + $0x30] sm:$0xff] %v753_v40  ;;  %763 = vst [vmem:[%s1844_s5 + $0x38] sm:$0xff] %v754_v63  ;;  %v782_v59 = vadd.f32 %v773_v55, %v1647_v52  ;;  %v784_v22 = vmax.f32 %v775_v7, 0.0  ;;  %v785_v24 = vmax.f32 %v776_v31, 0.0  ;;  %v786_v29 = vmax.f32 %v777_v8, 0.0 }
 0x255   :  { %764 = vst.msk [vmem:[%s1844_s5 + $0x40] sm:$0xff] %vm581_vm1, %v755_v0  ;;  %v787_v1 = vmax.f32 %v778_v54, 0.0  ;;  %v788_v35 = vmax.f32 %v779_v10, 0.0  ;;  %v789_v12 = vmax.f32 %v780_v41, 0.0  ;;  %v790_v36 = vmax.f32 %v781_v16, 0.0  ;;  %792 = vst [vmem:[%s1844_s5 + $0x48] sm:$0xff] %v783_v21 }
 0x256   :  { %v791_v42 = vmax.f32 %v782_v59, 0.0  ;;  %793 = vst [vmem:[%s1844_s5 + $0x50] sm:$0xff] %v784_v22  ;;  %794 = vst [vmem:[%s1844_s5 + $0x58] sm:$0xff] %v785_v24  ;;  %v810_v44 = vadd.f32 %v1618_v48, %v1647_v52  ;;  %v811_v60 = vadd.f32 %v1621_v4, %v1647_v52  ;;  %v812_v61 = vadd.f32 %v1624_v5, %v1647_v52 }
 0x257   :  { %795 = vst [vmem:[%s1844_s5 + $0x60] sm:$0xff] %v786_v29  ;;  %796 = vst [vmem:[%s1844_s5 + $0x68] sm:$0xff] %v787_v1  ;;  %v813_v9 = vadd.f32 %v1627_v20, %v1647_v52  ;;  %v814_v19 = vadd.f32 %v1630_v26, %v1647_v52  ;;  %v815_v46 = vadd.f32 %v1633_v17, %v1647_v52 }
 0x258   :  { %797 = vst [vmem:[%s1844_s5 + $0x70] sm:$0xff] %v788_v35  ;;  %798 = vst [vmem:[%s1844_s5 + $0x78] sm:$0xff] %v789_v12  ;;  %v816_v57 = vadd.f32 %v1636_v18, %v1647_v52  ;;  %v817_v37 = vadd.f32 %v1639_v13, %v1647_v52  ;;  %v818_v55 = vadd.f32 %v1642_v14, %v1647_v52  ;;  %v819_v48 = vmax.f32 %v810_v44, 0.0 }
 0x259   :  { %799 = vst [vmem:[%s1844_s5 + $0x80] sm:$0xff] %v790_v36  ;;  %800 = vst.msk [vmem:[%s1844_s5 + $0x88] sm:$0xff] %vm581_vm1, %v791_v42  ;;  %v820_v4 = vmax.f32 %v811_v60, 0.0  ;;  %v821_v5 = vmax.f32 %v812_v61, 0.0  ;;  %v822_v20 = vmax.f32 %v813_v9, 0.0  ;;  %v823_v45 = vmax.f32 %v814_v19, 0.0 }
 0x25a   :  { %v824_v56 = vmax.f32 %v815_v46, 0.0  ;;  %v825_v39 = vmax.f32 %v816_v57, 0.0  ;;  %v826_v26 = vmax.f32 %v817_v37, 0.0  ;;  %v827_v6 = vmax.f32 %v818_v55, 0.0  ;;  %828 = vst [vmem:[%s1844_s5 + $0x90] sm:$0xff] %v819_v48 }
 0x25b   :  { %829 = vst [vmem:[%s1844_s5 + $0x98] sm:$0xff] %v820_v4  ;;  %830 = vst [vmem:[%s1844_s5 + $0xa0] sm:$0xff] %v821_v5  ;;  %v846_v17 = vadd.f32 %v1645_v32, %v1647_v52  ;;  %v847_v18 = vadd.f32 %v1650_v38, %v1647_v52  ;;  %v848_v13 = vadd.f32 %v1653_v43, %v1647_v52 }
 0x25c   :  { %831 = vst [vmem:[%s1844_s5 + $0xa8] sm:$0xff] %v822_v20  ;;  %832 = vst [vmem:[%s1844_s5 + $0xb0] sm:$0xff] %v823_v45  ;;  %v849_v14 = vadd.f32 %v1656_v49, %v1647_v52  ;;  %v850_v32 = vadd.f32 %v1659_v58, %v1647_v52  ;;  %v851_v38 = vadd.f32 %v1662_v3, %v1647_v52 }
 0x25d   :  { %833 = vst [vmem:[%s1844_s5 + $0xb8] sm:$0xff] %v824_v56  ;;  %834 = vst [vmem:[%s1844_s5 + $0xc0] sm:$0xff] %v825_v39  ;;  %v852_v43 = vadd.f32 %v1665_v27, %v1647_v52  ;;  %v853_v49 = vadd.f32 %v1668_v28, %v1647_v52  ;;  %v854_v58 = vadd.f32 %v1671_v33, %v1647_v52  ;;  %v855_v11 = vmax.f32 %v846_v17, 0.0 }
 0x25e   :  { %835 = vst [vmem:[%s1844_s5 + $0xc8] sm:$0xff] %v826_v26  ;;  %836 = vst.msk [vmem:[%s1844_s5 + $0xd0] sm:$0xff] %vm581_vm1, %v827_v6  ;;  %v856_v3 = vmax.f32 %v847_v18, 0.0  ;;  %v857_v62 = vmax.f32 %v848_v13, 0.0  ;;  %v858_v47 = vmax.f32 %v849_v14, 0.0  ;;  %v859_v23 = vmax.f32 %v850_v32, 0.0 }
 0x25f   :  { %v860_v50 = vmax.f32 %v851_v38, 0.0  ;;  %v861_v30 = vmax.f32 %v852_v43, 0.0  ;;  %v862_v51 = vmax.f32 %v853_v49, 0.0  ;;  %v863_v34 = vmax.f32 %v854_v58, 0.0  ;;  %864 = vst [vmem:[%s1844_s5 + $0xd8] sm:$0xff] %v855_v11 }
 0x260   :  { %865 = vst [vmem:[%s1844_s5 + $0xe0] sm:$0xff] %v856_v3  ;;  %866 = vst [vmem:[%s1844_s5 + $0xe8] sm:$0xff] %v857_v62 }
 0x261   :  { %867 = vst [vmem:[%s1844_s5 + $0xf0] sm:$0xff] %v858_v47  ;;  %868 = vst [vmem:[%s1844_s5 + $0xf8] sm:$0xff] %v859_v23 }
 0x262   :  { %869 = vst [vmem:[%s1844_s5 + $0x100] sm:$0xff] %v860_v50  ;;  %870 = vst [vmem:[%s1844_s5 + $0x108] sm:$0xff] %v861_v30 }
 0x263   :  { %871 = vst [vmem:[%s1844_s5 + $0x110] sm:$0xff] %v862_v51  ;;  %872 = vst.msk [vmem:[%s1844_s5 + $0x118] sm:$0xff] %vm581_vm1, %v863_v34 }

// kernel: vowel_generator_forward.9
= control target key start
LH: loop header
LB: loop body
LE: loop exit
PB: predicated region body
PF: predicated region fallthrough
CT: control target
= control target key end

     0   :  { %v1819_v3 = vmov 0.0   ;;  %v1820_v8 = vmov 0   ;;  %vm161_vm0 = vcmask 261120   ;;  %vm1822_vm1 = vmmov 0   ;;  %s2416_s1 = inlined_call_operand.vmem [shape: f32[32,4418], index: 1, kind: input, shape index: {}]   ;;  %s2417_s0 = inlined_call_operand.vmem [shape: f32[4,32], index: 0, kind: input, shape index: {}]   ;;  %s2418_s2 = inlined_call_operand.vmem [shape: f32[4,1], index: 2, kind: input, shape index: {}]   ;;  %s2419_s3 = inlined_call_operand.vmem [shape: f32[4,4418], index: 3, kind: output, shape index: {}]  }
   0x1   :  { %v16_v0 = vld [vmem:[%s2416_s1 + $0x8] sm:$0xff]  ;;  %v51_v1 = vld [vmem:[%s2416_s1 + $0x120] sm:$0xff]  ;;  %229 = vmatprep.mubr.f32.mxu0 %v1819_v3  ;;  %300 = vmatprep.mubr.f32.mxu1 %v1819_v3  ;;  %v50_v5 = vld [vmem:[%s2416_s1 + $0x118] sm:$0xff]  ;;  %vm1562_vm2 = vcmask 535552  }
   0x2   :  { %v15_v2 = vld [vmem:[%s2416_s1] sm:$0xff]  ;;  %v1602_v4 = vpack.c.bf16 %v51_v1, %v16_v0  ;;  %v18_v6 = vld [vmem:[%s2416_s1 + $0x18] sm:$0xff]  ;;  %v53_v7 = vld [vmem:[%s2416_s1 + $0x130] sm:$0xff]  ;;  %1748 = vset.pattern.permute.xlu0 %v1820_v8 }
   0x3   :  { %v1604_v9 = vpack.c.bf16 %v50_v5, %v15_v2  ;;  %v1610_v10 = vpack.c.bf16 %v53_v7, %v18_v6  ;;  %v17_v11 = vld [vmem:[%s2416_s1 + $0x10] sm:$0xff]  ;;  %v52_v12 = vld [vmem:[%s2416_s1 + $0x128] sm:$0xff]  ;;  %v86_v13 = vld [vmem:[%s2416_s1 + $0x238] sm:$0xff] }
   0x4   :  { %1603 = vmatprep.subr.bf16.mxu0 %v1602_v4  ;;  %v1612_v14 = vpack.c.bf16 %v52_v12, %v17_v11  ;;  %v121_v15 = vld [vmem:[%s2416_s1 + $0x350] sm:$0xff]  ;;  %v120_v17 = vld [vmem:[%s2416_s1 + $0x348] sm:$0xff]  ;;  %v123_v21 = vld [vmem:[%s2416_s1 + $0x360] sm:$0xff] }
   0x5   :  { %v85_v16 = vld [vmem:[%s2416_s1 + $0x230] sm:$0xff]  ;;  %1605 = vmatpush1.bf16.msra.mxu0 %v1604_v9  ;;  %1611 = vmatprep.subr.bf16.mxu1 %v1610_v10  ;;  %v1606_v18 = vpack.c.bf16 %v121_v15, %v86_v13  ;;  %v88_v20 = vld [vmem:[%s2416_s1 + $0x248] sm:$0xff]  ;;  %v87_v22 = vld [vmem:[%s2416_s1 + $0x240] sm:$0xff] }
   0x6   :  { %v1608_v19 = vpack.c.bf16 %v120_v17, %v85_v16  ;;  %1613 = vmatpush1.bf16.msra.mxu1 %v1612_v14  ;;  %v1614_v23 = vpack.c.bf16 %v123_v21, %v88_v20  ;;  %v122_v24 = vld [vmem:[%s2416_s1 + $0x358] sm:$0xff]  ;;  %v20_v25 = vld [vmem:[%s2416_s1 + $0x28] sm:$0xff]  ;;  %v1899_v27 = vld [vmem:[%s2417_s0] sm:$0xf] }
   0x7   :  { %1607 = vmatprep.subr.bf16.mxu0 %v1606_v18  ;;  %v1616_v26 = vpack.c.bf16 %v122_v24, %v87_v22  ;;  %v55_v28 = vld [vmem:[%s2416_s1 + $0x140] sm:$0xff]  ;;  %v54_v30 = vld [vmem:[%s2416_s1 + $0x138] sm:$0xff]  ;;  %v57_v33 = vld [vmem:[%s2416_s1 + $0x150] sm:$0xff] }
   0x8   :  { %v19_v29 = vld [vmem:[%s2416_s1 + $0x20] sm:$0xff]  ;;  %1615 = vmatprep.subr.bf16.mxu1 %v1614_v23  ;;  %v1618_v31 = vpack.c.bf16 %v55_v28, %v20_v25  ;;  %v22_v32 = vld [vmem:[%s2416_s1 + $0x38] sm:$0xff]  ;;  %v21_v34 = vld [vmem:[%s2416_s1 + $0x30] sm:$0xff] }
   0x9   :  { %1609 = vmatpush1.bf16.msra.mxu0 %v1608_v19  ;;  %v1620_v35 = vpack.c.bf16 %v54_v30, %v19_v29  ;;  %v1626_v36 = vpack.c.bf16 %v57_v33, %v22_v32  ;;  %v56_v37 = vld [vmem:[%s2416_s1 + $0x148] sm:$0xff]  ;;  %v90_v38 = vld [vmem:[%s2416_s1 + $0x258] sm:$0xff]  ;;  %v125_v39 = vld [vmem:[%s2416_s1 + $0x370] sm:$0xff] }
   0xa   :  { %1617 = vmatpush1.bf16.msra.mxu1 %v1616_v26  ;;  %1619 = vmatprep.subr.bf16.mxu0 %v1618_v31  ;;  %v1628_v40 = vpack.c.bf16 %v56_v37, %v21_v34  ;;  %v1622_v41 = vpack.c.bf16 %v125_v39, %v90_v38  ;;  %v89_v42 = vld [vmem:[%s2416_s1 + $0x250] sm:$0xff]  ;;  %v124_v43 = vld [vmem:[%s2416_s1 + $0x368] sm:$0xff]  ;;  %v127_v45 = vld [vmem:[%s2416_s1 + $0x380] sm:$0xff] }
   0xb   :  { %v92_v44 = vld [vmem:[%s2416_s1 + $0x268] sm:$0xff]  ;;  %1627 = vmatprep.subr.bf16.mxu1 %v1626_v36  ;;  %v91_v46 = vld [vmem:[%s2416_s1 + $0x260] sm:$0xff]  ;;  %v126_v47 = vld [vmem:[%s2416_s1 + $0x378] sm:$0xff]  ;;  %v1624_v51 = vpack.c.bf16 %v124_v43, %v89_v42 }
   0xc   :  { %1568 = vmatmul.mubr.msk.f32.vlgmr.msra.gmra.mrb[0].mxu0 %vm161_vm0, %v1899_v27  ;;  %v1630_v48 = vpack.c.bf16 %v127_v45, %v92_v44  ;;  %v24_v49 = vld [vmem:[%s2416_s1 + $0x48] sm:$0xff]  ;;  %v59_v50 = vld [vmem:[%s2416_s1 + $0x160] sm:$0xff]  ;;  %v26_v52 = vld [vmem:[%s2416_s1 + $0x58] sm:$0xff]  ;;  %v1632_v54 = vpack.c.bf16 %v126_v47, %v91_v46 }
   0xd   :  { %1621 = vmatpush1.bf16.msra.mxu0 %v1620_v35  ;;  %1569 = vmatmul.mubr.msk.f32.vlgmr.msra.gmra.mrb[0].mxu1 %vm161_vm0, %v1899_v27  ;;  %v61_v53 = vld [vmem:[%s2416_s1 + $0x170] sm:$0xff]  ;;  %v1634_v55 = vpack.c.bf16 %v59_v50, %v24_v49  ;;  %v23_v56 = vld [vmem:[%s2416_s1 + $0x40] sm:$0xff]  ;;  %v58_v57 = vld [vmem:[%s2416_s1 + $0x158] sm:$0xff] }
   0xe   :  { %1629 = vmatpush1.bf16.msra.mxu1 %v1628_v40  ;;  %1623 = vmatprep.subr.bf16.mxu0 %v1622_v41  ;;  %v25_v58 = vld [vmem:[%s2416_s1 + $0x50] sm:$0xff]  ;;  %v1642_v59 = vpack.c.bf16 %v61_v53, %v26_v52  ;;  %v60_v60 = vld [vmem:[%s2416_s1 + $0x168] sm:$0xff]  ;;  %v94_v61 = vld [vmem:[%s2416_s1 + $0x278] sm:$0xff]  ;;  %v1636_v1 = vpack.c.bf16 %v58_v57, %v23_v56 }
   0xf   :  { %1631 = vmatprep.subr.bf16.mxu1 %v1630_v48  ;;  %371 = vmatprep.mubr.f32.mxu0 %v1819_v3  ;;  %v129_v62 = vld [vmem:[%s2416_s1 + $0x390] sm:$0xff]  ;;  %v96_v63 = vld [vmem:[%s2416_s1 + $0x288] sm:$0xff]  ;;  %v131_v0 = vld [vmem:[%s2416_s1 + $0x3a0] sm:$0xff]  ;;  %v1644_v2 = vpack.c.bf16 %v60_v60, %v25_v58 }
  0x10   :  { %442 = vmatprep.mubr.f32.mxu1 %v1819_v3  ;;  %v1638_v4 = vpack.c.bf16 %v129_v62, %v94_v61  ;;  %v93_v5 = vld [vmem:[%s2416_s1 + $0x270] sm:$0xff]  ;;  %v128_v6 = vld [vmem:[%s2416_s1 + $0x388] sm:$0xff]  ;;  %v95_v7 = vld [vmem:[%s2416_s1 + $0x280] sm:$0xff]  ;;  %v1646_v8 = vpack.c.bf16 %v131_v0, %v96_v63 }
  0x11   :  { %1625 = vmatpush1.bf16.msra.mxu0 %v1624_v51  ;;  %v130_v9 = vld [vmem:[%s2416_s1 + $0x398] sm:$0xff]  ;;  %v28_v10 = vld [vmem:[%s2416_s1 + $0x68] sm:$0xff]  ;;  %v63_v11 = vld [vmem:[%s2416_s1 + $0x180] sm:$0xff]  ;;  %v1640_v14 = vpack.c.bf16 %v128_v6, %v93_v5 }
  0x12   :  { %1633 = vmatpush1.bf16.msra.mxu1 %v1632_v54  ;;  %1635 = vmatprep.subr.bf16.mxu0 %v1634_v55  ;;  %v30_v12 = vld [vmem:[%s2416_s1 + $0x78] sm:$0xff]  ;;  %v65_v13 = vld [vmem:[%s2416_s1 + $0x190] sm:$0xff]  ;;  %v1648_v15 = vpack.c.bf16 %v130_v9, %v95_v7  ;;  %v1650_v16 = vpack.c.bf16 %v63_v11, %v28_v10  ;;  %v27_v17 = vld [vmem:[%s2416_s1 + $0x60] sm:$0xff] }
  0x13   :  { %1643 = vmatprep.subr.bf16.mxu1 %v1642_v59  ;;  %v62_v18 = vld [vmem:[%s2416_s1 + $0x178] sm:$0xff]  ;;  %v29_v19 = vld [vmem:[%s2416_s1 + $0x70] sm:$0xff]  ;;  %v1658_v20 = vpack.c.bf16 %v65_v13, %v30_v12  ;;  %v64_v21 = vld [vmem:[%s2416_s1 + $0x188] sm:$0xff] }
  0x14   :  { %1570 = vmatmul.mubr.msk.f32.vlgmr.msra.gmra.mrb[2].mxu0 %vm161_vm0, %v1899_v27  ;;  %v98_v22 = vld [vmem:[%s2416_s1 + $0x298] sm:$0xff]  ;;  %v133_v23 = vld [vmem:[%s2416_s1 + $0x3b0] sm:$0xff]  ;;  %v100_v24 = vld [vmem:[%s2416_s1 + $0x2a8] sm:$0xff]  ;;  %v1652_v26 = vpack.c.bf16 %v62_v18, %v27_v17  ;;  %v1660_v28 = vpack.c.bf16 %v64_v21, %v29_v19 }
  0x15   :  { %1637 = vmatpush1.bf16.msra.mxu0 %v1636_v1  ;;  %1571 = vmatmul.mubr.msk.f32.vlgmr.msra.gmra.mrb[2].mxu1 %vm161_vm0, %v1899_v27  ;;  %v135_v25 = vld [vmem:[%s2416_s1 + $0x3c0] sm:$0xff]  ;;  %v1654_v29 = vpack.c.bf16 %v133_v23, %v98_v22  ;;  %v97_v30 = vld [vmem:[%s2416_s1 + $0x290] sm:$0xff]  ;;  %v132_v31 = vld [vmem:[%s2416_s1 + $0x3a8] sm:$0xff] }
  0x16   :  { %1645 = vmatpush1.bf16.msra.mxu1 %v1644_v2  ;;  %1639 = vmatprep.subr.bf16.mxu0 %v1638_v4  ;;  %v99_v32 = vld [vmem:[%s2416_s1 + $0x2a0] sm:$0xff]  ;;  %v1662_v33 = vpack.c.bf16 %v135_v25, %v100_v24  ;;  %v134_v34 = vld [vmem:[%s2416_s1 + $0x3b8] sm:$0xff]  ;;  %v32_v35 = vld [vmem:[%s2416_s1 + $0x88] sm:$0xff]  ;;  %v1656_v39 = vpack.c.bf16 %v132_v31, %v97_v30 }
  0x17   :  { %1647 = vmatprep.subr.bf16.mxu1 %v1646_v8  ;;  %513 = vmatprep.mubr.f32.mxu0 %v1819_v3  ;;  %v67_v36 = vld [vmem:[%s2416_s1 + $0x1a0] sm:$0xff]  ;;  %v34_v37 = vld [vmem:[%s2416_s1 + $0x98] sm:$0xff]  ;;  %v69_v38 = vld [vmem:[%s2416_s1 + $0x1b0] sm:$0xff]  ;;  %v1664_v40 = vpack.c.bf16 %v134_v34, %v99_v32 }
  0x18   :  { %584 = vmatprep.mubr.f32.mxu1 %v1819_v3  ;;  %v1666_v41 = vpack.c.bf16 %v67_v36, %v32_v35  ;;  %v31_v42 = vld [vmem:[%s2416_s1 + $0x80] sm:$0xff]  ;;  %v66_v43 = vld [vmem:[%s2416_s1 + $0x198] sm:$0xff]  ;;  %v33_v44 = vld [vmem:[%s2416_s1 + $0x90] sm:$0xff]  ;;  %v1674_v45 = vpack.c.bf16 %v69_v38, %v34_v37 }
  0x19   :  { %1641 = vmatpush1.bf16.msra.mxu0 %v1640_v14  ;;  %v68_v46 = vld [vmem:[%s2416_s1 + $0x1a8] sm:$0xff]  ;;  %v102_v47 = vld [vmem:[%s2416_s1 + $0x2b8] sm:$0xff]  ;;  %v137_v48 = vld [vmem:[%s2416_s1 + $0x3d0] sm:$0xff]  ;;  %v1668_v51 = vpack.c.bf16 %v66_v43, %v31_v42 }
  0x1a   :  { %1649 = vmatpush1.bf16.msra.mxu1 %v1648_v15  ;;  %1651 = vmatprep.subr.bf16.mxu0 %v1650_v16  ;;  %v104_v49 = vld [vmem:[%s2416_s1 + $0x2c8] sm:$0xff]  ;;  %v139_v50 = vld [vmem:[%s2416_s1 + $0x3e0] sm:$0xff]  ;;  %v1676_v52 = vpack.c.bf16 %v68_v46, %v33_v44  ;;  %v1670_v53 = vpack.c.bf16 %v137_v48, %v102_v47  ;;  %v101_v54 = vld [vmem:[%s2416_s1 + $0x2b0] sm:$0xff] }
  0x1b   :  { %1659 = vmatprep.subr.bf16.mxu1 %v1658_v20  ;;  %v136_v55 = vld [vmem:[%s2416_s1 + $0x3c8] sm:$0xff]  ;;  %v103_v56 = vld [vmem:[%s2416_s1 + $0x2c0] sm:$0xff]  ;;  %v1678_v57 = vpack.c.bf16 %v139_v50, %v104_v49  ;;  %v138_v58 = vld [vmem:[%s2416_s1 + $0x3d8] sm:$0xff] }
  0x1c   :  { %1572 = vmatmul.mubr.msk.f32.vlgmr.msra.gmra.mrb[4].mxu0 %vm161_vm0, %v1899_v27  ;;  %v36_v59 = vld [vmem:[%s2416_s1 + $0xa8] sm:$0xff]  ;;  %v71_v60 = vld [vmem:[%s2416_s1 + $0x1c0] sm:$0xff]  ;;  %v38_v61 = vld [vmem:[%s2416_s1 + $0xb8] sm:$0xff]  ;;  %v1672_v63 = vpack.c.bf16 %v136_v55, %v101_v54  ;;  %v1680_v0 = vpack.c.bf16 %v138_v58, %v103_v56 }
  0x1d   :  { %1653 = vmatpush1.bf16.msra.mxu0 %v1652_v26  ;;  %1573 = vmatmul.mubr.msk.f32.vlgmr.msra.gmra.mrb[4].mxu1 %vm161_vm0, %v1899_v27  ;;  %v73_v62 = vld [vmem:[%s2416_s1 + $0x1d0] sm:$0xff]  ;;  %v1682_v1 = vpack.c.bf16 %v71_v60, %v36_v59  ;;  %v35_v2 = vld [vmem:[%s2416_s1 + $0xa0] sm:$0xff]  ;;  %v70_v4 = vld [vmem:[%s2416_s1 + $0x1b8] sm:$0xff] }
  0x1e   :  { %1661 = vmatpush1.bf16.msra.mxu1 %v1660_v28  ;;  %1655 = vmatprep.subr.bf16.mxu0 %v1654_v29  ;;  %v37_v5 = vld [vmem:[%s2416_s1 + $0xb0] sm:$0xff]  ;;  %v1690_v6 = vpack.c.bf16 %v73_v62, %v38_v61  ;;  %v72_v7 = vld [vmem:[%s2416_s1 + $0x1c8] sm:$0xff]  ;;  %v106_v8 = vld [vmem:[%s2416_s1 + $0x2d8] sm:$0xff]  ;;  %v1684_v12 = vpack.c.bf16 %v70_v4, %v35_v2 }
  0x1f   :  { %1663 = vmatprep.subr.bf16.mxu1 %v1662_v33  ;;  %655 = vmatprep.mubr.f32.mxu0 %v1819_v3  ;;  %v141_v9 = vld [vmem:[%s2416_s1 + $0x3f0] sm:$0xff]  ;;  %v108_v10 = vld [vmem:[%s2416_s1 + $0x2e8] sm:$0xff]  ;;  %v143_v11 = vld [vmem:[%s2416_s1 + $0x400] sm:$0xff]  ;;  %v1692_v13 = vpack.c.bf16 %v72_v7, %v37_v5 }
  0x20   :  { %726 = vmatprep.mubr.f32.mxu1 %v1819_v3  ;;  %v1686_v14 = vpack.c.bf16 %v141_v9, %v106_v8  ;;  %v105_v15 = vld [vmem:[%s2416_s1 + $0x2d0] sm:$0xff]  ;;  %v140_v16 = vld [vmem:[%s2416_s1 + $0x3e8] sm:$0xff]  ;;  %v107_v17 = vld [vmem:[%s2416_s1 + $0x2e0] sm:$0xff]  ;;  %v1694_v18 = vpack.c.bf16 %v143_v11, %v108_v10 }
  0x21   :  { %1657 = vmatpush1.bf16.msra.mxu0 %v1656_v39  ;;  %v142_v19 = vld [vmem:[%s2416_s1 + $0x3f8] sm:$0xff]  ;;  %v40_v20 = vld [vmem:[%s2416_s1 + $0xc8] sm:$0xff]  ;;  %v75_v21 = vld [vmem:[%s2416_s1 + $0x1e0] sm:$0xff]  ;;  %v1688_v24 = vpack.c.bf16 %v140_v16, %v105_v15 }
  0x22   :  { %1665 = vmatpush1.bf16.msra.mxu1 %v1664_v40  ;;  %1667 = vmatprep.subr.bf16.mxu0 %v1666_v41  ;;  %v42_v22 = vld [vmem:[%s2416_s1 + $0xd8] sm:$0xff]  ;;  %v77_v23 = vld [vmem:[%s2416_s1 + $0x1f0] sm:$0xff]  ;;  %v1696_v25 = vpack.c.bf16 %v142_v19, %v107_v17  ;;  %v1698_v26 = vpack.c.bf16 %v75_v21, %v40_v20  ;;  %v39_v28 = vld [vmem:[%s2416_s1 + $0xc0] sm:$0xff] }
  0x23   :  { %1675 = vmatprep.subr.bf16.mxu1 %v1674_v45  ;;  %v74_v29 = vld [vmem:[%s2416_s1 + $0x1d8] sm:$0xff]  ;;  %v41_v30 = vld [vmem:[%s2416_s1 + $0xd0] sm:$0xff]  ;;  %v1706_v31 = vpack.c.bf16 %v77_v23, %v42_v22  ;;  %v76_v32 = vld [vmem:[%s2416_s1 + $0x1e8] sm:$0xff]  ;;  %v1821_v23 = vmov 0.0|0.0  }
  0x24   :  { %1574 = vmatmul.mubr.msk.f32.vlgmr.msra.gmra.mrb[6].mxu0 %vm161_vm0, %v1899_v27  ;;  %v110_v33 = vld [vmem:[%s2416_s1 + $0x2f8] sm:$0xff]  ;;  %v145_v34 = vld [vmem:[%s2416_s1 + $0x410] sm:$0xff]  ;;  %v112_v35 = vld [vmem:[%s2416_s1 + $0x308] sm:$0xff]  ;;  %v1700_v38 = vpack.c.bf16 %v74_v29, %v39_v28  ;;  %v1708_v39 = vpack.c.bf16 %v76_v32, %v41_v30 }
  0x25   :  { %1669 = vmatpush1.bf16.msra.mxu0 %v1668_v51  ;;  %1575 = vmatmul.mubr.msk.f32.vlgmr.msra.gmra.mrb[6].mxu1 %vm161_vm0, %v1899_v27  ;;  %v147_v36 = vld [vmem:[%s2416_s1 + $0x420] sm:$0xff]  ;;  %v1702_v40 = vpack.c.bf16 %v145_v34, %v110_v33  ;;  %v109_v41 = vld [vmem:[%s2416_s1 + $0x2f0] sm:$0xff]  ;;  %v144_v42 = vld [vmem:[%s2416_s1 + $0x408] sm:$0xff] }
  0x26   :  { %1677 = vmatpush1.bf16.msra.mxu1 %v1676_v52  ;;  %1671 = vmatprep.subr.bf16.mxu0 %v1670_v53  ;;  %v155_v37 = vld [vmem:[%s2418_s2] sm:$0xf]  ;;  %v1710_v44 = vpack.c.bf16 %v147_v36, %v112_v35  ;;  %v146_v45 = vld [vmem:[%s2416_s1 + $0x418] sm:$0xff]  ;;  %v44_v46 = vld [vmem:[%s2416_s1 + $0xe8] sm:$0xff]  ;;  %v1704_v50 = vpack.c.bf16 %v144_v42, %v109_v41 }
  0x27   :  { %1679 = vmatprep.subr.bf16.mxu1 %v1678_v57  ;;  %797 = vmatprep.mubr.f32.mxu0 %v1819_v3  ;;  %v111_v43 = vld [vmem:[%s2416_s1 + $0x300] sm:$0xff]  ;;  %v46_v48 = vld [vmem:[%s2416_s1 + $0xf8] sm:$0xff]  ;;  %v81_v49 = vld [vmem:[%s2416_s1 + $0x210] sm:$0xff] }
  0x28   :  { %868 = vmatprep.mubr.f32.mxu1 %v1819_v3  ;;  %158 = vperm.xlu0 %1748, %v155_v37   ;;  %v79_v47 = vld [vmem:[%s2416_s1 + $0x200] sm:$0xff]  ;;  %v1712_v51 = vpack.c.bf16 %v146_v45, %v111_v43  ;;  %v78_v54 = vld [vmem:[%s2416_s1 + $0x1f8] sm:$0xff]  ;;  %v45_v55 = vld [vmem:[%s2416_s1 + $0xf0] sm:$0xff]  ;;  %v1722_v56 = vpack.c.bf16 %v81_v49, %v46_v48 }
  0x29   :  { %1673 = vmatpush1.bf16.msra.mxu0 %v1672_v63  ;;  %v1714_v52 = vpack.c.bf16 %v79_v47, %v44_v46  ;;  %v43_v53 = vld [vmem:[%s2416_s1 + $0xe0] sm:$0xff]  ;;  %v80_v57 = vld [vmem:[%s2416_s1 + $0x208] sm:$0xff]  ;;  %v114_v58 = vld [vmem:[%s2416_s1 + $0x318] sm:$0xff] }
  0x2a   :  { %1681 = vmatpush1.bf16.msra.mxu1 %v1680_v0  ;;  %1683 = vmatprep.subr.bf16.mxu0 %v1682_v1  ;;  %v149_v59 = vld [vmem:[%s2416_s1 + $0x430] sm:$0xff]  ;;  %v116_v60 = vld [vmem:[%s2416_s1 + $0x328] sm:$0xff]  ;;  %v151_v61 = vld [vmem:[%s2416_s1 + $0x440] sm:$0xff]  ;;  %v1716_v62 = vpack.c.bf16 %v78_v54, %v43_v53  ;;  %v1724_v63 = vpack.c.bf16 %v80_v57, %v45_v55 }
  0x2b   :  { %1691 = vmatprep.subr.bf16.mxu1 %v1690_v6  ;;  %v1718_v0 = vpack.c.bf16 %v149_v59, %v114_v58  ;;  %v113_v1 = vld [vmem:[%s2416_s1 + $0x310] sm:$0xff]  ;;  %v148_v2 = vld [vmem:[%s2416_s1 + $0x428] sm:$0xff]  ;;  %v115_v4 = vld [vmem:[%s2416_s1 + $0x320] sm:$0xff]  ;;  %v1726_v5 = vpack.c.bf16 %v151_v61, %v116_v60 }
  0x2c   :  { %1576 = vmatmul.mubr.msk.f32.vlgmr.msra.gmra.mrb[8].mxu0 %vm161_vm0, %v1899_v27  ;;  %v150_v6 = vld [vmem:[%s2416_s1 + $0x438] sm:$0xff]  ;;  %v48_v7 = vld [vmem:[%s2416_s1 + $0x108] sm:$0xff]  ;;  %v83_v8 = vld [vmem:[%s2416_s1 + $0x220] sm:$0xff]  ;;  %v1720_v9 = vpack.c.bf16 %v148_v2, %v113_v1 }
  0x2d   :  { %1685 = vmatpush1.bf16.msra.mxu0 %v1684_v12  ;;  %1577 = vmatmul.mubr.msk.f32.vlgmr.msra.gmra.mrb[8].mxu1 %vm161_vm0, %v1899_v27  ;;  %v1728_v10 = vpack.c.bf16 %v150_v6, %v115_v4  ;;  %v1730_v11 = vpack.c.bf16 %v83_v8, %v48_v7  ;;  %v47_v12 = vld [vmem:[%s2416_s1 + $0x100] sm:$0xff]  ;;  %v84_v15 = vld [vmem:[%s2416_s1 + $0x228] sm:$0xff]  ;;  %v118_v16 = vld [vmem:[%s2416_s1 + $0x338] sm:$0xff] }
  0x2e   :  { %1693 = vmatpush1.bf16.msra.mxu1 %v1692_v13  ;;  %1687 = vmatprep.subr.bf16.mxu0 %v1686_v14  ;;  %v82_v13 = vld [vmem:[%s2416_s1 + $0x218] sm:$0xff]  ;;  %v49_v14 = vld [vmem:[%s2416_s1 + $0x110] sm:$0xff]  ;;  %v152_v22 = vld [vmem:[%s2416_s1 + $0x448] sm:$0xff] }
  0x2f   :  { %1695 = vmatprep.subr.bf16.mxu1 %v1694_v18  ;;  %939 = vmatprep.mubr.f32.mxu0 %v1819_v3  ;;  %v153_v17 = vld [vmem:[%s2416_s1 + $0x450] sm:$0xff]  ;;  %v1732_v18 = vpack.c.bf16 %v82_v13, %v47_v12  ;;  %v1739_v19 = vpack.c.bf16 %v84_v15, %v49_v14 }
  0x30   :  { %1010 = vmatprep.mubr.f32.mxu1 %v1819_v3  ;;  %v1734_v20 = vpack.c.bf16 %v153_v17, %v118_v16  ;;  %v117_v21 = vld [vmem:[%s2416_s1 + $0x330] sm:$0xff] }
  0x31   :  { %1689 = vmatpush1.bf16.msra.mxu0 %v1688_v24  ;;  %v119_v24 = vld [vmem:[%s2416_s1 + $0x340] sm:$0xff] }
  0x32   :  { %1697 = vmatpush1.bf16.msra.mxu1 %v1696_v25  ;;  %1699 = vmatprep.subr.bf16.mxu0 %v1698_v26  ;;  %v154_v25 = vld [vmem:[%s2416_s1 + $0x458] sm:$0xff]  ;;  %v1736_v26 = vpack.c.bf16 %v152_v22, %v117_v21 }
  0x33   :  { %1707 = vmatprep.subr.bf16.mxu1 %v1706_v31  ;;  %v1742_v28 = vpack.c.bf16 %v154_v25, %v119_v24 }
  0x34   :  { %1578 = vmatmul.mubr.msk.f32.vlgmr.msra.gmra.mrb[10].mxu0 %vm161_vm0, %v1899_v27 }
  0x35   :  { %1701 = vmatpush1.bf16.msra.mxu0 %v1700_v38  ;;  %1579 = vmatmul.mubr.msk.f32.vlgmr.msra.gmra.mrb[10].mxu1 %vm161_vm0, %v1899_v27 }
  0x36   :  { %1709 = vmatpush1.bf16.msra.mxu1 %v1708_v39  ;;  %1703 = vmatprep.subr.bf16.mxu0 %v1702_v40 }
  0x37   :  { %1711 = vmatprep.subr.bf16.mxu1 %v1710_v44  ;;  %1081 = vmatprep.mubr.f32.mxu0 %v1819_v3 }
  0x38   :  { %1152 = vmatprep.mubr.f32.mxu1 %v1819_v3 }
  0x39   :  { %1705 = vmatpush1.bf16.msra.mxu0 %v1704_v50 }
  0x3a   :  { %1713 = vmatpush1.bf16.msra.mxu1 %v1712_v51  ;;  %1715 = vmatprep.subr.bf16.mxu0 %v1714_v52 }
  0x3b   :  { %1723 = vmatprep.subr.bf16.mxu1 %v1722_v56 }
  0x3c   :  { %1580 = vmatmul.mubr.msk.f32.vlgmr.msra.gmra.mrb[12].mxu0 %vm161_vm0, %v1899_v27 }
  0x3d   :  { %1717 = vmatpush1.bf16.msra.mxu0 %v1716_v62  ;;  %1581 = vmatmul.mubr.msk.f32.vlgmr.msra.gmra.mrb[12].mxu1 %vm161_vm0, %v1899_v27 }
  0x3e   :  { %1725 = vmatpush1.bf16.msra.mxu1 %v1724_v63  ;;  %1719 = vmatprep.subr.bf16.mxu0 %v1718_v0 }
  0x3f   :  { %1727 = vmatprep.subr.bf16.mxu1 %v1726_v5  ;;  %1223 = vmatprep.mubr.f32.mxu0 %v1819_v3 }
  0x40   :  { %1294 = vmatprep.mubr.f32.mxu1 %v1819_v3 }
  0x41   :  { %1721 = vmatpush1.bf16.msra.mxu0 %v1720_v9 }
  0x42   :  { %1729 = vmatpush1.bf16.msra.mxu1 %v1728_v10  ;;  %1731 = vmatprep.subr.bf16.mxu0 %v1730_v11 }
  0x43   :  { %1738 = vmatprep.subr.bf16.mxu1 %v1821_v23 }
  0x44   :  { %1582 = vmatmul.mubr.msk.f32.vlgmr.msra.gmra.mrb[14].mxu0 %vm161_vm0, %v1899_v27 }
  0x45   :  { %1733 = vmatpush1.bf16.msra.mxu0 %v1732_v18  ;;  %1583 = vmatmul.mubr.msk.f32.vlgmr.msra.gmra.mrb[14].mxu1 %vm161_vm0, %v1899_v27 }
  0x46   :  { %1740 = vmatpush3.bf16.msra.mxu1 %v1739_v19  ;;  %1735 = vmatprep.subr.bf16.mxu0 %v1734_v20 }
  0x47   :  { %1741 = vmatprep.subr.bf16.mxu1 %v1821_v23  ;;  %1365 = vmatprep.mubr.f32.mxu0 %v1819_v3 }
  0x48   :  { %1599 = vmatprep.mubr.msk.f32.mxu1 %vm1822_vm1, %v1819_v3 }
  0x49   :  { %1737 = vmatpush1.bf16.msra.mxu0 %v1736_v26 }
  0x4a   :  { %1743 = vmatpush3.bf16.msra.mxu1 %v1742_v28 }
  0x4c   :  { %1584 = vmatmul.mubr.msk.f32.vlgmr.msra.gmra.mrb[16].mxu0 %vm161_vm0, %v1899_v27 }
  0x4d   :  { %1600 = vmatmul.mubr.msk.f32.vlgmr.msra.gmra.mrb[16].mxu1 %vm161_vm0, %v1899_v27 }
  0xa7   :  { %v2325_v29 = vpop.permute.xlu0 %158 }
  0xdf   :  { %v231_v30 = vpop.f32.mrb[0].mxu0 }
  0xe0   :  { %v232_v31 = vadd.f32 %v231_v30, %v2325_v29  ;;  %v233_v32 = vpop.f32.mrb[1].mxu0  ;;  %v302_v33 = vpop.f32.mrb[0].mxu1 }
  0xe1   :  { %v234_v34 = vadd.f32 %v233_v32, %v2325_v29  ;;  %v303_v35 = vadd.f32 %v302_v33, %v2325_v29  ;;  %v304_v3 = vpop.f32.mrb[1].mxu1 }
  0xe2   :  { %1749 = vtanh.f32 %v232_v31  ;;  %v305_v36 = vadd.f32 %v304_v3, %v2325_v29 }
  0xe3   :  { %1751 = vtanh.f32 %v234_v34 }
  0xe4   :  { %1753 = vtanh.f32 %v303_v35 }
  0xe5   :  { %1755 = vtanh.f32 %v305_v36 }
  0xe7   :  { %v373_v37 = vpop.f32.mrb[2].mxu0 }
  0xe8   :  { %v374_v27 = vadd.f32 %v373_v37, %v2325_v29  ;;  %v375_v38 = vpop.f32.mrb[3].mxu0  ;;  %v444_v39 = vpop.f32.mrb[2].mxu1 }
  0xe9   :  { %v376_v40 = vadd.f32 %v375_v38, %v2325_v29  ;;  %v445_v41 = vadd.f32 %v444_v39, %v2325_v29  ;;  %v446_v42 = vpop.f32.mrb[3].mxu1 }
  0xea   :  { %1757 = vtanh.f32 %v374_v27  ;;  %v447_v43 = vadd.f32 %v446_v42, %v2325_v29 }
  0xeb   :  { %1759 = vtanh.f32 %v376_v40 }
  0xec   :  { %v1750_v44 = vpop.eup %1749  ;;  %1761 = vtanh.f32 %v445_v41 }
  0xed   :  { %v1752_v45 = vpop.eup %1751  ;;  %1763 = vtanh.f32 %v447_v43 }
  0xee   :  { %v1754_v46 = vpop.eup %1753  ;;  %v1511_v47 = vcombine.low %v1750_v44, %v1752_v45 }
  0xef   :  { %v1756_v48 = vpop.eup %1755  ;;  %v515_v49 = vpop.f32.mrb[4].mxu0 }
  0xf0   :  { %1545 = vst [vmem:[%s2419_s3] sm:$0xff] %v1511_v47  ;;  %v1512_v50 = vcombine.low %v1754_v46, %v1756_v48  ;;  %v516_v51 = vadd.f32 %v515_v49, %v2325_v29  ;;  %v517_v52 = vpop.f32.mrb[5].mxu0  ;;  %v586_v53 = vpop.f32.mrb[4].mxu1 }
  0xf1   :  { %v518_v54 = vadd.f32 %v517_v52, %v2325_v29  ;;  %v587_v55 = vadd.f32 %v586_v53, %v2325_v29  ;;  %v588_v56 = vpop.f32.mrb[5].mxu1 }
  0xf2   :  { %1546 = vst [vmem:[%s2419_s3 + $0x8] sm:$0xff] %v1512_v50  ;;  %1765 = vtanh.f32 %v516_v51  ;;  %v589_v57 = vadd.f32 %v588_v56, %v2325_v29 }
  0xf3   :  { %1767 = vtanh.f32 %v518_v54 }
  0xf4   :  { %v1758_v58 = vpop.eup %1757  ;;  %1769 = vtanh.f32 %v587_v55 }
  0xf5   :  { %v1760_v59 = vpop.eup %1759  ;;  %1771 = vtanh.f32 %v589_v57 }
  0xf6   :  { %v1762_v60 = vpop.eup %1761  ;;  %v1513_v61 = vcombine.low %v1758_v58, %v1760_v59 }
  0xf7   :  { %v1764_v62 = vpop.eup %1763  ;;  %v657_v63 = vpop.f32.mrb[6].mxu0 }
  0xf8   :  { %1547 = vst [vmem:[%s2419_s3 + $0x10] sm:$0xff] %v1513_v61  ;;  %v1514_v0 = vcombine.low %v1762_v60, %v1764_v62  ;;  %v658_v1 = vadd.f32 %v657_v63, %v2325_v29  ;;  %v659_v2 = vpop.f32.mrb[7].mxu0  ;;  %v728_v4 = vpop.f32.mrb[6].mxu1 }
  0xf9   :  { %v660_v5 = vadd.f32 %v659_v2, %v2325_v29  ;;  %v729_v6 = vadd.f32 %v728_v4, %v2325_v29  ;;  %v730_v7 = vpop.f32.mrb[7].mxu1 }
  0xfa   :  { %1548 = vst [vmem:[%s2419_s3 + $0x18] sm:$0xff] %v1514_v0  ;;  %1773 = vtanh.f32 %v658_v1  ;;  %v731_v8 = vadd.f32 %v730_v7, %v2325_v29 }
  0xfb   :  { %1775 = vtanh.f32 %v660_v5 }
  0xfc   :  { %v1766_v9 = vpop.eup %1765  ;;  %1777 = vtanh.f32 %v729_v6 }
  0xfd   :  { %v1768_v10 = vpop.eup %1767  ;;  %1779 = vtanh.f32 %v731_v8 }
  0xfe   :  { %v1770_v11 = vpop.eup %1769  ;;  %v1515_v12 = vcombine.low %v1766_v9, %v1768_v10 }
  0xff   :  { %v1772_v13 = vpop.eup %1771  ;;  %v799_v14 = vpop.f32.mrb[8].mxu0 }
 0x100   :  { %1549 = vst [vmem:[%s2419_s3 + $0x20] sm:$0xff] %v1515_v12  ;;  %v1516_v15 = vcombine.low %v1770_v11, %v1772_v13  ;;  %v800_v16 = vadd.f32 %v799_v14, %v2325_v29  ;;  %v801_v17 = vpop.f32.mrb[9].mxu0  ;;  %v870_v18 = vpop.f32.mrb[8].mxu1 }
 0x101   :  { %v802_v19 = vadd.f32 %v801_v17, %v2325_v29  ;;  %v871_v20 = vadd.f32 %v870_v18, %v2325_v29  ;;  %v872_v21 = vpop.f32.mrb[9].mxu1 }
 0x102   :  { %1550 = vst [vmem:[%s2419_s3 + $0x28] sm:$0xff] %v1516_v15  ;;  %1781 = vtanh.f32 %v800_v16  ;;  %v873_v22 = vadd.f32 %v872_v21, %v2325_v29 }
 0x103   :  { %1783 = vtanh.f32 %v802_v19 }
 0x104   :  { %v1774_v23 = vpop.eup %1773  ;;  %1785 = vtanh.f32 %v871_v20 }
 0x105   :  { %v1776_v24 = vpop.eup %1775  ;;  %1787 = vtanh.f32 %v873_v22 }
 0x106   :  { %v1778_v25 = vpop.eup %1777  ;;  %v1517_v26 = vcombine.low %v1774_v23, %v1776_v24 }
 0x107   :  { %v1780_v28 = vpop.eup %1779  ;;  %v941_v30 = vpop.f32.mrb[10].mxu0 }
 0x108   :  { %1551 = vst [vmem:[%s2419_s3 + $0x30] sm:$0xff] %v1517_v26  ;;  %v1518_v31 = vcombine.low %v1778_v25, %v1780_v28  ;;  %v942_v32 = vadd.f32 %v941_v30, %v2325_v29  ;;  %v943_v33 = vpop.f32.mrb[11].mxu0  ;;  %v1012_v34 = vpop.f32.mrb[10].mxu1 }
 0x109   :  { %v944_v35 = vadd.f32 %v943_v33, %v2325_v29  ;;  %v1013_v3 = vadd.f32 %v1012_v34, %v2325_v29  ;;  %v1014_v36 = vpop.f32.mrb[11].mxu1 }
 0x10a   :  { %1552 = vst [vmem:[%s2419_s3 + $0x38] sm:$0xff] %v1518_v31  ;;  %1789 = vtanh.f32 %v942_v32  ;;  %v1015_v37 = vadd.f32 %v1014_v36, %v2325_v29 }
 0x10b   :  { %1791 = vtanh.f32 %v944_v35 }
 0x10c   :  { %v1782_v27 = vpop.eup %1781  ;;  %1793 = vtanh.f32 %v1013_v3 }
 0x10d   :  { %v1784_v38 = vpop.eup %1783  ;;  %1795 = vtanh.f32 %v1015_v37 }
 0x10e   :  { %v1786_v39 = vpop.eup %1785  ;;  %v1519_v40 = vcombine.low %v1782_v27, %v1784_v38 }
 0x10f   :  { %v1788_v41 = vpop.eup %1787  ;;  %v1083_v42 = vpop.f32.mrb[12].mxu0 }
 0x110   :  { %1553 = vst [vmem:[%s2419_s3 + $0x40] sm:$0xff] %v1519_v40  ;;  %v1520_v43 = vcombine.low %v1786_v39, %v1788_v41  ;;  %v1084_v44 = vadd.f32 %v1083_v42, %v2325_v29  ;;  %v1085_v45 = vpop.f32.mrb[13].mxu0  ;;  %v1154_v46 = vpop.f32.mrb[12].mxu1 }
 0x111   :  { %v1086_v47 = vadd.f32 %v1085_v45, %v2325_v29  ;;  %v1155_v48 = vadd.f32 %v1154_v46, %v2325_v29  ;;  %v1156_v49 = vpop.f32.mrb[13].mxu1 }
 0x112   :  { %1554 = vst [vmem:[%s2419_s3 + $0x48] sm:$0xff] %v1520_v43  ;;  %1797 = vtanh.f32 %v1084_v44  ;;  %v1157_v50 = vadd.f32 %v1156_v49, %v2325_v29 }
 0x113   :  { %1799 = vtanh.f32 %v1086_v47 }
 0x114   :  { %v1790_v51 = vpop.eup %1789  ;;  %1801 = vtanh.f32 %v1155_v48 }
 0x115   :  { %v1792_v52 = vpop.eup %1791  ;;  %1803 = vtanh.f32 %v1157_v50 }
 0x116   :  { %v1794_v53 = vpop.eup %1793  ;;  %v1521_v54 = vcombine.low %v1790_v51, %v1792_v52 }
 0x117   :  { %v1796_v55 = vpop.eup %1795  ;;  %v1225_v56 = vpop.f32.mrb[14].mxu0 }
 0x118   :  { %1555 = vst [vmem:[%s2419_s3 + $0x50] sm:$0xff] %v1521_v54  ;;  %v1522_v57 = vcombine.low %v1794_v53, %v1796_v55  ;;  %v1226_v58 = vadd.f32 %v1225_v56, %v2325_v29  ;;  %v1227_v59 = vpop.f32.mrb[15].mxu0  ;;  %v1296_v60 = vpop.f32.mrb[14].mxu1 }
 0x119   :  { %v1228_v61 = vadd.f32 %v1227_v59, %v2325_v29  ;;  %v1297_v62 = vadd.f32 %v1296_v60, %v2325_v29  ;;  %v1298_v63 = vpop.f32.mrb[15].mxu1 }
 0x11a   :  { %1556 = vst [vmem:[%s2419_s3 + $0x58] sm:$0xff] %v1522_v57  ;;  %1805 = vtanh.f32 %v1226_v58  ;;  %v1299_v0 = vadd.f32 %v1298_v63, %v2325_v29 }
 0x11b   :  { %1807 = vtanh.f32 %v1228_v61 }
 0x11c   :  { %v1798_v1 = vpop.eup %1797  ;;  %1809 = vtanh.f32 %v1297_v62 }
 0x11d   :  { %v1800_v2 = vpop.eup %1799  ;;  %1811 = vtanh.f32 %v1299_v0 }
 0x11e   :  { %v1802_v4 = vpop.eup %1801  ;;  %v1523_v5 = vcombine.low %v1798_v1, %v1800_v2 }
 0x11f   :  { %v1804_v6 = vpop.eup %1803  ;;  %v1367_v7 = vpop.f32.mrb[16].mxu0 }
 0x120   :  { %1557 = vst [vmem:[%s2419_s3 + $0x60] sm:$0xff] %v1523_v5  ;;  %v1524_v8 = vcombine.low %v1802_v4, %v1804_v6  ;;  %v1368_v9 = vadd.f32 %v1367_v7, %v2325_v29  ;;  %v1369_v10 = vpop.f32.mrb[17].mxu0  ;;  %v1438_v11 = vpop.f32.mrb[16].mxu1 }
 0x121   :  { %v1370_v12 = vadd.f32 %v1369_v10, %v2325_v29  ;;  %v1439_v13 = vadd.f32 %v1438_v11, %v2325_v29  ;;  %v1601_v14 = vpop.f32.mrb[17].mxu1 }
 0x122   :  { %1558 = vst [vmem:[%s2419_s3 + $0x68] sm:$0xff] %v1524_v8  ;;  %1813 = vtanh.f32 %v1368_v9 }
 0x123   :  { %1815 = vtanh.f32 %v1370_v12 }
 0x124   :  { %v1806_v15 = vpop.eup %1805  ;;  %1817 = vtanh.f32 %v1439_v13 }
 0x125   :  { %v1808_v16 = vpop.eup %1807 }
 0x126   :  { %v1810_v17 = vpop.eup %1809  ;;  %v1525_v18 = vcombine.low %v1806_v15, %v1808_v16 }
 0x127   :  { %v1812_v19 = vpop.eup %1811 }
 0x128   :  { %1559 = vst [vmem:[%s2419_s3 + $0x70] sm:$0xff] %v1525_v18  ;;  %v1526_v20 = vcombine.low %v1810_v17, %v1812_v19 }
 0x12a   :  { %1560 = vst [vmem:[%s2419_s3 + $0x78] sm:$0xff] %v1526_v20 }
 0x12c   :  { %v1814_v29 = vpop.eup %1813 }
 0x12d   :  { %v1816_v21 = vpop.eup %1815 }
 0x12e   :  { %v1818_v22 = vpop.eup %1817  ;;  %v1527_v23 = vcombine.low %v1814_v29, %v1816_v21 }
 0x12f   :  { %1563 = vst.msk [vmem:[%s2419_s3 + $0x88] sm:$0xf] %vm1562_vm2, %v1818_v22 }
 0x130   :  { %1561 = vst [vmem:[%s2419_s3 + $0x80] sm:$0xff] %v1527_v23 }

</bundles_post_ra>
